<compile_context>
chip_gen: v7x
topology: tpu7x:2x2x1
jax: 0.10.0
libtpu: 0.0.40
codegen_flags: <defaults>
</compile_context>

<pallas_src>
import functools

import jax
import jax.numpy as jnp
from jax.experimental import pallas as pl
from jax.experimental.pallas import tpu as pltpu


def _round_up(a, b):
    return ((a + b - 1) // b) * b


def _cdiv(a, b):
    return (a + b - 1) // b


def _resnet_block_kernel(xe_ref, me_ref, t_ref,
                         w1_ref, b1_ref, wt_ref, bt_ref,
                         w2_ref, b2_ref, wr_ref, br_ref,
                         out_ref, he_ref, *, wp, e2, tr, res_mode):
    # xe_ref : (1, Sext, Cin)  bf16  zero-extended, spatially padded input rows
    # me_ref : (Sext, 1)       f32   1.0 on interior rows, 0.0 elsewhere
    # t_ref  : (1, 1, T)       f32   raw time embedding for this batch element
    # w1_ref : (9, Cin, Cp)    bf16  conv1 taps (BN1 folded);  b1_ref: (1, Cp) f32
    # wt_ref : (T, Cp)         bf16  time-MLP linear;          bt_ref: (1, Cp) f32
    # w2_ref : (9, Cp, Cp)     bf16  conv2 taps (BN2 folded);  b2_ref: (1, Cp) f32
    # wr_ref : (Cin, Cp)       bf16  1x1 residual conv;        br_ref: (1, Cp) f32
    # out_ref: (1, TR, Cp)           output rows for this tile
    # he_ref : (TRE, Cp)       bf16  VMEM scratch: block1 output (tile + halo)
    f32, bf16 = jnp.float32, jnp.bfloat16
    tre = tr + 2 * e2            # block1 rows needed (tile + conv2 halo)
    win = tr + 4 * e2            # xe rows conv1 reads to produce those rows
    e = 2 * e2                   # zero-extension rows on each side of xe

    # first output row of this tile, in padded-spatial ("Sp") coordinates.
    row0 = pl.multiple_of(pl.program_id(1) * tr, 16)

    taps = [(dy - 1) * wp + (dx - 1) for dy in range(3) for dx in range(3)]

    # ---- conv1 input window: one 16-aligned dynamic slice, static per-tap
    # slices of the loaded value (window local j <-> xe row row0 + j).
    xwin = xe_ref[0, pl.ds(row0, win), :]                     # (win, Cin) bf16

    # ---- block1: 3x3 conv (BN1 folded) + bias + ReLU over the haloed rows.
    acc = None
    for tap, off in enumerate(taps):
        slab = xwin[e2 + off:e2 + off + tre, :]               # (TRE, Cin) bf16
        d = jnp.dot(slab, w1_ref[tap], preferred_element_type=f32)
        acc = d if acc is None else acc + d
    h = jnp.maximum(acc + b1_ref[...], 0.0)                   # (TRE, Cp) f32

    # ---- time-embedding MLP: Linear(SiLU(t)), broadcast over rows.
    tvec = t_ref[0].astype(f32)                               # (1, T)
    tvec = tvec * (1.0 / (1.0 + jnp.exp(-tvec)))              # SiLU on the EUP
    temb = jnp.dot(tvec.astype(bf16), wt_ref[...],
                   preferred_element_type=f32) + bt_ref[...]  # (1, Cp)

    # zero pad/extension rows so they act as conv2's zero padding; stage bf16.
    mask = me_ref[pl.ds(row0 + e2, tre), :]                   # (TRE, 1)
    he_ref[...] = ((h + temb) * mask).astype(bf16)

    # ---- block2: 3x3 conv (BN2 folded) + bias + ReLU over the tile rows.
    acc2 = None
    for tap, off in enumerate(taps):
        slab = he_ref[e2 + off:e2 + off + tr, :]              # (TR, Cp) bf16
        d = jnp.dot(slab, w2_ref[tap], preferred_element_type=f32)
        acc2 = d if acc2 is None else acc2 + d
    h2 = jnp.maximum(acc2 + b2_ref[...], 0.0)                 # (TR, Cp) f32

    # ---- residual path (compile-time specialized) -----------------------
    xres = xe_ref[0, pl.ds(row0 + e, tr), :]                  # (TR, Cin) bf16
    if res_mode == "conv":
        res = jnp.dot(xres, wr_ref[...],
                      preferred_element_type=f32) + br_ref[...]
    elif res_mode == "identity":        # dim == dim_out == padded lane width
        res = xres.astype(f32)
    else:                               # identity, but channels are lane-padded
        res = jnp.dot(xres, wr_ref[...], preferred_element_type=f32)

    out_ref[0] = (h2 + res).astype(out_ref.dtype)


def _fold_bn(w, b, gamma, beta, mean, var, eps):
    scale = gamma / jnp.sqrt(var + eps)
    return w * scale[:, None, None, None], (b - mean) * scale + beta


def resnet_block_forward(x, time_emb, p, *, eps=1e-5, target_rows=256):
    """Pallas forward of ResnetBlock (eval-mode BatchNorm). x is NCHW."""
    n, cin, h, w = x.shape
    cout = p["w1"].shape[0]
    hp, wp = h + 2, w + 2
    sp = hp * wp
    cpad = _round_up(cout, 128)          # lane-dense channel padding

    e2 = _round_up(wp + 1, 8)            # conv halo rows, sublane aligned
    e = 2 * e2                           # zero-extension band on each side
    n_tiles = max(1, _cdiv(sp, target_rows))
    tr = _round_up(_cdiv(sp, n_tiles), 16)     # tile rows (16-aligned for bf16)
    n_tiles = _cdiv(sp, tr)
    sp_pad = n_tiles * tr
    sext = sp_pad + 2 * e
    tre = tr + 2 * e2

    f32, bf16 = jnp.float32, jnp.bfloat16
    out_dtype = x.dtype

    # NCHW -> zero-padded NHWC rows, flattened + extended: (N, Sext, Cin) bf16.
    x_rows = jnp.transpose(x, (0, 2, 3, 1)).astype(f32)          # (N, H, W, C)
    x_rows = jnp.pad(x_rows, ((0, 0), (1, 1), (1, 1), (0, 0)))   # (N, Hp, Wp, C)
    x_rows = x_rows.reshape(n, sp, cin)
    x_rows = jnp.pad(x_rows, ((0, 0), (e, e + (sp_pad - sp)), (0, 0)))
    x_rows = x_rows.astype(bf16)

    # interior mask over the extended row space (0 on pad / extension rows).
    yy = jnp.arange(hp)[:, None]
    xx = jnp.arange(wp)[None, :]
    mask = ((yy >= 1) & (yy <= h) & (xx >= 1) & (xx <= w)).astype(f32)
    mask_ext = jnp.pad(mask.reshape(sp, 1), ((e, e + (sp_pad - sp)), (0, 0)))

    # fold eval-mode BN; tap-major layout; pad channels to cpad; bf16 weights.
    w1f, b1f = _fold_bn(p["w1"], p["b1"], p["g1"], p["be1"], p["m1"], p["v1"], eps)
    w2f, b2f = _fold_bn(p["w2"], p["b2"], p["g2"], p["be2"], p["m2"], p["v2"], eps)
    w1k = jnp.transpose(w1f, (2, 3, 1, 0)).reshape(9, cin, cout)
    w2k = jnp.transpose(w2f, (2, 3, 1, 0)).reshape(9, cout, cout)
    w1k = jnp.pad(w1k, ((0, 0), (0, 0), (0, cpad - cout))).astype(bf16)
    w2k = jnp.pad(w2k, ((0, 0), (0, cpad - cout), (0, cpad - cout))).astype(bf16)
    b1k = jnp.pad(b1f.reshape(1, cout), ((0, 0), (0, cpad - cout))).astype(f32)
    b2k = jnp.pad(b2f.reshape(1, cout), ((0, 0), (0, cpad - cout))).astype(f32)

    # time-embedding MLP (SiLU -> Linear); absent -> zero contribution.
    if time_emb is not None and p.get("wt") is not None:
        t_in = time_emb.astype(f32).reshape(n, 1, -1)
        wtk = jnp.pad(jnp.transpose(p["wt"]),
                      ((0, 0), (0, cpad - cout))).astype(bf16)       # (T, Cp)
        btk = jnp.pad(p["bt"].reshape(1, cout),
                      ((0, 0), (0, cpad - cout))).astype(f32)
    else:
        t_in = jnp.zeros((n, 1, 8), f32)
        wtk = jnp.zeros((8, cpad), bf16)
        btk = jnp.zeros((1, cpad), f32)
    t_feat = t_in.shape[-1]

    # residual path: 1x1 conv, or identity (compile-time specialized).
    if p.get("wr") is not None:
        res_mode = "conv"
        wrk = jnp.pad(jnp.transpose(p["wr"][:, :, 0, 0]),
                      ((0, 0), (0, cpad - cout))).astype(bf16)       # (Cin, Cp)
        brk = jnp.pad(p["br"].reshape(1, cout),
                      ((0, 0), (0, cpad - cout))).astype(f32)
    else:
        assert cin == cout, "identity residual requires dim == dim_out"
        res_mode = "identity" if cpad == cin else "identity_pad"
        wrk = jnp.pad(jnp.eye(cin, dtype=f32),
                      ((0, 0), (0, cpad - cin))).astype(bf16)
        brk = jnp.zeros((1, cpad), f32)

    # explicit VMEM budget from the actual block sizes (double-buffered
    # inputs/outputs + scratch + margin), clamped for v7x's 64 MiB.
    def nbytes(shape, dtype):
        sz = 1
        for d in shape:
            sz *= d
        return sz * jnp.dtype(dtype).itemsize

    blk = (nbytes((1, sext, cin), bf16) + nbytes((sext, 1), f32)
           + nbytes((1, 1, t_feat), f32)
           + nbytes((9, cin, cpad), bf16) + nbytes((9, cpad, cpad), bf16)
           + nbytes((t_feat, cpad), bf16) + nbytes((cin, cpad), bf16)
           + 4 * nbytes((1, cpad), f32)
           + nbytes((1, tr, cpad), out_dtype))
    scratch = nbytes((tre, cpad), bf16)
    vmem_limit = int(min(max(3 * blk + scratch + (4 << 20), 16 << 20), 64 << 20))

    kern = functools.partial(_resnet_block_kernel,
                             wp=wp, e2=e2, tr=tr, res_mode=res_mode)

    # NOTE: the weight/mask BlockSpecs are grid-invariant; for very large Cout
    # they could be single-buffered with pipeline_mode=pl.Buffered(1) to halve
    # their VMEM footprint (left at the default double-buffering here).
    out_rows = pl.pallas_call(
        kern,
        out_shape=jax.ShapeDtypeStruct((n, sp_pad, cpad), out_dtype),
        grid_spec=pltpu.PrefetchScalarGridSpec(
            num_scalar_prefetch=0,
            grid=(n, n_tiles),
            in_specs=[
                pl.BlockSpec((1, sext, cin), lambda b, t: (b, 0, 0)),    # x rows
                pl.BlockSpec((sext, 1), lambda b, t: (0, 0)),            # mask
                pl.BlockSpec((1, 1, t_feat), lambda b, t: (b, 0, 0)),    # time emb
                pl.BlockSpec((9, cin, cpad), lambda b, t: (0, 0, 0)),    # w1
                pl.BlockSpec((1, cpad), lambda b, t: (0, 0)),            # b1
                pl.BlockSpec((t_feat, cpad), lambda b, t: (0, 0)),       # wt
                pl.BlockSpec((1, cpad), lambda b, t: (0, 0)),            # bt
                pl.BlockSpec((9, cpad, cpad), lambda b, t: (0, 0, 0)),   # w2
                pl.BlockSpec((1, cpad), lambda b, t: (0, 0)),            # b2
                pl.BlockSpec((cin, cpad), lambda b, t: (0, 0)),          # wr
                pl.BlockSpec((1, cpad), lambda b, t: (0, 0)),            # br
            ],
            out_specs=pl.BlockSpec((1, tr, cpad), lambda b, t: (b, t, 0)),
            scratch_shapes=[pltpu.VMEM((tre, cpad), bf16)],
        ),
        compiler_params=pltpu.CompilerParams(
            dimension_semantics=("parallel", "parallel"),
            vmem_limit_bytes=vmem_limit),
    )(x_rows, mask_ext, t_in, w1k, b1k, wtk, btk, w2k, b2k, wrk, brk)

    # drop the row/channel padding and go back to NCHW.
    out = out_rows[:, :sp, :cout].reshape(n, hp, wp, cout)[:, 1:h + 1, 1:w + 1, :]
    return jnp.transpose(out, (0, 3, 1, 2))


def _reference(x, time_emb, p, *, eps=1e-5):
    """Pure-JAX (lax.conv) reference matching the PyTorch module in eval mode."""
    hi = jax.lax.Precision.HIGHEST

    def conv(v, w, b, pad):
        y = jax.lax.conv_general_dilated(
            v, w, window_strides=(1, 1), padding=((pad, pad), (pad, pad)),
            dimension_numbers=("NCHW", "OIHW", "NCHW"), precision=hi)
        return y + b[None, :, None, None]

    def bn(y, g, be, m, v):
        inv = (g / jnp.sqrt(v + eps))[None, :, None, None]
        return (y - m[None, :, None, None]) * inv + be[None, :, None, None]

    h = jax.nn.relu(bn(conv(x, p["w1"], p["b1"], 1),
                       p["g1"], p["be1"], p["m1"], p["v1"]))
    if time_emb is not None and p.get("wt") is not None:
        te = jnp.dot(jax.nn.silu(time_emb), p["wt"].T, precision=hi) + p["bt"]
        h = h + te[:, :, None, None]
    h = jax.nn.relu(bn(conv(h, p["w2"], p["b2"], 1),
                       p["g2"], p["be2"], p["m2"], p["v2"]))
    res = conv(x, p["wr"], p["br"], 0) if p.get("wr") is not None else x
    return h + res


if __name__ == "__main__":
    key = jax.random.PRNGKey(0)
    n, cin, cout, hh, ww, tdim = 2, 4, 8, 16, 16, 32
    ks = jax.random.split(key, 16)

    def rnd(k, shape, scale=0.1):
        return (scale * jax.random.normal(k, shape)).astype(jnp.float32)

    p = {
        "w1": rnd(ks[0], (cout, cin, 3, 3)), "b1": rnd(ks[1], (cout,)),
        "g1": 1.0 + rnd(ks[2], (cout,)), "be1": rnd(ks[3], (cout,)),
        "m1": rnd(ks[4], (cout,)), "v1": 0.5 + jnp.abs(rnd(ks[5], (cout,))),
        "w2": rnd(ks[6], (cout, cout, 3, 3)), "b2": rnd(ks[7], (cout,)),
        "g2": 1.0 + rnd(ks[8], (cout,)), "be2": rnd(ks[9], (cout,)),
        "m2": rnd(ks[10], (cout,)), "v2": 0.5 + jnp.abs(rnd(ks[11], (cout,))),
        "wt": rnd(ks[12], (cout, tdim)), "bt": rnd(ks[13], (cout,)),
        "wr": rnd(ks[14], (cout, cin, 1, 1)), "br": rnd(ks[15], (cout,)),
    }
    x = jax.random.normal(jax.random.PRNGKey(1), (n, cin, hh, ww), dtype=jnp.float32)
    t = jax.random.normal(jax.random.PRNGKey(2), (n, tdim), dtype=jnp.float32)

    out = jax.block_until_ready(resnet_block_forward(x, t, p))
    ref = jax.block_until_ready(_reference(x, t, p))

    assert out.shape == (n, cout, hh, ww), out.shape
    err = float(jnp.max(jnp.abs(out - ref)))
    tol = 5e-3 + 2e-2 * float(jnp.max(jnp.abs(ref)))   # bf16 MXU operands
    assert err < tol, f"max abs error {err} (tol {tol})"
    print("KERNEL_OK")
</pallas_src>

<mosaic_0001>
module attributes {stable_mosaic.version = 11 : i64} {
  func.func @_resnet_block_kernel(%arg0: i32, %arg1: i32, %arg2: memref<1x448x4xbf16, #tpu.memory_space<vmem>>, %arg3: memref<448x1xf32, #tpu.memory_space<vmem>>, %arg4: memref<1x1x32xf32, #tpu.memory_space<vmem>>, %arg5: memref<9x4x128xbf16, #tpu.memory_space<vmem>>, %arg6: memref<1x128xf32, #tpu.memory_space<vmem>>, %arg7: memref<32x128xbf16, #tpu.memory_space<vmem>>, %arg8: memref<1x128xf32, #tpu.memory_space<vmem>>, %arg9: memref<9x128x128xbf16, #tpu.memory_space<vmem>>, %arg10: memref<1x128xf32, #tpu.memory_space<vmem>>, %arg11: memref<4x128xbf16, #tpu.memory_space<vmem>>, %arg12: memref<1x128xf32, #tpu.memory_space<vmem>>, %arg13: memref<1x176x128xf32, #tpu.memory_space<vmem>>, %arg14: memref<224x128xbf16, #tpu.memory_space<vmem>>) attributes {dimension_semantics = [#tpu.dimension_semantics<parallel>, #tpu.dimension_semantics<parallel>], iteration_bounds = array<i64: 2, 2>, scalar_prefetch = 0 : i64, scratch_operands = 1 : i64, tpu.core_type = #tpu.core_type<tc>, window_params = [{transform_indices = @transform_0, window_bounds = array<i64: 1, 448, 4>}, {pipeline_mode = #tpu.pipeline_mode<synchronous>, transform_indices = @transform_1, window_bounds = array<i64: 448, 1>}, {transform_indices = @transform_2, window_bounds = array<i64: 1, 1, 32>}, {pipeline_mode = #tpu.pipeline_mode<synchronous>, transform_indices = @transform_3, window_bounds = array<i64: 9, 4, 128>}, {pipeline_mode = #tpu.pipeline_mode<synchronous>, transform_indices = @transform_4, window_bounds = array<i64: 1, 128>}, {pipeline_mode = #tpu.pipeline_mode<synchronous>, transform_indices = @transform_5, window_bounds = array<i64: 32, 128>}, {pipeline_mode = #tpu.pipeline_mode<synchronous>, transform_indices = @transform_6, window_bounds = array<i64: 1, 128>}, {pipeline_mode = #tpu.pipeline_mode<synchronous>, transform_indices = @transform_7, window_bounds = array<i64: 9, 128, 128>}, {pipeline_mode = #tpu.pipeline_mode<synchronous>, transform_indices = @transform_8, window_bounds = array<i64: 1, 128>}, {pipeline_mode = #tpu.pipeline_mode<synchronous>, transform_indices = @transform_9, window_bounds = array<i64: 4, 128>}, {pipeline_mode = #tpu.pipeline_mode<synchronous>, transform_indices = @transform_10, window_bounds = array<i64: 1, 128>}, {transform_indices = @transform_11, window_bounds = array<i64: 1, 176, 128>}]} {
    %c176_i32 = arith.constant 176 : i32
    %0 = arith.muli %arg1, %c176_i32 : i32
    %1 = tpu.assume_multiple %0, 16 : i32
    %c0 = arith.constant 0 : index
    %2 = arith.index_cast %1 : i32 to index
    %c0_0 = arith.constant 0 : index
    %3 = vector.load %arg2[%c0, %2, %c0_0] : memref<1x448x4xbf16, #tpu.memory_space<vmem>>, vector<1x272x4xbf16>
    %4 = vector.shape_cast %3 : vector<1x272x4xbf16> to vector<272x4xbf16>
    %5 = vector.extract_strided_slice %4 {offsets = [5, 0], sizes = [224, 4], strides = [1, 1]} : vector<272x4xbf16> to vector<224x4xbf16>
    %c0_1 = arith.constant 0 : index
    %c0_2 = arith.constant 0 : index
    %c0_3 = arith.constant 0 : index
    %6 = vector.load %arg5[%c0_1, %c0_2, %c0_3] : memref<9x4x128xbf16, #tpu.memory_space<vmem>>, vector<1x4x128xbf16>
    %7 = vector.shape_cast %6 : vector<1x4x128xbf16> to vector<4x128xbf16>
    %cst = arith.constant dense<0.000000e+00> : vector<224x128xf32>
    %8 = tpu.matmul %5, %7, %cst {dimension_numbers = #tpu.dot_dimension_numbers<[1], [0], [0], [1], [0, 0, 1, 1], [], []>} : vector<224x4xbf16>, vector<4x128xbf16>, vector<224x128xf32> -> vector<224x128xf32>
    %9 = vector.extract_strided_slice %4 {offsets = [6, 0], sizes = [224, 4], strides = [1, 1]} : vector<272x4xbf16> to vector<224x4xbf16>
    %c1 = arith.constant 1 : index
    %c0_4 = arith.constant 0 : index
    %c0_5 = arith.constant 0 : index
    %10 = vector.load %arg5[%c1, %c0_4, %c0_5] : memref<9x4x128xbf16, #tpu.memory_space<vmem>>, vector<1x4x128xbf16>
    %11 = vector.shape_cast %10 : vector<1x4x128xbf16> to vector<4x128xbf16>
    %cst_6 = arith.constant dense<0.000000e+00> : vector<224x128xf32>
    %12 = tpu.matmul %9, %11, %cst_6 {dimension_numbers = #tpu.dot_dimension_numbers<[1], [0], [0], [1], [0, 0, 1, 1], [], []>} : vector<224x4xbf16>, vector<4x128xbf16>, vector<224x128xf32> -> vector<224x128xf32>
    %13 = arith.addf %8, %12 : vector<224x128xf32>
    %14 = vector.extract_strided_slice %4 {offsets = [7, 0], sizes = [224, 4], strides = [1, 1]} : vector<272x4xbf16> to vector<224x4xbf16>
    %c2 = arith.constant 2 : index
    %c0_7 = arith.constant 0 : index
    %c0_8 = arith.constant 0 : index
    %15 = vector.load %arg5[%c2, %c0_7, %c0_8] : memref<9x4x128xbf16, #tpu.memory_space<vmem>>, vector<1x4x128xbf16>
    %16 = vector.shape_cast %15 : vector<1x4x128xbf16> to vector<4x128xbf16>
    %cst_9 = arith.constant dense<0.000000e+00> : vector<224x128xf32>
    %17 = tpu.matmul %14, %16, %cst_9 {dimension_numbers = #tpu.dot_dimension_numbers<[1], [0], [0], [1], [0, 0, 1, 1], [], []>} : vector<224x4xbf16>, vector<4x128xbf16>, vector<224x128xf32> -> vector<224x128xf32>
    %18 = arith.addf %13, %17 : vector<224x128xf32>
    %19 = vector.extract_strided_slice %4 {offsets = [23, 0], sizes = [224, 4], strides = [1, 1]} : vector<272x4xbf16> to vector<224x4xbf16>
    %c3 = arith.constant 3 : index
    %c0_10 = arith.constant 0 : index
    %c0_11 = arith.constant 0 : index
    %20 = vector.load %arg5[%c3, %c0_10, %c0_11] : memref<9x4x128xbf16, #tpu.memory_space<vmem>>, vector<1x4x128xbf16>
    %21 = vector.shape_cast %20 : vector<1x4x128xbf16> to vector<4x128xbf16>
    %cst_12 = arith.constant dense<0.000000e+00> : vector<224x128xf32>
    %22 = tpu.matmul %19, %21, %cst_12 {dimension_numbers = #tpu.dot_dimension_numbers<[1], [0], [0], [1], [0, 0, 1, 1], [], []>} : vector<224x4xbf16>, vector<4x128xbf16>, vector<224x128xf32> -> vector<224x128xf32>
    %23 = arith.addf %18, %22 : vector<224x128xf32>
    %24 = vector.extract_strided_slice %4 {offsets = [24, 0], sizes = [224, 4], strides = [1, 1]} : vector<272x4xbf16> to vector<224x4xbf16>
    %c4 = arith.constant 4 : index
    %c0_13 = arith.constant 0 : index
    %c0_14 = arith.constant 0 : index
    %25 = vector.load %arg5[%c4, %c0_13, %c0_14] : memref<9x4x128xbf16, #tpu.memory_space<vmem>>, vector<1x4x128xbf16>
    %26 = vector.shape_cast %25 : vector<1x4x128xbf16> to vector<4x128xbf16>
    %cst_15 = arith.constant dense<0.000000e+00> : vector<224x128xf32>
    %27 = tpu.matmul %24, %26, %cst_15 {dimension_numbers = #tpu.dot_dimension_numbers<[1], [0], [0], [1], [0, 0, 1, 1], [], []>} : vector<224x4xbf16>, vector<4x128xbf16>, vector<224x128xf32> -> vector<224x128xf32>
    %28 = arith.addf %23, %27 : vector<224x128xf32>
    %29 = vector.extract_strided_slice %4 {offsets = [25, 0], sizes = [224, 4], strides = [1, 1]} : vector<272x4xbf16> to vector<224x4xbf16>
    %c5 = arith.constant 5 : index
    %c0_16 = arith.constant 0 : index
    %c0_17 = arith.constant 0 : index
    %30 = vector.load %arg5[%c5, %c0_16, %c0_17] : memref<9x4x128xbf16, #tpu.memory_space<vmem>>, vector<1x4x128xbf16>
    %31 = vector.shape_cast %30 : vector<1x4x128xbf16> to vector<4x128xbf16>
    %cst_18 = arith.constant dense<0.000000e+00> : vector<224x128xf32>
    %32 = tpu.matmul %29, %31, %cst_18 {dimension_numbers = #tpu.dot_dimension_numbers<[1], [0], [0], [1], [0, 0, 1, 1], [], []>} : vector<224x4xbf16>, vector<4x128xbf16>, vector<224x128xf32> -> vector<224x128xf32>
    %33 = arith.addf %28, %32 : vector<224x128xf32>
    %34 = vector.extract_strided_slice %4 {offsets = [41, 0], sizes = [224, 4], strides = [1, 1]} : vector<272x4xbf16> to vector<224x4xbf16>
    %c6 = arith.constant 6 : index
    %c0_19 = arith.constant 0 : index
    %c0_20 = arith.constant 0 : index
    %35 = vector.load %arg5[%c6, %c0_19, %c0_20] : memref<9x4x128xbf16, #tpu.memory_space<vmem>>, vector<1x4x128xbf16>
    %36 = vector.shape_cast %35 : vector<1x4x128xbf16> to vector<4x128xbf16>
    %cst_21 = arith.constant dense<0.000000e+00> : vector<224x128xf32>
    %37 = tpu.matmul %34, %36, %cst_21 {dimension_numbers = #tpu.dot_dimension_numbers<[1], [0], [0], [1], [0, 0, 1, 1], [], []>} : vector<224x4xbf16>, vector<4x128xbf16>, vector<224x128xf32> -> vector<224x128xf32>
    %38 = arith.addf %33, %37 : vector<224x128xf32>
    %39 = vector.extract_strided_slice %4 {offsets = [42, 0], sizes = [224, 4], strides = [1, 1]} : vector<272x4xbf16> to vector<224x4xbf16>
    %c7 = arith.constant 7 : index
    %c0_22 = arith.constant 0 : index
    %c0_23 = arith.constant 0 : index
    %40 = vector.load %arg5[%c7, %c0_22, %c0_23] : memref<9x4x128xbf16, #tpu.memory_space<vmem>>, vector<1x4x128xbf16>
    %41 = vector.shape_cast %40 : vector<1x4x128xbf16> to vector<4x128xbf16>
    %cst_24 = arith.constant dense<0.000000e+00> : vector<224x128xf32>
    %42 = tpu.matmul %39, %41, %cst_24 {dimension_numbers = #tpu.dot_dimension_numbers<[1], [0], [0], [1], [0, 0, 1, 1], [], []>} : vector<224x4xbf16>, vector<4x128xbf16>, vector<224x128xf32> -> vector<224x128xf32>
    %43 = arith.addf %38, %42 : vector<224x128xf32>
    %44 = vector.extract_strided_slice %4 {offsets = [43, 0], sizes = [224, 4], strides = [1, 1]} : vector<272x4xbf16> to vector<224x4xbf16>
    %c8 = arith.constant 8 : index
    %c0_25 = arith.constant 0 : index
    %c0_26 = arith.constant 0 : index
    %45 = vector.load %arg5[%c8, %c0_25, %c0_26] : memref<9x4x128xbf16, #tpu.memory_space<vmem>>, vector<1x4x128xbf16>
    %46 = vector.shape_cast %45 : vector<1x4x128xbf16> to vector<4x128xbf16>
    %cst_27 = arith.constant dense<0.000000e+00> : vector<224x128xf32>
    %47 = tpu.matmul %44, %46, %cst_27 {dimension_numbers = #tpu.dot_dimension_numbers<[1], [0], [0], [1], [0, 0, 1, 1], [], []>} : vector<224x4xbf16>, vector<4x128xbf16>, vector<224x128xf32> -> vector<224x128xf32>
    %48 = arith.addf %43, %47 : vector<224x128xf32>
    %c0_28 = arith.constant 0 : index
    %c0_29 = arith.constant 0 : index
    %49 = vector.load %arg6[%c0_28, %c0_29] : memref<1x128xf32, #tpu.memory_space<vmem>>, vector<1x128xf32>
    %50 = vector.broadcast %49 : vector<1x128xf32> to vector<224x128xf32>
    %51 = arith.addf %48, %50 : vector<224x128xf32>
    %cst_30 = arith.constant 0.000000e+00 : f32
    %52 = vector.broadcast %cst_30 : f32 to vector<224x128xf32>
    %53 = arith.maximumf %51, %52 : vector<224x128xf32>
    %c0_31 = arith.constant 0 : index
    %c0_32 = arith.constant 0 : index
    %c0_33 = arith.constant 0 : index
    %54 = vector.load %arg4[%c0_31, %c0_32, %c0_33] : memref<1x1x32xf32, #tpu.memory_space<vmem>>, vector<1x1x32xf32>
    %55 = vector.shape_cast %54 : vector<1x1x32xf32> to vector<1x32xf32>
    %cst_34 = arith.constant 0.000000e+00 : f32
    %56 = vector.broadcast %cst_34 : f32 to vector<1x32xf32>
    %57 = arith.subf %56, %55 : vector<1x32xf32>
    %58 = math.exp %57 : vector<1x32xf32>
    %cst_35 = arith.constant 1.000000e+00 : f32
    %59 = vector.broadcast %cst_35 : f32 to vector<1x32xf32>
    %60 = arith.addf %59, %58 : vector<1x32xf32>
    %cst_36 = arith.constant 1.000000e+00 : f32
    %61 = vector.broadcast %cst_36 : f32 to vector<1x32xf32>
    %62 = arith.divf %61, %60 : vector<1x32xf32>
    %63 = arith.mulf %55, %62 : vector<1x32xf32>
    %64 = arith.truncf %63 : vector<1x32xf32> to vector<1x32xbf16>
    %c0_37 = arith.constant 0 : index
    %c0_38 = arith.constant 0 : index
    %65 = vector.load %arg7[%c0_37, %c0_38] : memref<32x128xbf16, #tpu.memory_space<vmem>>, vector<32x128xbf16>
    %cst_39 = arith.constant dense<0.000000e+00> : vector<1x128xf32>
    %66 = tpu.matmul %64, %65, %cst_39 {dimension_numbers = #tpu.dot_dimension_numbers<[1], [0], [0], [1], [0, 0, 1, 1], [], []>} : vector<1x32xbf16>, vector<32x128xbf16>, vector<1x128xf32> -> vector<1x128xf32>
    %c0_40 = arith.constant 0 : index
    %c0_41 = arith.constant 0 : index
    %67 = vector.load %arg8[%c0_40, %c0_41] : memref<1x128xf32, #tpu.memory_space<vmem>>, vector<1x128xf32>
    %68 = arith.addf %66, %67 : vector<1x128xf32>
    %c24_i32 = arith.constant 24 : i32
    %69 = arith.addi %1, %c24_i32 : i32
    %70 = arith.index_cast %69 : i32 to index
    %c0_42 = arith.constant 0 : index
    %71 = vector.load %arg3[%70, %c0_42] : memref<448x1xf32, #tpu.memory_space<vmem>>, vector<224x1xf32>
    %72 = vector.broadcast %68 : vector<1x128xf32> to vector<224x128xf32>
    %73 = arith.addf %53, %72 : vector<224x128xf32>
    %74 = vector.broadcast %71 : vector<224x1xf32> to vector<224x128xf32>
    %75 = arith.mulf %73, %74 : vector<224x128xf32>
    %76 = arith.truncf %75 : vector<224x128xf32> to vector<224x128xbf16>
    %c0_43 = arith.constant 0 : index
    %c0_44 = arith.constant 0 : index
    %77 = vector.load %arg14[%c0_43, %c0_44] : memref<224x128xbf16, #tpu.memory_space<vmem>>, vector<224x128xbf16>
    tpu.vector_store %arg14[%c0_43, %c0_44], %76 {strides = array<i32>} : memref<224x128xbf16, #tpu.memory_space<vmem>>, vector<224x128xbf16>,
    %c5_45 = arith.constant 5 : index
    %c0_46 = arith.constant 0 : index
    %78 = vector.load %arg14[%c5_45, %c0_46] : memref<224x128xbf16, #tpu.memory_space<vmem>>, vector<176x128xbf16>
    %c0_47 = arith.constant 0 : index
    %c0_48 = arith.constant 0 : index
    %c0_49 = arith.constant 0 : index
    %79 = vector.load %arg9[%c0_47, %c0_48, %c0_49] : memref<9x128x128xbf16, #tpu.memory_space<vmem>>, vector<1x128x128xbf16>
    %80 = vector.shape_cast %79 : vector<1x128x128xbf16> to vector<128x128xbf16>
    %cst_50 = arith.constant dense<0.000000e+00> : vector<176x128xf32>
    %81 = tpu.matmul %78, %80, %cst_50 {dimension_numbers = #tpu.dot_dimension_numbers<[1], [0], [0], [1], [0, 0, 1, 1], [], []>} : vector<176x128xbf16>, vector<128x128xbf16>, vector<176x128xf32> -> vector<176x128xf32>
    %c6_51 = arith.constant 6 : index
    %c0_52 = arith.constant 0 : index
    %82 = vector.load %arg14[%c6_51, %c0_52] : memref<224x128xbf16, #tpu.memory_space<vmem>>, vector<176x128xbf16>
    %c1_53 = arith.constant 1 : index
    %c0_54 = arith.constant 0 : index
    %c0_55 = arith.constant 0 : index
    %83 = vector.load %arg9[%c1_53, %c0_54, %c0_55] : memref<9x128x128xbf16, #tpu.memory_space<vmem>>, vector<1x128x128xbf16>
    %84 = vector.shape_cast %83 : vector<1x128x128xbf16> to vector<128x128xbf16>
    %cst_56 = arith.constant dense<0.000000e+00> : vector<176x128xf32>
    %85 = tpu.matmul %82, %84, %cst_56 {dimension_numbers = #tpu.dot_dimension_numbers<[1], [0], [0], [1], [0, 0, 1, 1], [], []>} : vector<176x128xbf16>, vector<128x128xbf16>, vector<176x128xf32> -> vector<176x128xf32>
    %86 = arith.addf %81, %85 : vector<176x128xf32>
    %c7_57 = arith.constant 7 : index
    %c0_58 = arith.constant 0 : index
    %87 = vector.load %arg14[%c7_57, %c0_58] : memref<224x128xbf16, #tpu.memory_space<vmem>>, vector<176x128xbf16>
    %c2_59 = arith.constant 2 : index
    %c0_60 = arith.constant 0 : index
    %c0_61 = arith.constant 0 : index
    %88 = vector.load %arg9[%c2_59, %c0_60, %c0_61] : memref<9x128x128xbf16, #tpu.memory_space<vmem>>, vector<1x128x128xbf16>
    %89 = vector.shape_cast %88 : vector<1x128x128xbf16> to vector<128x128xbf16>
    %cst_62 = arith.constant dense<0.000000e+00> : vector<176x128xf32>
    %90 = tpu.matmul %87, %89, %cst_62 {dimension_numbers = #tpu.dot_dimension_numbers<[1], [0], [0], [1], [0, 0, 1, 1], [], []>} : vector<176x128xbf16>, vector<128x128xbf16>, vector<176x128xf32> -> vector<176x128xf32>
    %91 = arith.addf %86, %90 : vector<176x128xf32>
    %c23 = arith.constant 23 : index
    %c0_63 = arith.constant 0 : index
    %92 = vector.load %arg14[%c23, %c0_63] : memref<224x128xbf16, #tpu.memory_space<vmem>>, vector<176x128xbf16>
    %c3_64 = arith.constant 3 : index
    %c0_65 = arith.constant 0 : index
    %c0_66 = arith.constant 0 : index
    %93 = vector.load %arg9[%c3_64, %c0_65, %c0_66] : memref<9x128x128xbf16, #tpu.memory_space<vmem>>, vector<1x128x128xbf16>
    %94 = vector.shape_cast %93 : vector<1x128x128xbf16> to vector<128x128xbf16>
    %cst_67 = arith.constant dense<0.000000e+00> : vector<176x128xf32>
    %95 = tpu.matmul %92, %94, %cst_67 {dimension_numbers = #tpu.dot_dimension_numbers<[1], [0], [0], [1], [0, 0, 1, 1], [], []>} : vector<176x128xbf16>, vector<128x128xbf16>, vector<176x128xf32> -> vector<176x128xf32>
    %96 = arith.addf %91, %95 : vector<176x128xf32>
    %c24 = arith.constant 24 : index
    %c0_68 = arith.constant 0 : index
    %97 = vector.load %arg14[%c24, %c0_68] : memref<224x128xbf16, #tpu.memory_space<vmem>>, vector<176x128xbf16>
    %c4_69 = arith.constant 4 : index
    %c0_70 = arith.constant 0 : index
    %c0_71 = arith.constant 0 : index
    %98 = vector.load %arg9[%c4_69, %c0_70, %c0_71] : memref<9x128x128xbf16, #tpu.memory_space<vmem>>, vector<1x128x128xbf16>
    %99 = vector.shape_cast %98 : vector<1x128x128xbf16> to vector<128x128xbf16>
    %cst_72 = arith.constant dense<0.000000e+00> : vector<176x128xf32>
    %100 = tpu.matmul %97, %99, %cst_72 {dimension_numbers = #tpu.dot_dimension_numbers<[1], [0], [0], [1], [0, 0, 1, 1], [], []>} : vector<176x128xbf16>, vector<128x128xbf16>, vector<176x128xf32> -> vector<176x128xf32>
    %101 = arith.addf %96, %100 : vector<176x128xf32>
    %c25 = arith.constant 25 : index
    %c0_73 = arith.constant 0 : index
    %102 = vector.load %arg14[%c25, %c0_73] : memref<224x128xbf16, #tpu.memory_space<vmem>>, vector<176x128xbf16>
    %c5_74 = arith.constant 5 : index
    %c0_75 = arith.constant 0 : index
    %c0_76 = arith.constant 0 : index
    %103 = vector.load %arg9[%c5_74, %c0_75, %c0_76] : memref<9x128x128xbf16, #tpu.memory_space<vmem>>, vector<1x128x128xbf16>
    %104 = vector.shape_cast %103 : vector<1x128x128xbf16> to vector<128x128xbf16>
    %cst_77 = arith.constant dense<0.000000e+00> : vector<176x128xf32>
    %105 = tpu.matmul %102, %104, %cst_77 {dimension_numbers = #tpu.dot_dimension_numbers<[1], [0], [0], [1], [0, 0, 1, 1], [], []>} : vector<176x128xbf16>, vector<128x128xbf16>, vector<176x128xf32> -> vector<176x128xf32>
    %106 = arith.addf %101, %105 : vector<176x128xf32>
    %c41 = arith.constant 41 : index
    %c0_78 = arith.constant 0 : index
    %107 = vector.load %arg14[%c41, %c0_78] : memref<224x128xbf16, #tpu.memory_space<vmem>>, vector<176x128xbf16>
    %c6_79 = arith.constant 6 : index
    %c0_80 = arith.constant 0 : index
    %c0_81 = arith.constant 0 : index
    %108 = vector.load %arg9[%c6_79, %c0_80, %c0_81] : memref<9x128x128xbf16, #tpu.memory_space<vmem>>, vector<1x128x128xbf16>
    %109 = vector.shape_cast %108 : vector<1x128x128xbf16> to vector<128x128xbf16>
    %cst_82 = arith.constant dense<0.000000e+00> : vector<176x128xf32>
    %110 = tpu.matmul %107, %109, %cst_82 {dimension_numbers = #tpu.dot_dimension_numbers<[1], [0], [0], [1], [0, 0, 1, 1], [], []>} : vector<176x128xbf16>, vector<128x128xbf16>, vector<176x128xf32> -> vector<176x128xf32>
    %111 = arith.addf %106, %110 : vector<176x128xf32>
    %c42 = arith.constant 42 : index
    %c0_83 = arith.constant 0 : index
    %112 = vector.load %arg14[%c42, %c0_83] : memref<224x128xbf16, #tpu.memory_space<vmem>>, vector<176x128xbf16>
    %c7_84 = arith.constant 7 : index
    %c0_85 = arith.constant 0 : index
    %c0_86 = arith.constant 0 : index
    %113 = vector.load %arg9[%c7_84, %c0_85, %c0_86] : memref<9x128x128xbf16, #tpu.memory_space<vmem>>, vector<1x128x128xbf16>
    %114 = vector.shape_cast %113 : vector<1x128x128xbf16> to vector<128x128xbf16>
    %cst_87 = arith.constant dense<0.000000e+00> : vector<176x128xf32>
    %115 = tpu.matmul %112, %114, %cst_87 {dimension_numbers = #tpu.dot_dimension_numbers<[1], [0], [0], [1], [0, 0, 1, 1], [], []>} : vector<176x128xbf16>, vector<128x128xbf16>, vector<176x128xf32> -> vector<176x128xf32>
    %116 = arith.addf %111, %115 : vector<176x128xf32>
    %c43 = arith.constant 43 : index
    %c0_88 = arith.constant 0 : index
    %117 = vector.load %arg14[%c43, %c0_88] : memref<224x128xbf16, #tpu.memory_space<vmem>>, vector<176x128xbf16>
    %c8_89 = arith.constant 8 : index
    %c0_90 = arith.constant 0 : index
    %c0_91 = arith.constant 0 : index
    %118 = vector.load %arg9[%c8_89, %c0_90, %c0_91] : memref<9x128x128xbf16, #tpu.memory_space<vmem>>, vector<1x128x128xbf16>
    %119 = vector.shape_cast %118 : vector<1x128x128xbf16> to vector<128x128xbf16>
    %cst_92 = arith.constant dense<0.000000e+00> : vector<176x128xf32>
    %120 = tpu.matmul %117, %119, %cst_92 {dimension_numbers = #tpu.dot_dimension_numbers<[1], [0], [0], [1], [0, 0, 1, 1], [], []>} : vector<176x128xbf16>, vector<128x128xbf16>, vector<176x128xf32> -> vector<176x128xf32>
    %121 = arith.addf %116, %120 : vector<176x128xf32>
    %c0_93 = arith.constant 0 : index
    %c0_94 = arith.constant 0 : index
    %122 = vector.load %arg10[%c0_93, %c0_94] : memref<1x128xf32, #tpu.memory_space<vmem>>, vector<1x128xf32>
    %123 = vector.broadcast %122 : vector<1x128xf32> to vector<176x128xf32>
    %124 = arith.addf %121, %123 : vector<176x128xf32>
    %cst_95 = arith.constant 0.000000e+00 : f32
    %125 = vector.broadcast %cst_95 : f32 to vector<176x128xf32>
    %126 = arith.maximumf %124, %125 : vector<176x128xf32>
    %c48_i32 = arith.constant 48 : i32
    %127 = arith.addi %1, %c48_i32 : i32
    %c0_96 = arith.constant 0 : index
    %128 = arith.index_cast %127 : i32 to index
    %c0_97 = arith.constant 0 : index
    %129 = vector.load %arg2[%c0_96, %128, %c0_97] : memref<1x448x4xbf16, #tpu.memory_space<vmem>>, vector<1x176x4xbf16>
    %130 = vector.shape_cast %129 : vector<1x176x4xbf16> to vector<176x4xbf16>
    %c0_98 = arith.constant 0 : index
    %c0_99 = arith.constant 0 : index
    %131 = vector.load %arg11[%c0_98, %c0_99] : memref<4x128xbf16, #tpu.memory_space<vmem>>, vector<4x128xbf16>
    %cst_100 = arith.constant dense<0.000000e+00> : vector<176x128xf32>
    %132 = tpu.matmul %130, %131, %cst_100 {dimension_numbers = #tpu.dot_dimension_numbers<[1], [0], [0], [1], [0, 0, 1, 1], [], []>} : vector<176x4xbf16>, vector<4x128xbf16>, vector<176x128xf32> -> vector<176x128xf32>
    %c0_101 = arith.constant 0 : index
    %c0_102 = arith.constant 0 : index
    %133 = vector.load %arg12[%c0_101, %c0_102] : memref<1x128xf32, #tpu.memory_space<vmem>>, vector<1x128xf32>
    %134 = vector.broadcast %133 : vector<1x128xf32> to vector<176x128xf32>
    %135 = arith.addf %132, %134 : vector<176x128xf32>
    %136 = arith.addf %126, %135 : vector<176x128xf32>
    %c0_103 = arith.constant 0 : index
    %c0_104 = arith.constant 0 : index
    %c0_105 = arith.constant 0 : index
    %137 = vector.load %arg13[%c0_103, %c0_104, %c0_105] : memref<1x176x128xf32, #tpu.memory_space<vmem>>, vector<1x176x128xf32>
    %138 = vector.shape_cast %137 : vector<1x176x128xf32> to vector<176x128xf32>
    %139 = vector.shape_cast %136 : vector<176x128xf32> to vector<1x176x128xf32>
    tpu.vector_store %arg13[%c0_103, %c0_104, %c0_105], %139 {strides = array<i32>} : memref<1x176x128xf32, #tpu.memory_space<vmem>>, vector<1x176x128xf32>,
    return
  }
  func.func @transform_0(%arg0: i32, %arg1: i32) -> (i32, i32, i32) {
    %c0_i32 = arith.constant 0 : i32
    %c0_i32_0 = arith.constant 0 : i32
    %c0_i32_1 = arith.constant 0 : i32
    return %arg0, %c0_i32, %c0_i32_0 : i32, i32, i32
  }
  func.func @transform_1(%arg0: i32, %arg1: i32) -> (i32, i32) {
    %c0_i32 = arith.constant 0 : i32
    %c0_i32_0 = arith.constant 0 : i32
    %c0_i32_1 = arith.constant 0 : i32
    return %c0_i32, %c0_i32_0 : i32, i32
  }
  func.func @transform_2(%arg0: i32, %arg1: i32) -> (i32, i32, i32) {
    %c0_i32 = arith.constant 0 : i32
    %c0_i32_0 = arith.constant 0 : i32
    %c0_i32_1 = arith.constant 0 : i32
    return %arg0, %c0_i32, %c0_i32_0 : i32, i32, i32
  }
  func.func @transform_3(%arg0: i32, %arg1: i32) -> (i32, i32, i32) {
    %c0_i32 = arith.constant 0 : i32
    %c0_i32_0 = arith.constant 0 : i32
    %c0_i32_1 = arith.constant 0 : i32
    %c0_i32_2 = arith.constant 0 : i32
    return %c0_i32, %c0_i32_0, %c0_i32_1 : i32, i32, i32
  }
  func.func @transform_4(%arg0: i32, %arg1: i32) -> (i32, i32) {
    %c0_i32 = arith.constant 0 : i32
    %c0_i32_0 = arith.constant 0 : i32
    %c0_i32_1 = arith.constant 0 : i32
    return %c0_i32, %c0_i32_0 : i32, i32
  }
  func.func @transform_5(%arg0: i32, %arg1: i32) -> (i32, i32) {
    %c0_i32 = arith.constant 0 : i32
    %c0_i32_0 = arith.constant 0 : i32
    %c0_i32_1 = arith.constant 0 : i32
    return %c0_i32, %c0_i32_0 : i32, i32
  }
  func.func @transform_6(%arg0: i32, %arg1: i32) -> (i32, i32) {
    %c0_i32 = arith.constant 0 : i32
    %c0_i32_0 = arith.constant 0 : i32
    %c0_i32_1 = arith.constant 0 : i32
    return %c0_i32, %c0_i32_0 : i32, i32
  }
  func.func @transform_7(%arg0: i32, %arg1: i32) -> (i32, i32, i32) {
    %c0_i32 = arith.constant 0 : i32
    %c0_i32_0 = arith.constant 0 : i32
    %c0_i32_1 = arith.constant 0 : i32
    %c0_i32_2 = arith.constant 0 : i32
    return %c0_i32, %c0_i32_0, %c0_i32_1 : i32, i32, i32
  }
  func.func @transform_8(%arg0: i32, %arg1: i32) -> (i32, i32) {
    %c0_i32 = arith.constant 0 : i32
    %c0_i32_0 = arith.constant 0 : i32
    %c0_i32_1 = arith.constant 0 : i32
    return %c0_i32, %c0_i32_0 : i32, i32
  }
  func.func @transform_9(%arg0: i32, %arg1: i32) -> (i32, i32) {
    %c0_i32 = arith.constant 0 : i32
    %c0_i32_0 = arith.constant 0 : i32
    %c0_i32_1 = arith.constant 0 : i32
    return %c0_i32, %c0_i32_0 : i32, i32
  }
  func.func @transform_10(%arg0: i32, %arg1: i32) -> (i32, i32) {
    %c0_i32 = arith.constant 0 : i32
    %c0_i32_0 = arith.constant 0 : i32
    %c0_i32_1 = arith.constant 0 : i32
    return %c0_i32, %c0_i32_0 : i32, i32
  }
  func.func @transform_11(%arg0: i32, %arg1: i32) -> (i32, i32, i32) {
    %c0_i32 = arith.constant 0 : i32
    %c0_i32_0 = arith.constant 0 : i32
    return %arg0, %arg1, %c0_i32 : i32, i32, i32
  }
}

</mosaic_0001>

<bundles_post_ra>
// kernel: tpu_custom_call.1
= control target key start
LH: loop header
LB: loop body
LE: loop exit
PB: predicated region body
PF: predicated region fallthrough
CT: control target
= control target key end

     0   :  { %16 = vsyncpa [#allocation4], 0  ;;  %s11639_s0 = inlined_call_operand.vmem [shape: bf16[2,448,4], index: 0, kind: input, shape index: {}]   ;;  %s11640_s1 = inlined_call_operand.vmem [shape: f32[448,1], index: 1, kind: input, shape index: {}]   ;;  %s11641_s2 = inlined_call_operand.vmem [shape: f32[2,1,32], index: 2, kind: input, shape index: {}]   ;;  %s11642_s3 = inlined_call_operand.vmem [shape: bf16[9,4,128], index: 3, kind: input, shape index: {}]   ;;  %s11643_s4 = inlined_call_operand.vmem [shape: f32[1,128], index: 4, kind: input, shape index: {}]   ;;  %s11644_s5 = inlined_call_operand.vmem [shape: bf16[32,128], index: 5, kind: input, shape index: {}]   ;;  %s11645_s6 = inlined_call_operand.vmem [shape: f32[1,128], index: 6, kind: input, shape index: {}]   ;;  %s11646_s7 = inlined_call_operand.vmem [shape: bf16[9,128,128], index: 7, kind: input, shape index: {}]   ;;  %s11647_s8 = inlined_call_operand.vmem [shape: f32[1,128], index: 8, kind: input, shape index: {}]   ;;  %s11648_s9 = inlined_call_operand.vmem [shape: bf16[4,128], index: 9, kind: input, shape index: {}]   ;;  %s11649_s10 = inlined_call_operand.vmem [shape: f32[1,128], index: 10, kind: input, shape index: {}]   ;;  %s11650_s11 = inlined_call_operand.hbm [shape: f32[2,352,128], index: 11, kind: output, shape index: {}]  }
   0x1   :  { %18 = vsyncpa [#allocation4 + $0x1], 0  ;;  %s8491_s17 = smov 0   ;;  %s8493_s18 = smov 0  }
   0x2   :  { %s8495_s19 = smov 0   ;;  %s8497_s20 = smov 0  }
   0x3   :  { %s8499_s21 = smov 0   ;;  %s8501_s22 = smov 0  }
   0x4   :  { %s8503_s23 = smov 0   ;;  %s8505_s24 = smov 0  }
   0x5 LB: > { %11698 = sst [smem:[#allocation6_spill]] %s8415_s22  ;;  %s6270_s25 = sadd.s32 4294967295, %s8423_s24   ;;  %s8423_s24 = sphi %s8505_s24, %s24_s24   ;;  %s8419_s23 = sphi %s8503_s23, %s11937_s23   ;;  %s8415_s22 = sphi %s8501_s22, %s11936_s22   ;;  %s8411_s21 = sphi %s8499_s21, %s11935_s21   ;;  %s8407_s20 = sphi %s8497_s20, %s11934_s20   ;;  %s8403_s19 = sphi %s8495_s19, %s11940_s19   ;;  %s8399_s18 = sphi %s8493_s18, %s11939_s18   ;;  %s8395_s17 = sphi %s8491_s17, %s11938_s17  }
   0x6   : > { %11699 = sst [smem:[#allocation7_spill]] %s8419_s23  ;;  %s6271_s26 = sadd.s32 4294967294, %s8423_s24  }
   0x7   : > { %s33_s27 = sadd.s32 1, %s8415_s22  ;;  %s36_s28 = sadd.s32 1, %s8419_s23 }
   0x8   : > { %p34_p0 = scmp.ge.s32.totalorder %s33_s27, 2  ;;  %p296_p1 = scmp.ne.s32.totalorder %s8403_s19, %s8399_s18 }
   0x9   : > { %p297_p2 = scmp.eq.s32.totalorder %s6270_s25, 3  ;;  %p302_p5 = scmp.ne.s32.totalorder %s8399_s18, %s8395_s17 }
   0xa   : > { %s11942_s27 = smov (%p34_p0, %s33_s27), 0  ;;  %s11944_s28 = smov (!%p34_p0, %s36_s28), %s8419_s23 }
   0xb   : > { %11700 = sst [smem:[#allocation8_spill]] %s11942_s27  ;;  %s282_s29 = ssub.s32 %s8415_s22, %s11942_s27 }
   0xc   : > { %p8542_p3 = por %p297_p2, %p296_p1  ;;  %p38_p4 = scmp.ge.s32.totalorder %s11944_s28, 2 }
   0xd   : > { %p303_p6 = scmp.eq.s32.totalorder %s6271_s26, 3  ;;  %p6274_p7 = scmp.ge.s32.totalorder %s8423_s24, 1 }
   0xe   : > { %s11946_s28 = smov (%p38_p4, %s11944_s28), 0  ;;  %p362_p9 = scmp.lt.s32.totalorder %s8423_s24, 5 }
   0xf   : > { %11702 = sst [smem:[#allocation9_spill]] %s11946_s28  ;;  %p8551_p8 = por %p303_p6, %p302_p5 }
  0x10   : > { %s281_s13 = ssub.s32 %s8419_s23, %s11946_s28  ;;  %s286_s14 = sadd.s32 1, %s8403_s19 }
  0x11   : > { %s283_s15 = sor.u32 %s282_s29, %s281_s13  ;;  %p363_p10 = pnand %p6274_p7, %p362_p9 }
  0x12   : > { %p284_p11 = scmp.eq.s32.totalorder %s283_s15, 0 }
  0x13   : > { %366 = sbr.rel (%p363_p10) target bundleno = 1630 (0x65e), region = 64 }
  0x14   : > { %s8560_s16 = scalar_select %p284_p11, %s8403_s19, %s286_s14  }
  0x16   : > { %11704 = sst [smem:[#allocation10_spill]] %s8560_s16 }
  0x1a   : > { %v6277_v0 = vld [vmem:[%s11642_s3 + $0x2] sm:$0x3]  ;;  %vm603_vm0 = vcmask 1041408   ;;  %p405_p12 = scmp.lt.s32.totalorder %s8411_s21, 1  ;;  %s8567_s26 = smul.u32 176, %s8407_s20  ;;  %vm530_vm1 = vcmask 1044480  }
  0x1b   : > { %8116 = vmatprep.subr.msk.bf16.mxu0 %vm603_vm0, %v6277_v0  ;;  %v605_v1 = vsel %vm603_vm0, %v6277_v0, 0  ;;  %v454_v2 = vld [vmem:[%s11642_s3] sm:$0x3]  ;;  %vm560_vm2 = vcmask 31744   ;;  %v6321_v28 = vld [vmem:[%s11642_s3 + $0x4] sm:$0x3] }
  0x1c   : > { %7027 = vmatpush3.bf16.msra.mxu0 %v605_v1  ;;  %s8575_s14 = scalar_select %p405_p12, %s8411_s21, 1  ;;  %v930_v24 = vsel %vm603_vm0, %v454_v2, 0  ;;  %vm752_vm3 = vsmask.f32 5376  ;;  %vm1079_vm4 = vsmask.f32 4352 }
  0x1d   : > { %s416_s27 = sshra.s32 %s8567_s26, 3  ;;  %8117 = vmatprep.subr.msk.bf16.mxu0 %vm603_vm0, %v454_v2  ;;  %vm1804_vm5 = vsmask.f32 7424  ;;  %vm8426_vm6 = vmmov 0   ;;  %vm2949_vm7 = vcmask 261120   ;;  %vm2330_vm8 = vcmask 1046528  }
  0x1e   : > { %s8126_s15 = smul.u32 224, %s8575_s14  ;;  %s6276_s25 = sshll.u32 %s416_s27, 2  ;;  %vm2580_vm9 = vsmask.f32 6400  ;;  %vm4688_vm10 = vsmask.f32 3328 }
  0x1f   : > { %s412_s23 = scalar_lea.vmem %s11641_s2, %s8575_s14  ;;  %s9290_s14 = scalar_lea.vmem %s11640_s1, %s8567_s26  ;;  %vm5560_vm11 = vsmask.f32 2304  ;;  %vm4444_vm12 = vcmask 1043456   ;;  %vm5316_vm13 = vcmask 1042432  }
  0x20   : > { %s8583_s22 = scalar_lea.vmem %s11639_s0, %s8126_s15  ;;  %s6170_s13 = smul.u32 22, %s8407_s20 }
  0x21   : > { %s8586_s16 = scalar_lea.vmem %s8583_s22, %s6276_s25  ;;  %s8127_s27 = smul.u32 44, %s8411_s21 }
  0x22   : > { %v422_v3 = vld [vmem:[%s8586_s16 + $0x8] sm:$0xf]  ;;  %v8590_v4 = vld [vmem:[%s8586_s16 + $0xc] sm:$0xf]  ;;  %v8593_v5 = vld [vmem:[%s8586_s16] sm:$0xff]  }
  0x23   : > { %v8596_v6 = vld [vmem:[%s8586_s16 + $0x10] sm:$0xf]  ;;  %v8599_v7 = vcombine.low %v422_v3, %v8590_v4  ;;  %v425_v8 = vld [vmem:[%s8586_s16 + $0x14] sm:$0xf]  ;;  %v426_v9 = vld [vmem:[%s8586_s16 + $0x18] sm:$0xf]  ;;  %s6175_s15 = sadd.s32 %s8127_s27, %s6170_s13 }
  0x24   : > { %v8604_v10 = vld [vmem:[%s8586_s16 + $0x1c] sm:$0xf]  ;;  %v531_v11 = vrot.slane %v8593_v5, 3  ;;  %v8608_v12 = vcombine.low %v8596_v6, %v425_v8  ;;  %v8613_v14 = vcombine.low %v425_v8, %v426_v9  ;;  %v8616_v15 = vld [vmem:[%s8586_s16 + $0x20] sm:$0xf]  ;;  %v11661_v63 = vshrl.u32 %v8593_v5, 16 }
  0x25   : > { %v8611_v13 = vcombine.low %v426_v9, %v8604_v10  ;;  %v8619_v16 = vld [vmem:[%s8586_s16 + $0x24] sm:$0xf]  ;;  %v532_v17 = vrot.slane %v8599_v7, 3  ;;  %v8623_v18 = vld [vmem:[%s8586_s16 + $0x28] sm:$0xf]  ;;  %v11658_v2 = vshll.u32 %v8593_v5, 16 }
  0x26   : > { %v8626_v19 = vld [vmem:[%s8586_s16 + $0x2c] sm:$0xf]  ;;  %v534_v20 = vrot.slane %v8608_v12, 3  ;;  %v8632_v22 = vcombine.low %v8616_v15, %v8619_v16  ;;  %v8651_v31 = vld [vmem:[%s8586_s16 + $0x30] sm:$0xf]  ;;  %v11656_v3 = vshrl.u32 %v8599_v7, 16 }
  0x27   : > { %v536_v21 = vrot.slane %v8611_v13, 3  ;;  %v533_v23 = vsel %vm530_vm1, %v531_v11, %v532_v17  ;;  %v8638_v25 = vcombine.low %v8623_v18, %v8626_v19  ;;  %v8654_v32 = vld [vmem:[%s8586_s16 + $0x34] sm:$0xf]  ;;  %v8658_v33 = vld [vmem:[%s8586_s16 + $0x38] sm:$0xf]  ;;  %v1182_v11 = vsel %vm603_vm0, %v6321_v28, 0 }
  0x28   : > { %7028 = vmatprep.mubr.msk.bf16.mxu0 %vm560_vm2, %v533_v23  ;;  %v535_v26 = vsel %vm530_vm1, %v532_v17, %v534_v20  ;;  %v538_v29 = vrot.slane %v8632_v22, 3  ;;  %v8661_v34 = vld [vmem:[%s8586_s16 + $0x3c] sm:$0xf]  ;;  %v8666_v36 = vcombine.low %v8651_v31, %v8654_v32  ;;  %v8675_v39 = vld [vmem:[%s8586_s16 + $0x40] sm:$0xf]  ;;  %v11655_v23 = vshll.u32 %v8599_v7, 16 }
  0x29   : > { %v537_v27 = vsel %vm530_vm1, %v534_v20, %v536_v21  ;;  %7029 = vmatmul.mubr.msk.bf16.vlgmr.msra.gmra.mrb[0].mxu0 %vm560_vm2, %v535_v26  ;;  %v540_v30 = vrot.slane %v8638_v25, 3  ;;  %v8671_v38 = vcombine.low %v8658_v33, %v8661_v34  ;;  %v8678_v40 = vld [vmem:[%s8586_s16 + $0x44] sm:$0xf]  ;;  %v8684_v43 = vld [vmem:[%s8586_s16 + $0x48] sm:$0xf]  ;;  %v759_v26 = vrot.slane %v11658_v2, 3 }
  0x2a   : > { %7057 = vmatpush3.bf16.msra.mxu0 %v930_v24  ;;  %7032 = vmatprep.mubr.msk.bf16.mxu0 %vm560_vm2, %v537_v27  ;;  %v539_v35 = vsel %vm530_vm1, %v536_v21, %v538_v29  ;;  %v542_v41 = vrot.slane %v8666_v36, 3  ;;  %v8687_v44 = vld [vmem:[%s8586_s16 + $0x4c] sm:$0xf]  ;;  %v8692_v46 = vcombine.low %v8675_v39, %v8678_v40  ;;  %v8701_v49 = vld [vmem:[%s8586_s16 + $0x50] sm:$0xf]  ;;  %v756_v21 = vrot.slane %v11661_v63, 2 }
  0x2b   : > { %8118 = vmatprep.subr.msk.bf16.mxu0 %vm603_vm0, %v6321_v28  ;;  %v541_v37 = vsel %vm530_vm1, %v538_v29, %v540_v30  ;;  %v544_v42 = vrot.slane %v8671_v38, 3  ;;  %v8697_v48 = vcombine.low %v8684_v43, %v8687_v44  ;;  %v8706_v51 = vld [vmem:[%s8586_s16 + $0x54] sm:$0xf]  ;;  %v8710_v53 = vld [vmem:[%s8586_s16 + $0x58] sm:$0xf]  ;;  %v764_v27 = vrot.slane %v11656_v3, 2 }
  0x2c   : > { %v543_v45 = vsel %vm530_vm1, %v540_v30, %v542_v41  ;;  %v546_v50 = vrot.slane %v8692_v46, 3  ;;  %11705 = vst [vmem:[#allocation11_spill] sm:$0xff] %v8706_v51  ;;  %v8713_v54 = vld [vmem:[%s8586_s16 + $0x5c] sm:$0xf]  ;;  %v8716_v55 = vld [vmem:[%s8586_s16 + $0x60] sm:$0xf]  ;;  %v8724_v58 = vcombine.low %v8701_v49, %v8706_v51 }
  0x2d   : > { %v545_v47 = vsel %vm530_vm1, %v542_v41, %v544_v42  ;;  %v548_v52 = vrot.slane %v8697_v48, 3  ;;  %11706 = vst [vmem:[#allocation12_spill] sm:$0xff] %v8713_v54  ;;  %11707 = vst [vmem:[#allocation13_spill] sm:$0xff] %v8716_v55  ;;  %v8719_v56 = vld [vmem:[%s8586_s16 + $0x64] sm:$0xf]  ;;  %v8735_v62 = vcombine.low %v8710_v53, %v8713_v54  ;;  %v11657_v28 = vshrl.u32 %v8608_v12, 16 }
  0x2e   : > { %11708 = vst [vmem:[#allocation14_spill] sm:$0xff] %v8719_v56  ;;  %v547_v57 = vsel %vm530_vm1, %v544_v42, %v546_v50  ;;  %v8727_v59 = vld [vmem:[%s8586_s16 + $0x68] sm:$0xf]  ;;  %v8730_v60 = vld [vmem:[%s8586_s16 + $0x6c] sm:$0xf]  ;;  %v8740_v0 = vcombine.low %v8716_v55, %v8719_v56  ;;  %v550_v9 = vrot.slane %v8724_v58, 3  ;;  %v760_v55 = vor.u32 %v759_v26, %v756_v21 }
  0x2f   : > { %11709 = vst [vmem:[#allocation15_spill] sm:$0xff] %v8727_v59  ;;  %11710 = vst [vmem:[#allocation16_spill] sm:$0xff] %v8730_v60  ;;  %v549_v61 = vsel %vm530_vm1, %v546_v50, %v548_v52  ;;  %v8743_v1 = vld [vmem:[%s8586_s16 + $0x70] sm:$0xf]  ;;  %v8750_v8 = vcombine.low %v8727_v59, %v8730_v60  ;;  %v552_v17 = vrot.slane %v8735_v62, 3  ;;  %v11659_v30 = vshll.u32 %v8608_v12, 16 }
  0x30   : > { %v8758_v20 = vcombine.low %v8743_v1, %v8743_v1  ;;  %v554_v24 = vrot.slane %v8740_v0, 3  ;;  %v11662_v41 = vshll.u32 %v8611_v13, 16  ;;  %v773_v50 = vrot.slane %v11657_v28, 2  ;;  %s6702_s21 = sshll.u32 %s6175_s15, 7 }
  0x31   : > { %7033 = vmatmul.mubr.msk.bf16.gmra.mrb[4].mxu0 %vm560_vm2, %v539_v35  ;;  %v556_v29 = vrot.slane %v8750_v8, 3  ;;  %v551_v35 = vsel %vm530_vm1, %v548_v52, %v550_v9  ;;  %v553_v42 = vsel %vm530_vm1, %v550_v9, %v552_v17  ;;  %v776_v52 = vrot.slane %v11659_v30, 3 }
  0x32   : > { %7036 = vmatprep.mubr.msk.bf16.mxu0 %vm560_vm2, %v541_v37  ;;  %v11660_v37 = vshrl.u32 %v8611_v13, 16  ;;  %v11669_v3 = vshrl.u32 %v8638_v25, 16  ;;  %v11711_v2 = vshll.u32 %v8638_v25, 16  ;;  %v11712_v56 = vshrl.u32 %v8666_v36, 16 }
  0x33   : > { %v825_v63 = vshrl.u32 %v8692_v46, 16 }
  0x34   : > { %v782_v9 = vrot.slane %v11660_v37, 2  ;;  %v800_v28 = vrot.slane %v11669_v3, 2  ;;  %v803_v60 = vrot.slane %v11711_v2, 3 }
  0x39   : > { %7037 = vmatmul.mubr.msk.bf16.gmra.mrb[8].mxu0 %vm560_vm2, %v543_v45  ;;  %v558_v45 = vrot.slane %v8758_v20, 3 }
  0x3a   : > { %7040 = vmatprep.mubr.msk.bf16.mxu0 %vm560_vm2, %v545_v47  ;;  %v767_v47 = vrot.slane %v11655_v23, 3  ;;  %v785_v23 = vrot.slane %v11662_v41, 3  ;;  %v555_v41 = vsel %vm530_vm1, %v552_v17, %v554_v24  ;;  %v11715_v17 = vshll.u32 %v8671_v38, 16 }
  0x3b   : > { %v559_v51 = vsel %vm530_vm1, %v556_v29, %v558_v45 }
  0x3c   : > { %v821_v3 = vrot.slane %v11715_v17, 3  ;;  %v786_v17 = vor.u32 %v785_v23, %v782_v9 }
  0x41   : > { %7041 = vmatmul.mubr.msk.bf16.gmra.mrb[12].mxu0 %vm560_vm2, %v547_v57  ;;  %v11665_v57 = vshrl.u32 %v8632_v22, 16 }
  0x42   : > { %7044 = vmatprep.mubr.msk.bf16.mxu0 %vm560_vm2, %v549_v61  ;;  %v11667_v61 = vshll.u32 %v8632_v22, 16 }
  0x43   : > { %v791_v30 = vrot.slane %v11665_v57, 2  ;;  %v809_v57 = vrot.slane %v11712_v56, 2  ;;  %v837_v56 = vshll.u32 %v8697_v48, 16 }
  0x44   : > { %v794_v37 = vrot.slane %v11667_v61, 3  ;;  %v11714_v61 = vshrl.u32 %v8671_v38, 16 }
  0x46   : > { %v818_v54 = vrot.slane %v11714_v61, 2 }
  0x49   : > { %7045 = vmatmul.mubr.msk.bf16.gmra.mrb[16].mxu0 %vm560_vm2, %v551_v35  ;;  %v557_v35 = vsel %vm530_vm1, %v554_v24, %v556_v29  ;;  %v834_v24 = vshrl.u32 %v8697_v48, 16  ;;  %v822_v29 = vor.u32 %v821_v3, %v818_v54  ;;  %v846_v3 = vshll.u32 %v8724_v58, 16 }
  0x4a   : > { %7048 = vmatprep.mubr.msk.bf16.mxu0 %vm560_vm2, %v553_v42  ;;  %v11713_v42 = vshll.u32 %v8666_v36, 16 }
  0x4c   : > { %v812_v59 = vrot.slane %v11713_v42, 3  ;;  %v768_v42 = vor.u32 %v767_v47, %v764_v27  ;;  %v839_v47 = vrot.slane %v837_v56, 3 }
  0x4e   : > { %v769_v61 = vsel %vm752_vm3, %v760_v55, %v768_v42  ;;  %v795_v55 = vor.u32 %v794_v37, %v791_v30  ;;  %v813_v27 = vor.u32 %v812_v59, %v809_v57  ;;  %v836_v37 = vrot.slane %v834_v24, 2 }
  0x4f   : > { %v843_v59 = vshrl.u32 %v8724_v58, 16  ;;  %v852_v57 = vshrl.u32 %v8735_v62, 16 }
  0x50   : > { %v796_v23 = vsel %vm752_vm3, %v786_v17, %v795_v55  ;;  %v823_v30 = vsel %vm752_vm3, %v813_v27, %v822_v29 }
  0x51   : > { %7049 = vmatmul.mubr.msk.bf16.gmra.mrb[20].mxu0 %vm560_vm2, %v555_v41  ;;  %v777_v41 = vor.u32 %v776_v52, %v773_v50  ;;  %v840_v50 = vor.u32 %v839_v47, %v836_v37  ;;  %v855_v52 = vshll.u32 %v8735_v62, 16  ;;  %v11673_v47 = vshrl.u32 %v8758_v20, 16 }
  0x52   : > { %7052 = vmatprep.mubr.msk.bf16.mxu0 %vm560_vm2, %v557_v35  ;;  %v8828_v35 = vld [vmem:[%s11642_s3 + $0x6] sm:$0x3]  ;;  %v1123_v48 = vrot.slane %v852_v57, 3 }
  0x53   : > { %v778_v2 = vsel %vm752_vm3, %v768_v42, %v777_v41  ;;  %v787_v21 = vsel %vm752_vm3, %v777_v41, %v786_v17  ;;  %v848_v42 = vrot.slane %v846_v3, 3  ;;  %v854_v41 = vrot.slane %v852_v57, 2 }
  0x54   : > { %v857_v17 = vrot.slane %v855_v52, 3 }
  0x59   : > { %7053 = vmatmul.mubr.msk.bf16.gmra.mrb[24].mxu0 %vm560_vm2, %v559_v51  ;;  %v804_v51 = vor.u32 %v803_v60, %v800_v28  ;;  %v11716_v60 = vshll.u32 %v8692_v46, 16 }
  0x5a   : > { %7058 = vmatprep.mubr.msk.bf16.mxu0 %vm560_vm2, %v769_v61 }
  0x5b   : > { %v805_v26 = vsel %vm752_vm3, %v795_v55, %v804_v51  ;;  %v814_v45 = vsel %vm752_vm3, %v804_v51, %v813_v27  ;;  %v830_v28 = vrot.slane %v11716_v60, 3  ;;  %v861_v55 = vshrl.u32 %v8740_v0, 16 }
  0x5c   : > { %v864_v51 = vshll.u32 %v8740_v0, 16  ;;  %v873_v27 = vshll.u32 %v8750_v8, 16 }
  0x5d   : > { %v1127_v58 = vrot.slane %v861_v55, 3 }
  0x5e   : > { %v1132_v57 = vrot.slane %v873_v27, 4 }
  0x61   : > { %7059 = vmatmul.mubr.msk.bf16.vlgmr.msra.gmra.mrb[0].mxu0 %vm560_vm2, %v778_v2  ;;  %v845_v2 = vrot.slane %v843_v59, 2 }
  0x62   : > { %7087 = vmatpush3.bf16.msra.mxu0 %v1182_v11  ;;  %7062 = vmatprep.mubr.msk.bf16.mxu0 %vm560_vm2, %v787_v21  ;;  %v827_v11 = vrot.slane %v825_v63, 2 }
  0x63   : > { %8119 = vmatprep.subr.msk.bf16.mxu0 %vm603_vm0, %v8828_v35  ;;  %v849_v21 = vor.u32 %v848_v42, %v845_v2  ;;  %v881_v2 = vrot.slane %v11673_v47, 2 }
  0x64   : > { %v831_v54 = vor.u32 %v830_v28, %v827_v11  ;;  %v866_v11 = vrot.slane %v864_v51, 3 }
  0x66   : > { %v832_v9 = vsel %vm752_vm3, %v822_v29, %v831_v54  ;;  %v841_v61 = vsel %vm752_vm3, %v831_v54, %v840_v50  ;;  %v850_v29 = vsel %vm752_vm3, %v840_v50, %v849_v21  ;;  %v11672_v54 = vshll.u32 %v8758_v20, 16 }
  0x68   : > { %v884_v42 = vrot.slane %v11672_v54, 3 }
  0x69   : > { %7063 = vmatmul.mubr.msk.bf16.gmra.mrb[4].mxu0 %vm560_vm2, %v796_v23  ;;  %v858_v23 = vor.u32 %v857_v17, %v854_v41 }
  0x6a   : > { %7066 = vmatprep.mubr.msk.bf16.mxu0 %vm560_vm2, %v805_v26  ;;  %v870_v26 = vshrl.u32 %v8750_v8, 16 }
  0x6b   : > { %v859_v60 = vsel %vm752_vm3, %v849_v21, %v858_v23  ;;  %v11718_v21 = vshll.u32 %v8593_v5, 16 }
  0x6c   : > { %v872_v28 = vrot.slane %v870_v26, 2  ;;  %v1131_v62 = vrot.slane %v870_v26, 3 }
  0x71   : > { %7067 = vmatmul.mubr.msk.bf16.gmra.mrb[8].mxu0 %vm560_vm2, %v814_v45  ;;  %v863_v45 = vrot.slane %v861_v55, 2  ;;  %v11734_v55 = vshrl.u32 %v8758_v20, 16 }
  0x72   : > { %7070 = vmatprep.mubr.msk.bf16.mxu0 %vm560_vm2, %v823_v30  ;;  %v875_v30 = vrot.slane %v873_v27, 3 }
  0x73   : > { %v867_v37 = vor.u32 %v866_v11, %v863_v45  ;;  %v11719_v45 = vshrl.u32 %v8599_v7, 16  ;;  %v1135_v0 = vrot.slane %v11734_v55, 3 }
  0x74   : > { %v876_v50 = vor.u32 %v875_v30, %v872_v28  ;;  %v885_v28 = vor.u32 %v884_v42, %v881_v2 }
  0x75   : > { %v1083_v11 = vrot.slane %v11719_v45, 3 }
  0x76   : > { %v877_v17 = vsel %vm752_vm3, %v867_v37, %v876_v50 }
  0x79   : > { %7071 = vmatmul.mubr.msk.bf16.gmra.mrb[12].mxu0 %vm560_vm2, %v832_v9  ;;  %v868_v9 = vsel %vm752_vm3, %v858_v23, %v867_v37  ;;  %v11721_v37 = vshrl.u32 %v8608_v12, 16 }
  0x7a   : > { %7074 = vmatprep.mubr.msk.bf16.mxu0 %vm560_vm2, %v841_v61  ;;  %v11717_v61 = vshrl.u32 %v8593_v5, 16 }
  0x7b   : > { %v1087_v5 = vrot.slane %v11721_v37, 3 }
  0x7c   : > { %v1080_v41 = vrot.slane %v11717_v61, 3  ;;  %v886_v61 = vsel %vm752_vm3, %v876_v50, %v885_v28  ;;  %v11727_v28 = vshrl.u32 %v8638_v25, 16 }
  0x81   : > { %7075 = vmatmul.mubr.msk.bf16.gmra.mrb[16].mxu0 %vm560_vm2, %v850_v29  ;;  %v1081_v29 = vrot.slane %v11718_v21, 4  ;;  %v11722_v21 = vshll.u32 %v8608_v12, 16  ;;  %v11725_v12 = vshrl.u32 %v8632_v22, 16 }
  0x82   : > { %7078 = vmatprep.mubr.msk.bf16.mxu0 %vm560_vm2, %v859_v60  ;;  %v11720_v60 = vshll.u32 %v8599_v7, 16  ;;  %v11723_v7 = vshrl.u32 %v8611_v13, 16 }
  0x83   : > { %v1082_v30 = vor.u32 %v1081_v29, %v1080_v41  ;;  %v1088_v47 = vrot.slane %v11722_v21, 4  ;;  %v1095_v41 = vrot.slane %v11725_v12, 3  ;;  %v11726_v29 = vshll.u32 %v8632_v22, 16 }
  0x84   : > { %v1084_v23 = vrot.slane %v11720_v60, 4  ;;  %v1091_v60 = vrot.slane %v11723_v7, 3  ;;  %v11730_v21 = vshll.u32 %v8666_v36, 16 }
  0x85   : > { %v1089_v2 = vor.u32 %v1088_v47, %v1087_v5  ;;  %v11728_v47 = vshll.u32 %v8638_v25, 16  ;;  %v11729_v5 = vshrl.u32 %v8666_v36, 16  ;;  %v1111_v36 = vrot.slane %v825_v63, 3 }
  0x86   : > { %v1085_v54 = vor.u32 %v1084_v23, %v1083_v11  ;;  %v1096_v11 = vrot.slane %v11726_v29, 4  ;;  %v1390_v23 = vsel %vm603_vm0, %v8828_v35, 0  ;;  %v11733_v29 = vshll.u32 %v8692_v46, 16 }
  0x87   : > { %v1103_v25 = vrot.slane %v11729_v5, 3  ;;  %v1119_v46 = vrot.slane %v843_v59, 3  ;;  %v1120_v63 = vrot.slane %v846_v3, 4  ;;  %v1128_v59 = vrot.slane %v864_v51, 4 }
  0x88   : > { %v1086_v45 = vsel %vm1079_vm4, %v1082_v30, %v1085_v54  ;;  %v8914_v42 = vsel %vm1079_vm4, %v1085_v54, %v1089_v2  ;;  %v1099_v30 = vrot.slane %v11727_v28, 3  ;;  %v6353_v54 = vld [vmem:[%s11642_s3 + $0x8] sm:$0x3]  ;;  %v1097_v22 = vor.u32 %v1096_v11, %v1095_v41 }
  0x89   : > { %7079 = vmatmul.mubr.msk.bf16.gmra.mrb[20].mxu0 %vm560_vm2, %v868_v9  ;;  %v11724_v9 = vshll.u32 %v8611_v13, 16  ;;  %v1112_v11 = vrot.slane %v11733_v29, 4  ;;  %v1116_v28 = vrot.slane %v837_v56, 4  ;;  %v1121_v56 = vor.u32 %v1120_v63, %v1119_v46 }
  0x8a   : > { %7082 = vmatprep.mubr.msk.bf16.mxu0 %vm560_vm2, %v877_v17  ;;  %v11735_v51 = vshll.u32 %v8758_v20, 16  ;;  %v1624_v27 = vsel %vm603_vm0, %v6353_v54, 0  ;;  %v6382_v20 = vld [vmem:[%s11642_s3 + $0xa] sm:$0x3] }
  0x8b   : > { %v1092_v17 = vrot.slane %v11724_v9, 4 }
  0x8d   : > { %v1093_v50 = vor.u32 %v1092_v17, %v1091_v60  ;;  %v11731_v60 = vshrl.u32 %v8671_v38, 16  ;;  %v11732_v17 = vshll.u32 %v8671_v38, 16  ;;  %v1115_v38 = vrot.slane %v834_v24, 3 }
  0x8e   : > { %v1124_v24 = vrot.slane %v855_v52, 4  ;;  %v1129_v52 = vor.u32 %v1128_v59, %v1127_v58 }
  0x8f   : > { %v1094_v13 = vsel %vm1079_vm4, %v1089_v2, %v1093_v50  ;;  %v1098_v37 = vsel %vm1079_vm4, %v1093_v50, %v1097_v22  ;;  %v1107_v9 = vrot.slane %v11731_v60, 3  ;;  %v1108_v2 = vrot.slane %v11732_v17, 4 }
  0x91   : > { %7083 = vmatmul.mubr.msk.bf16.gmra.mrb[24].mxu0 %vm560_vm2, %v886_v61  ;;  %v1100_v61 = vrot.slane %v11728_v47, 4  ;;  %v1109_v50 = vor.u32 %v1108_v2, %v1107_v9  ;;  %v1117_v47 = vor.u32 %v1116_v28, %v1115_v38  ;;  %v6354_v28 = vcombine.low %v8590_v4, %v8596_v6 }
  0x92   : > { %7088 = vmatprep.mubr.msk.bf16.mxu0 %vm560_vm2, %v1086_v45  ;;  %v1104_v45 = vrot.slane %v11730_v21, 4  ;;  %v9035_v4 = vcombine.low %v8619_v16, %v8623_v18  ;;  %v9039_v6 = vcombine.low %v8626_v19, %v8651_v31  ;;  %v9059_v16 = vcombine.low %v8678_v40, %v8684_v43  ;;  %v11736_v19 = vld [vmem:[#allocation11_spill] sm:$0xff]  ;;  %v11740_v43 = vld [vmem:[#allocation14_spill] sm:$0xff] }
  0x93   : > { %v1101_v35 = vor.u32 %v1100_v61, %v1099_v30  ;;  %v1113_v30 = vor.u32 %v1112_v11, %v1111_v36  ;;  %v1122_v5 = vsel %vm1079_vm4, %v1117_v47, %v1121_v56  ;;  %v9063_v18 = vcombine.low %v8687_v44, %v8701_v49  ;;  %v11739_v40 = vld [vmem:[#allocation15_spill] sm:$0xff]  ;;  %v11741_v49 = vld [vmem:[#allocation16_spill] sm:$0xff] }
  0x94   : > { %v1105_v12 = vor.u32 %v1104_v45, %v1103_v25  ;;  %v1133_v25 = vor.u32 %v1132_v57, %v1131_v62  ;;  %v1136_v45 = vrot.slane %v11735_v51, 4  ;;  %v9071_v31 = vcombine.low %v11736_v19, %v8710_v53 }
  0x95   : > { %v1102_v7 = vsel %vm1079_vm4, %v1097_v22, %v1101_v35  ;;  %v1114_v61 = vsel %vm1079_vm4, %v1109_v50, %v1113_v30  ;;  %v1118_v22 = vsel %vm1079_vm4, %v1113_v30, %v1117_v47  ;;  %v9022_v30 = vcombine.low %v8604_v10, %v8616_v15 }
  0x96   : > { %v1106_v41 = vsel %vm1079_vm4, %v1101_v35, %v1105_v12  ;;  %v1125_v35 = vor.u32 %v1124_v24, %v1123_v48  ;;  %v1134_v60 = vsel %vm1079_vm4, %v1129_v52, %v1133_v25  ;;  %v1137_v8 = vor.u32 %v1136_v45, %v1135_v0 }
  0x97   : > { %v1950_v47 = vsel %vm603_vm0, %v6382_v20, 0  ;;  %v9047_v10 = vcombine.low %v8654_v32, %v8658_v33  ;;  %v9051_v15 = vcombine.low %v8661_v34, %v8675_v39  ;;  %v11737_v32 = vld [vmem:[#allocation13_spill] sm:$0xff]  ;;  %v11738_v33 = vld [vmem:[#allocation12_spill] sm:$0xff]  ;;  %v1807_v39 = vshll.u32 %v6354_v28, 16 }
  0x98   : > { %v1126_v3 = vsel %vm1079_vm4, %v1121_v56, %v1125_v35  ;;  %v1130_v21 = vsel %vm1079_vm4, %v1125_v35, %v1129_v52  ;;  %v1138_v26 = vsel %vm1079_vm4, %v1133_v25, %v1137_v8  ;;  %v9075_v34 = vcombine.low %v11738_v33, %v11737_v32  ;;  %v9128_v8 = vld [vmem:[%s11642_s3 + $0xe] sm:$0x3] }
  0x99   : > { %7089 = vmatmul.mubr.msk.bf16.vlgmr.msra.gmra.mrb[0].mxu0 %vm560_vm2, %v8914_v42  ;;  %v9083_v44 = vcombine.low %v11740_v43, %v11739_v40  ;;  %v9087_v46 = vcombine.low %v11741_v49, %v8743_v1  ;;  %v1805_v53 = vshrl.u32 %v6354_v28, 16  ;;  %v1809_v63 = vrot.slane %v1807_v39, 1 }
  0x9a   : > { %7117 = vmatpush3.bf16.msra.mxu0 %v1390_v23  ;;  %7092 = vmatprep.mubr.msk.bf16.mxu0 %vm560_vm2, %v1094_v13  ;;  %v1110_v23 = vsel %vm1079_vm4, %v1105_v12, %v1109_v50  ;;  %v1815_v35 = vshrl.u32 %v8613_v14, 16  ;;  %v1822_v58 = vshrl.u32 %v9022_v30, 16  ;;  %v1825_v59 = vshll.u32 %v9035_v4, 16 }
  0x9b   : > { %8120 = vmatprep.subr.msk.bf16.mxu0 %vm603_vm0, %v6353_v54  ;;  %v1810_v48 = vor.u32 %v1809_v63, %v1805_v53  ;;  %v1829_v55 = vshrl.u32 %v9035_v4, 16  ;;  %v1836_v45 = vshrl.u32 %v9039_v6, 16  ;;  %v1867_v19 = vshll.u32 %v9071_v31, 16 }
  0x9c   : > { %v1827_v52 = vrot.slane %v1825_v59, 1  ;;  %v1874_v43 = vshll.u32 %v9075_v34, 16  ;;  %v1871_v53 = vshrl.u32 %v9071_v31, 16 }
  0x9d   : > { %v1869_v40 = vrot.slane %v1867_v19, 1 }
  0xa1   : > { %7093 = vmatmul.mubr.msk.bf16.gmra.mrb[4].mxu0 %vm560_vm2, %v1098_v37 }
  0xa2   : > { %7096 = vmatprep.mubr.msk.bf16.mxu0 %vm560_vm2, %v1102_v7 }
  0xa9   : > { %7097 = vmatmul.mubr.msk.bf16.gmra.mrb[8].mxu0 %vm560_vm2, %v1106_v41 }
  0xaa   : > { %7100 = vmatprep.mubr.msk.bf16.mxu0 %vm560_vm2, %v1110_v23 }
  0xb1   : > { %7101 = vmatmul.mubr.msk.bf16.gmra.mrb[12].mxu0 %vm560_vm2, %v1114_v61 }
  0xb2   : > { %7104 = vmatprep.mubr.msk.bf16.mxu0 %vm560_vm2, %v1118_v22 }
  0xb9   : > { %7105 = vmatmul.mubr.msk.bf16.gmra.mrb[16].mxu0 %vm560_vm2, %v1122_v5 }
  0xba   : > { %7108 = vmatprep.mubr.msk.bf16.mxu0 %vm560_vm2, %v1126_v3 }
  0xc1   : > { %7109 = vmatmul.mubr.msk.bf16.gmra.mrb[20].mxu0 %vm560_vm2, %v1130_v21 }
  0xc2   : > { %7112 = vmatprep.mubr.msk.bf16.mxu0 %vm560_vm2, %v1134_v60 }
  0xc9   : > { %7113 = vmatmul.mubr.msk.bf16.gmra.mrb[24].mxu0 %vm560_vm2, %v1138_v26 }
  0xca   : > { %7118 = vmatprep.mubr.msk.bf16.mxu0 %vm560_vm2, %v8914_v42  ;;  %v449_v42 = vld [vmem:[%s8586_s16 + $0x74] sm:$0xf] }
  0xcb   : > { %v6337_v54 = vcombine.low %v8743_v1, %v449_v42  ;;  %v1818_v1 = vshll.u32 %v9022_v30, 16 }
  0xcd   : > { %v1369_v9 = vshll.u32 %v6337_v54, 16 }
  0xcf   : > { %v1371_v12 = vrot.slane %v1369_v9, 4  ;;  %v1843_v9 = vshrl.u32 %v9047_v10, 16 }
  0xd1   : > { %7119 = vmatmul.mubr.msk.bf16.vlgmr.msra.gmra.mrb[0].mxu0 %vm560_vm2, %v1094_v13  ;;  %v1366_v13 = vshrl.u32 %v6337_v54, 16  ;;  %v1846_v54 = vshll.u32 %v9051_v15, 16 }
  0xd2   : > { %7147 = vmatpush3.bf16.msra.mxu0 %v1624_v27  ;;  %7122 = vmatprep.mubr.msk.bf16.mxu0 %vm560_vm2, %v1098_v37  ;;  %v450_v37 = vld [vmem:[%s8586_s16 + $0x78] sm:$0xf]  ;;  %v1831_v27 = vor.u32 %v1829_v55, %v1827_v52 }
  0xd3   : > { %8121 = vmatprep.subr.msk.bf16.mxu0 %vm603_vm0, %v6382_v20  ;;  %v6338_v17 = vcombine.low %v450_v37, %v450_v37  ;;  %v1368_v2 = vrot.slane %v1366_v13, 3  ;;  %v9096_v56 = vcombine.low %v449_v42, %v450_v37 }
  0xd5   : > { %v1378_v50 = vshll.u32 %v6338_v17, 16 }
  0xd7   : > { %v1380_v29 = vrot.slane %v1378_v50, 4 }
  0xd9   : > { %7123 = vmatmul.mubr.msk.bf16.gmra.mrb[4].mxu0 %vm560_vm2, %v1102_v7  ;;  %v1375_v7 = vshrl.u32 %v6338_v17, 16  ;;  %v1850_v17 = vshrl.u32 %v9051_v15, 16 }
  0xda   : > { %7126 = vmatprep.mubr.msk.bf16.mxu0 %vm560_vm2, %v1106_v41  ;;  %v1372_v41 = vor.u32 %v1371_v12, %v1368_v2  ;;  %v1853_v2 = vshll.u32 %v9059_v16, 16  ;;  %v9156_v12 = vld [vmem:[%s412_s23] sm:$0x1] }
  0xdb   : > { %v1377_v36 = vrot.slane %v1375_v7, 3  ;;  %v1848_v7 = vrot.slane %v1846_v54, 1  ;;  %v2924_v50 = vsub.f32 0.0, %v9156_v12 }
  0xdc   : > { %v1373_v11 = vsel %vm1079_vm4, %v1133_v25, %v1372_v41  ;;  %v1832_v25 = vshll.u32 %v9039_v6, 16 }
  0xde   : > { %v1834_v26 = vrot.slane %v1832_v25, 1 }
  0xe0   : > { %v1838_v20 = vor.u32 %v1836_v45, %v1834_v26  ;;  %v9144_v13 = vsel %vm1804_vm5, %v1831_v27, %v1834_v26  ;;  %v1888_v26 = vshll.u32 %v9087_v46, 16  ;;  %v2589_v27 = vrot.slane %v1825_v59, 2 }
  0xe1   : > { %7127 = vmatmul.mubr.msk.bf16.gmra.mrb[8].mxu0 %vm560_vm2, %v1110_v23  ;;  %v1381_v23 = vor.u32 %v1380_v29, %v1377_v36  ;;  %v1852_v36 = vor.u32 %v1850_v17, %v1848_v7  ;;  %v1855_v29 = vrot.slane %v1853_v2, 1 }
  0xe2   : > { %7130 = vmatprep.mubr.msk.bf16.mxu0 %vm560_vm2, %v1114_v61  ;;  %v6398_v61 = vld [vmem:[%s11642_s3 + $0xc] sm:$0x3]  ;;  %v1890_v59 = vrot.slane %v1888_v26, 1 }
  0xe3   : > { %v1382_v38 = vsel %vm1079_vm4, %v1372_v41, %v1381_v23  ;;  %v2153_v0 = vsel %vm603_vm0, %v6398_v61, 0  ;;  %v1860_v23 = vshll.u32 %v9063_v18, 16 }
  0xe5   : > { %v1862_v32 = vrot.slane %v1860_v23, 1 }
  0xe9   : > { %7131 = vmatmul.mubr.msk.bf16.gmra.mrb[12].mxu0 %vm560_vm2, %v1118_v22  ;;  %v1811_v22 = vshll.u32 %v8613_v14, 16 }
  0xea   : > { %7134 = vmatprep.mubr.msk.bf16.mxu0 %vm560_vm2, %v1122_v5 }
  0xeb   : > { %v1813_v24 = vrot.slane %v1811_v22, 1 }
  0xed   : > { %v1814_v5 = vsel %vm1804_vm5, %v1810_v48, %v1813_v24  ;;  %v1817_v62 = vor.u32 %v1815_v35, %v1813_v24  ;;  %v1878_v24 = vshrl.u32 %v9075_v34, 16 }
  0xf1   : > { %7135 = vmatmul.mubr.msk.bf16.gmra.mrb[16].mxu0 %vm560_vm2, %v1126_v3  ;;  %v1820_v3 = vrot.slane %v1818_v1, 1 }
  0xf2   : > { %7138 = vmatprep.mubr.msk.bf16.mxu0 %vm560_vm2, %v1130_v21 }
  0xf3   : > { %v1824_v57 = vor.u32 %v1822_v58, %v1820_v3  ;;  %v9116_v21 = vsel %vm1804_vm5, %v1817_v62, %v1820_v3  ;;  %v1876_v62 = vrot.slane %v1874_v43, 1 }
  0xf5   : > { %v9121_v51 = vsel %vm1804_vm5, %v1824_v57, %v1827_v52  ;;  %v1873_v57 = vor.u32 %v1871_v53, %v1869_v40  ;;  %v1880_v52 = vor.u32 %v1878_v24, %v1876_v62 }
  0xf9   : > { %7139 = vmatmul.mubr.msk.bf16.gmra.mrb[20].mxu0 %vm560_vm2, %v1134_v60  ;;  %v1839_v60 = vshll.u32 %v9047_v10, 16 }
  0xfa   : > { %7142 = vmatprep.mubr.msk.bf16.mxu0 %vm560_vm2, %v1373_v11  ;;  %v2925_v11 = vmul.f32 1.442695, %v2924_v50 }
  0xfb   : > { %v1841_v42 = vrot.slane %v1839_v60, 1 }
  0xfc   : > { %8325 = vpow2.f32 %v2925_v11  ;;  %v8240_v11 = vld [vmem:[%s11644_s5] sm:$0xff]  }
  0xfd   : > { %v9148_v37 = vsel %vm1804_vm5, %v1838_v20, %v1841_v42  ;;  %v1845_v41 = vor.u32 %v1843_v9, %v1841_v42  ;;  %v2588_v20 = vrot.slane %v1829_v55, 1  ;;  %v9219_v42 = vsel %vm1804_vm5, %v1873_v57, %v1876_v62 }
  0xfe   : > { %v11681_v55 = vmov 0.0  }
  0xff   : > { %7296 = vmatprep.subr.bf16.mxu1 %v11681_v55  ;;  %7300 = vmatprep.mubr.msk.bf16.mxu1 %vm8426_vm6, %v11681_v55 }
 0x100   : > { %7297 = vmatpush3.bf16.msra.mxu1 %v8240_v11 }
 0x101   : > { %7143 = vmatmul.mubr.msk.bf16.gmra.mrb[24].mxu0 %vm560_vm2, %v1382_v38  ;;  %v9173_v38 = vsel %vm1804_vm5, %v1845_v41, %v1848_v7  ;;  %v1885_v7 = vshrl.u32 %v9083_v44, 16  ;;  %v1892_v41 = vshrl.u32 %v9087_v46, 16  ;;  %7298 = vmatprep.subr.bf16.mxu1 %v11681_v55 }
 0x102   : > { %7148 = vmatprep.mubr.msk.bf16.mxu0 %vm560_vm2, %v6354_v28  ;;  %v1857_v28 = vshrl.u32 %v9059_v16, 16 }
 0x104   : > { %v1859_v33 = vor.u32 %v1857_v28, %v1855_v29 }
 0x106   : > { %v9195_v49 = vsel %vm1804_vm5, %v1859_v33, %v1862_v32  ;;  %v8326_v63 = vpop.eup %8325 }
 0x107   : > { %v2927_v3 = vadd.f32 1.0, %v8326_v63  ;;  %v1894_v63 = vor.u32 %v1892_v41, %v1890_v59 }
 0x109   : > { %7149 = vmatmul.mubr.msk.bf16.vlgmr.msra.gmra.mrb[0].mxu0 %vm560_vm2, %v8613_v14  ;;  %8327 = vrcp.f32 %v2927_v3 }
 0x10a   : > { %7177 = vmatpush3.bf16.msra.mxu0 %v1950_v47  ;;  %7152 = vmatprep.mubr.msk.bf16.mxu0 %vm560_vm2, %v9022_v30  ;;  %v9177_v47 = vsel %vm1804_vm5, %v1852_v36, %v1855_v29  ;;  %v1895_v36 = vshll.u32 %v9096_v56, 16  ;;  %v451_v29 = vld [vmem:[%s8586_s16 + $0x7c] sm:$0xf] }
 0x10b   : > { %8122 = vmatprep.subr.msk.bf16.mxu0 %vm603_vm0, %v6398_v61  ;;  %v1864_v61 = vshrl.u32 %v9063_v18, 16  ;;  %v6383_v33 = vcombine.low %v451_v29, %v451_v29 }
 0x10c   : > { %v1897_v3 = vrot.slane %v1895_v36, 1 }
 0x10d   : > { %v1866_v39 = vor.u32 %v1864_v61, %v1862_v32 }
 0x10f   : > { %v9199_v48 = vsel %vm1804_vm5, %v1866_v39, %v1869_v40  ;;  %v8241_v39 = vld [vmem:[%s11644_s5 + $0x8] sm:$0xff]   ;;  %v9243_v40 = vor.u32 %v2589_v27, %v2588_v20  ;;  %v1903_v27 = vshll.u32 %v6383_v33, 16  ;;  %v1898_v20 = vsel %vm1804_vm5, %v1894_v63, %v1897_v3  ;;  %v6453_v63 = vld [vmem:[%s9290_s14 + $0x38] sm:$0xff] }
 0x110   : > { %7299 = vmatpush3.bf16.msra.mxu1 %v8241_v39  ;;  %v2403_v33 = vsel %vm603_vm0, %v9128_v8, 0  ;;  %v9272_v39 = vld [vmem:[%s11642_s3 + $0x10] sm:$0x3] }
 0x111   : > { %7153 = vmatmul.mubr.msk.bf16.gmra.mrb[4].mxu0 %vm560_vm2, %v9035_v4  ;;  %7304 = vmatprep.subr.bf16.mxu1 %v11681_v55 }
 0x112   : > { %7156 = vmatprep.mubr.msk.bf16.mxu0 %vm560_vm2, %v9039_v6 }
 0x113   : > { %v8328_v62 = vpop.eup %8327 }
 0x114   : > { %v2930_v57 = vmul.f32 %v8328_v62, %v9156_v12  ;;  %v6455_v62 = vld [vmem:[%s9290_s14 + $0x48] sm:$0xff] }
 0x116   : > { %v2931_v11 = vpack.c.bf16 %v2930_v57, %v2930_v57  ;;  %v6458_v57 = vld [vmem:[%s9290_s14 + $0x60] sm:$0xff] }
 0x118   : > { %7301 = vmatmul.mubr.msk.bf16.vlgmr.msra.gmra.mrb[0].mxu1 %vm2949_vm7, %v2931_v11 }
 0x119   : > { %7157 = vmatmul.mubr.msk.bf16.gmra.mrb[8].mxu0 %vm560_vm2, %v9047_v10  ;;  %7320 = vmatprep.mubr.msk.bf16.mxu1 %vm8426_vm6, %v11681_v55 }
 0x11a   : > { %7160 = vmatprep.mubr.msk.bf16.mxu0 %vm560_vm2, %v9051_v15 }
 0x121   : > { %7161 = vmatmul.mubr.msk.bf16.gmra.mrb[12].mxu0 %vm560_vm2, %v9059_v16 }
 0x122   : > { %7164 = vmatprep.mubr.msk.bf16.mxu0 %vm560_vm2, %v9063_v18 }
 0x129   : > { %7165 = vmatmul.mubr.msk.bf16.gmra.mrb[16].mxu0 %vm560_vm2, %v9071_v31 }
 0x12a   : > { %7168 = vmatprep.mubr.msk.bf16.mxu0 %vm560_vm2, %v9075_v34 }
 0x131   : > { %7169 = vmatmul.mubr.msk.bf16.gmra.mrb[20].mxu0 %vm560_vm2, %v9083_v44 }
 0x132   : > { %7172 = vmatprep.mubr.msk.bf16.mxu0 %vm560_vm2, %v9087_v46 }
 0x139   : > { %7173 = vmatmul.mubr.msk.bf16.gmra.mrb[24].mxu0 %vm560_vm2, %v9096_v56 }
 0x13a   : > { %7178 = vmatprep.mubr.msk.bf16.mxu0 %vm560_vm2, %v1814_v5  ;;  %v1881_v5 = vshll.u32 %v9083_v44, 16 }
 0x141   : > { %7179 = vmatmul.mubr.msk.bf16.vlgmr.msra.gmra.mrb[0].mxu0 %vm560_vm2, %v9116_v21 }
 0x142   : > { %7207 = vmatpush3.bf16.msra.mxu0 %v2153_v0  ;;  %7182 = vmatprep.mubr.msk.bf16.mxu0 %vm560_vm2, %v9121_v51  ;;  %v1883_v0 = vrot.slane %v1881_v5, 1 }
 0x143   : > { %8123 = vmatprep.subr.msk.bf16.mxu0 %vm603_vm0, %v9128_v8  ;;  %v6449_v8 = vld [vmem:[%s9290_s14 + $0x18] sm:$0xff] }
 0x144   : > { %v9223_v50 = vsel %vm1804_vm5, %v1880_v52, %v1883_v0  ;;  %v1887_v32 = vor.u32 %v1885_v7, %v1883_v0  ;;  %v1899_v0 = vshrl.u32 %v9096_v56, 16 }
 0x146   : > { %v1891_v52 = vsel %vm1804_vm5, %v1887_v32, %v1890_v59  ;;  %v1901_v12 = vor.u32 %v1899_v0, %v1897_v3  ;;  %v1905_v59 = vrot.slane %v1903_v27, 1  ;;  %v6457_v27 = vld [vmem:[%s9290_s14 + $0x58] sm:$0xff] }
 0x148   : > { %v1906_v32 = vsel %vm1804_vm5, %v1901_v12, %v1905_v59 }
 0x149   : > { %7183 = vmatmul.mubr.msk.bf16.gmra.mrb[4].mxu0 %vm560_vm2, %v9144_v13 }
 0x14a   : > { %7186 = vmatprep.mubr.msk.bf16.mxu0 %vm560_vm2, %v9148_v37 }
 0x151   : > { %7187 = vmatmul.mubr.msk.bf16.gmra.mrb[8].mxu0 %vm560_vm2, %v9173_v38 }
 0x152   : > { %7190 = vmatprep.mubr.msk.bf16.mxu0 %vm560_vm2, %v9177_v47 }
 0x159   : > { %7191 = vmatmul.mubr.msk.bf16.gmra.mrb[12].mxu0 %vm560_vm2, %v9195_v49 }
 0x15a   : > { %7194 = vmatprep.mubr.msk.bf16.mxu0 %vm560_vm2, %v9199_v48 }
 0x161   : > { %7195 = vmatmul.mubr.msk.bf16.gmra.mrb[16].mxu0 %vm560_vm2, %v9219_v42 }
 0x162   : > { %7198 = vmatprep.mubr.msk.bf16.mxu0 %vm560_vm2, %v9223_v50 }
 0x169   : > { %7199 = vmatmul.mubr.msk.bf16.gmra.mrb[20].mxu0 %vm560_vm2, %v1891_v52 }
 0x16a   : > { %7202 = vmatprep.mubr.msk.bf16.mxu0 %vm560_vm2, %v1898_v20 }
 0x171   : > { %7203 = vmatmul.mubr.msk.bf16.gmra.mrb[24].mxu0 %vm560_vm2, %v1906_v32  ;;  %v6459_v32 = vld [vmem:[%s9290_s14 + $0x68] sm:$0xff] }
 0x172   : > { %7208 = vmatprep.mubr.msk.bf16.mxu0 %vm560_vm2, %v9116_v21  ;;  %v8427_v21 = vmov 0  }
 0x173   : > { %8205 = vset.pattern.permute.xlu1 %v8427_v21  ;;  %8204 = vset.pattern.permute.xlu0 %v8427_v21 }
 0x174   : > { %3057 = vperm.xlu0 %8204, %v6449_v8   ;;  %v6462_v8 = vld [vmem:[%s9290_s14 + $0x80] sm:$0xff] }
 0x179   : > { %7209 = vmatmul.mubr.msk.bf16.vlgmr.msra.gmra.mrb[0].mxu0 %vm560_vm2, %v9121_v51  ;;  %v6451_v51 = vld [vmem:[%s9290_s14 + $0x28] sm:$0xff] }
 0x17a   : > { %7237 = vmatpush3.bf16.msra.mxu0 %v2403_v33  ;;  %7212 = vmatprep.mubr.msk.bf16.mxu0 %vm560_vm2, %v9144_v13  ;;  %v452_v13 = vld [vmem:[%s8586_s16 + $0x80] sm:$0xf] }
 0x17b   : > { %8124 = vmatprep.subr.msk.bf16.mxu0 %vm603_vm0, %v9272_v39  ;;  %3067 = vperm.xlu1 %8205, %v6451_v51   ;;  %v2331_v51 = vrot.slane %v8613_v14, 1 }
 0x181   : > { %7213 = vmatmul.mubr.msk.bf16.gmra.mrb[4].mxu0 %vm560_vm2, %v9148_v37  ;;  %v6452_v37 = vld [vmem:[%s9290_s14 + $0x30] sm:$0xff] }
 0x182   : > { %7216 = vmatprep.mubr.msk.bf16.mxu0 %vm560_vm2, %v9173_v38  ;;  %v6450_v38 = vld [vmem:[%s9290_s14 + $0x20] sm:$0xff]  ;;  %3072 = vperm.xlu1 %8205, %v6452_v37  }
 0x183   : > { %3062 = vperm.xlu0 %8204, %v6450_v38   ;;  %v6464_v38 = vld [vmem:[%s9290_s14 + $0x90] sm:$0xff] }
 0x187   : > { %3077 = vperm.xlu0 %8204, %v6453_v63   ;;  %v2334_v63 = vrot.slane %v9035_v4, 1  ;;  %v2338_v4 = vrot.slane %v9047_v10, 1  ;;  %v2604_v10 = vrot.slane %v1857_v28, 1 }
 0x189   : > { %7217 = vmatmul.mubr.msk.bf16.gmra.mrb[8].mxu0 %vm560_vm2, %v9177_v47  ;;  %v9303_v47 = vcombine.low %v451_v29, %v452_v13 }
 0x18a   : > { %7220 = vmatprep.mubr.msk.bf16.mxu0 %vm560_vm2, %v9195_v49  ;;  %v6454_v49 = vld [vmem:[%s9290_s14 + $0x40] sm:$0xff] }
 0x18b   : > { %3082 = vperm.xlu1 %8205, %v6454_v49   ;;  %v2134_v3 = vshll.u32 %v9303_v47, 16  ;;  %3087 = vperm.xlu0 %8204, %v6455_v62   ;;  %v2138_v11 = vshrl.u32 %v9303_v47, 16  ;;  %v6463_v49 = vld [vmem:[%s9290_s14 + $0x88] sm:$0xff]  ;;  %v6466_v62 = vld [vmem:[%s9290_s14 + $0xa0] sm:$0xff] }
 0x18d   : > { %v2136_v29 = vrot.slane %v2134_v3, 1 }
 0x18f   : > { %3097 = vperm.xlu0 %8204, %v6457_v27   ;;  %v2140_v33 = vor.u32 %v2138_v11, %v2136_v29  ;;  %v2685_v27 = vsel %vm603_vm0, %v9272_v39, 0  ;;  %v6469_v39 = vld [vmem:[%s9290_s14 + $0xb8] sm:$0xff] }
 0x191   : > { %7221 = vmatmul.mubr.msk.bf16.gmra.mrb[12].mxu0 %vm560_vm2, %v9199_v48  ;;  %v6456_v48 = vld [vmem:[%s9290_s14 + $0x50] sm:$0xff] }
 0x192   : > { %7224 = vmatprep.mubr.msk.bf16.mxu0 %vm560_vm2, %v9219_v42  ;;  %v9314_v42 = vld [vmem:[%s8586_s16 + $0x84] ss:$0 sps:$4 sm:$0xff]   ;;  %3092 = vperm.xlu1 %8205, %v6456_v48   ;;  %v2336_v48 = vrot.slane %v9039_v6, 1  ;;  %v2600_v6 = vrot.slane %v1850_v17, 1 }
 0x193   : > { %v2142_v59 = vshll.u32 %v9314_v42, 16  ;;  %3107 = vperm.xlu0 %8204, %v6459_v32   ;;  %v6467_v32 = vld [vmem:[%s9290_s14 + $0xa8] sm:$0xff] }
 0x195   : > { %v2144_v21 = vrot.slane %v2142_v59, 1 }
 0x196   : > { %3102 = vperm.xlu1 %8205, %v6458_v57  }
 0x197   : > { %v2145_v13 = vsel %vm1804_vm5, %v2140_v33, %v2144_v21  ;;  %v2340_v33 = vrot.slane %v9051_v15, 1  ;;  %v6470_v21 = vld [vmem:[%s9290_s14 + $0xc0] sm:$0xff]  ;;  %v2608_v15 = vrot.slane %v1864_v61, 1 }
 0x199   : > { %7225 = vmatmul.mubr.msk.bf16.gmra.mrb[16].mxu0 %vm560_vm2, %v9223_v50  ;;  %v2137_v50 = vsel %vm1804_vm5, %v1901_v12, %v2136_v29  ;;  %v2332_v12 = vrot.slane %v9022_v30, 1  ;;  %v6465_v29 = vld [vmem:[%s9290_s14 + $0x98] sm:$0xff]  ;;  %v2593_v30 = vrot.slane %v1832_v25, 2  ;;  %v2601_v25 = vrot.slane %v1846_v54, 2 }
 0x19a   : > { %7228 = vmatprep.mubr.msk.bf16.mxu0 %vm560_vm2, %v1891_v52  ;;  %v6460_v52 = vld [vmem:[%s9290_s14 + $0x70] sm:$0xff]  ;;  %v2609_v54 = vrot.slane %v1860_v23, 2  ;;  %v2617_v23 = vrot.slane %v1874_v43, 2  ;;  %v2625_v43 = vrot.slane %v1888_v26, 2  ;;  %v2633_v26 = vrot.slane %v2134_v3, 2 }
 0x19b   : > { %3112 = vperm.xlu1 %8205, %v6460_v52   ;;  %v2333_v37 = vsel %vm2330_vm8, %v2331_v51, %v2332_v12  ;;  %v2335_v57 = vsel %vm2330_vm8, %v2332_v12, %v2334_v63  ;;  %v6468_v52 = vld [vmem:[%s9290_s14 + $0xb0] sm:$0xff]  ;;  %v2339_v51 = vsel %vm2330_vm8, %v2336_v48, %v2338_v4  ;;  %v8242_v12 = vld [vmem:[%s11646_s7 + $0x40] sm:$0xff]  }
 0x19c   : > { %7305 = vmatpush3.bf16.msra.mxu1 %v8242_v12  ;;  %v2354_v12 = vrot.slane %v9096_v56, 1 }
 0x19d   : > { %7306 = vmatprep.subr.bf16.mxu1 %v11681_v55 }
 0x19f   : > { %3122 = vperm.xlu1 %8205, %v6462_v8   ;;  %v2341_v8 = vsel %vm2330_vm8, %v2338_v4, %v2340_v33 }
 0x1a1   : > { %7229 = vmatmul.mubr.msk.bf16.gmra.mrb[20].mxu0 %vm560_vm2, %v1898_v20  ;;  %v6461_v20 = vld [vmem:[%s9290_s14 + $0x78] sm:$0xff] }
 0x1a2   : > { %7232 = vmatprep.mubr.msk.bf16.mxu0 %vm560_vm2, %v2137_v50  ;;  %3117 = vperm.xlu0 %8204, %v6461_v20   ;;  %v2337_v50 = vsel %vm2330_vm8, %v2334_v63, %v2336_v48  ;;  %v6472_v20 = vld [vmem:[%s9290_s14 + $0xd0] sm:$0xff]  ;;  %v6474_v63 = vld [vmem:[%s9290_s14 + $0xe0] sm:$0xff]  ;;  %v6473_v48 = vld [vmem:[%s9290_s14 + $0xd8] sm:$0xff] }
 0x1a3   : > { %3132 = vperm.xlu1 %8205, %v6464_v38   ;;  %v8243_v38 = vld [vmem:[%s11646_s7 + $0x48] sm:$0xff]  }
 0x1a4   : > { %7307 = vmatpush3.bf16.msra.mxu1 %v8243_v38  ;;  %v2582_v38 = vrot.slane %v1811_v22, 2  ;;  %v2592_v22 = vrot.slane %v1836_v45, 1 }
 0x1a5   : > { %7308 = vmatprep.subr.bf16.mxu1 %v11681_v55 }
 0x1a6   : > { %3127 = vperm.xlu0 %8204, %v6463_v49   ;;  %v2344_v49 = vrot.slane %v9063_v18, 1  ;;  %v2616_v18 = vrot.slane %v1878_v24, 1 }
 0x1a7   : > { %3142 = vperm.xlu1 %8205, %v6466_v62  }
 0x1a9   : > { %7233 = vmatmul.mubr.msk.bf16.gmra.mrb[24].mxu0 %vm560_vm2, %v2145_v13  ;;  %v6471_v13 = vld [vmem:[%s9290_s14 + $0xc8] sm:$0xff] }
 0x1aa   : > { %7238 = vmatprep.mubr.msk.bf16.mxu0 %vm560_vm2, %v2333_v37  ;;  %3137 = vperm.xlu0 %8204, %v6465_v29   ;;  %v2342_v37 = vrot.slane %v9059_v16, 1  ;;  %v2612_v16 = vrot.slane %v1871_v53, 1 }
 0x1ab   : > { %3152 = vperm.xlu1 %8205, %v6468_v52   ;;  %v2348_v52 = vrot.slane %v9075_v34, 1  ;;  %v2624_v34 = vrot.slane %v1892_v41, 1 }
 0x1ac   : > { %v2343_v62 = vsel %vm2330_vm8, %v2340_v33, %v2342_v37  ;;  %v2345_v29 = vsel %vm2330_vm8, %v2342_v37, %v2344_v49  ;;  %v2350_v33 = vrot.slane %v9083_v44, 1  ;;  %v2581_v37 = vrot.slane %v1815_v35, 1 }
 0x1ad   : > { %v2628_v44 = vrot.slane %v1899_v0, 1 }
 0x1ae   : > { %3147 = vperm.xlu0 %8204, %v6467_v32  }
 0x1af   : > { %3162 = vperm.xlu1 %8205, %v6470_v21   ;;  %v2352_v21 = vrot.slane %v9087_v46, 1  ;;  %v2632_v46 = vrot.slane %v2138_v11, 1 }
 0x1b1   : > { %7239 = vmatmul.mubr.msk.bf16.vlgmr.msra.gmra.mrb[0].mxu0 %vm560_vm2, %v2335_v57  ;;  %v6476_v57 = vld [vmem:[%s9290_s14 + $0xf0] sm:$0xff] }
 0x1b2   : > { %7267 = vmatpush3.bf16.msra.mxu0 %v2685_v27  ;;  %7242 = vmatprep.mubr.msk.bf16.mxu0 %vm560_vm2, %v2337_v50  ;;  %v6475_v27 = vld [vmem:[%s9290_s14 + $0xe8] sm:$0xff]  ;;  %v2346_v50 = vrot.slane %v9071_v31, 1  ;;  %v2620_v31 = vrot.slane %v1885_v7, 1  ;;  %s5871_s14 = sadd.s32 48, %s8567_s26 }
 0x1b3   : > { %7664 = vmatprep.subr.bf16.mxu0 %v11681_v55  ;;  %3157 = vperm.xlu0 %8204, %v6469_v39   ;;  %v2351_v39 = vsel %vm2330_vm8, %v2348_v52, %v2350_v33  ;;  %s5872_s16 = sshra.s32 %s5871_s14, 3  ;;  %s11582_s14 = scalar_lea.hbm %s11650_s11, %s6702_s21 }
 0x1b4   : > { %3172 = vperm.xlu1 %8205, %v6472_v20   ;;  %v2347_v32 = vsel %vm2330_vm8, %v2344_v49, %v2346_v50  ;;  %v2349_v4 = vsel %vm2330_vm8, %v2346_v50, %v2348_v52  ;;  %v2355_v20 = vsel %vm2330_vm8, %v2352_v21, %v2354_v12  ;;  %v2584_v49 = vrot.slane %v1822_v58, 1  ;;  %s6678_s28 = sshll.u32 %s5872_s16, 2 }
 0x1b5   : > { %v2602_v52 = vor.u32 %v2601_v25, %v2600_v6  ;;  %s10971_s29 = scalar_lea.vmem %s8583_s22, %s6678_s28 }
 0x1b7   : > { %3167 = vperm.xlu0 %8204, %v6471_v13  }
 0x1b8   : > { %3182 = vperm.xlu1 %8205, %v6474_v63   ;;  %v2585_v63 = vrot.slane %v1818_v1, 2  ;;  %v2594_v1 = vor.u32 %v2593_v30, %v2592_v22  ;;  %v8253_v22 = vld [vmem:[%s11646_s7 + $0x78] sm:$0xff]   ;;  %v8254_v30 = vld [vmem:[%s11646_s7 + $0x1a0] sm:$0xff]  }
 0x1b9   : > { %7243 = vmatmul.mubr.msk.bf16.gmra.mrb[4].mxu0 %vm560_vm2, %v2339_v51  ;;  %v2353_v51 = vsel %vm2330_vm8, %v2350_v33, %v2352_v21  ;;  %v2618_v33 = vor.u32 %v2617_v23, %v2616_v18 }
 0x1ba   : > { %7246 = vmatprep.mubr.msk.bf16.mxu0 %vm560_vm2, %v2341_v8  ;;  %v2356_v8 = vrot.slane %v9303_v47, 1  ;;  %v2595_v45 = vsel %vm2580_vm9, %v9243_v40, %v2594_v1 }
 0x1bb   : > { %3177 = vperm.xlu0 %8204, %v6473_v48   ;;  %v2358_v48 = vrot.slane %v9314_v42, 1 }
 0x1bc   : > { %3192 = vperm.xlu1 %8205, %v6476_v57   ;;  %v2357_v13 = vsel %vm2330_vm8, %v2354_v12, %v2356_v8  ;;  %v2596_v57 = vrot.slane %v1843_v9, 1  ;;  %v2636_v12 = vshrl.u32 %v9314_v42, 16  ;;  %v8244_v42 = vld [vmem:[%s11646_s7 + $0x50] sm:$0xff]  }
 0x1bd   : > { %v2359_v35 = vsel %vm2330_vm8, %v2356_v8, %v2358_v48  ;;  %v2634_v8 = vor.u32 %v2633_v26, %v2632_v46  ;;  %7309 = vmatpush3.bf16.msra.mxu1 %v8244_v42  ;;  %v8248_v48 = vld [vmem:[%s11646_s7 + $0x188] sm:$0xff]  }
 0x1be   : > { %v2638_v56 = vrot.slane %v2636_v12, 1  ;;  %7310 = vmatprep.subr.bf16.mxu1 %v11681_v55 }
 0x1bf   : > { %3187 = vperm.xlu0 %8204, %v6475_v27   ;;  %v2597_v27 = vrot.slane %v1839_v60, 2  ;;  %v2605_v60 = vrot.slane %v1853_v2, 2  ;;  %v2613_v2 = vrot.slane %v1867_v19, 2  ;;  %v2621_v19 = vrot.slane %v1881_v5, 2 }
 0x1c0   : > { %v2629_v5 = vrot.slane %v1895_v36, 2  ;;  %v2639_v36 = vrot.slane %v2142_v59, 2 }
 0x1c1   : > { %7247 = vmatmul.mubr.msk.bf16.gmra.mrb[8].mxu0 %vm560_vm2, %v2343_v62  ;;  %v2583_v62 = vor.u32 %v2582_v38, %v2581_v37  ;;  %v2598_v50 = vor.u32 %v2597_v27, %v2596_v57  ;;  %v2606_v17 = vor.u32 %v2605_v60, %v2604_v10  ;;  %v2614_v61 = vor.u32 %v2613_v2, %v2612_v16  ;;  %v8245_v38 = vld [vmem:[%s11646_s7 + $0x58] sm:$0xff]   ;;  %v2936_v60 = vld [vmem:[%s11645_s6] sm:$0x1] }
 0x1c2   : > { %7250 = vmatprep.mubr.msk.bf16.mxu0 %vm560_vm2, %v2345_v29  ;;  %v2586_v29 = vor.u32 %v2585_v63, %v2584_v49  ;;  %v2622_v24 = vor.u32 %v2621_v19, %v2620_v31  ;;  %v2630_v41 = vor.u32 %v2629_v5, %v2628_v44  ;;  %v2640_v47 = vor.u32 %v2639_v36, %v2638_v56  ;;  %v8246_v49 = vld [vmem:[%s11646_s7 + $0x180] sm:$0xff]   ;;  %v8258_v57 = vld [vmem:[%s11646_s7 + $0x1b8] sm:$0xff]  }
 0x1c3   : > { %v2599_v9 = vsel %vm2580_vm9, %v2594_v1, %v2598_v50  ;;  %v2619_v53 = vsel %vm2580_vm9, %v2614_v61, %v2618_v33  ;;  %7311 = vmatpush3.bf16.msra.mxu1 %v8245_v38  ;;  %v8247_v63 = vld [vmem:[%s11646_s7 + $0x60] sm:$0xff]   ;;  %v8256_v1 = vld [vmem:[%s11646_s7 + $0x1a8] sm:$0xff]  }
 0x1c4   : > { %v2587_v14 = vsel %vm2580_vm9, %v2583_v62, %v2586_v29  ;;  %v2591_v58 = vsel %vm2580_vm9, %v2586_v29, %v9243_v40  ;;  %v2603_v40 = vsel %vm2580_vm9, %v2598_v50, %v2602_v52  ;;  %v2641_v3 = vsel %vm2580_vm9, %v2634_v8, %v2640_v47  ;;  %7312 = vmatprep.subr.bf16.mxu1 %v11681_v55  ;;  %v8249_v62 = vld [vmem:[%s11646_s7 + $0x68] sm:$0xff]   ;;  %v8250_v29 = vld [vmem:[%s11646_s7 + $0x190] sm:$0xff]  }
 0x1c7   : > { %7313 = vmatpush3.bf16.msra.mxu1 %v8247_v63 }
 0x1c8   : > { %7314 = vmatprep.subr.bf16.mxu1 %v11681_v55 }
 0x1c9   : > { %7251 = vmatmul.mubr.msk.bf16.gmra.mrb[12].mxu0 %vm560_vm2, %v2347_v32  ;;  %v2610_v32 = vor.u32 %v2609_v54, %v2608_v15 }
 0x1ca   : > { %7254 = vmatprep.mubr.msk.bf16.mxu0 %vm560_vm2, %v2349_v4  ;;  %v2607_v4 = vsel %vm2580_vm9, %v2602_v52, %v2606_v17  ;;  %v3023_v52 = vlaneseq }
 0x1cb   : > { %v2611_v28 = vsel %vm2580_vm9, %v2606_v17, %v2610_v32  ;;  %v2615_v21 = vsel %vm2580_vm9, %v2610_v32, %v2614_v61  ;;  %7315 = vmatpush3.bf16.msra.mxu1 %v8249_v62  ;;  %v9556_v32 = vld [vmem:[%s11643_s4] ss:$0 sm:$0xff] }
 0x1cc   : > { %7316 = vmatprep.subr.bf16.mxu1 %v11681_v55  ;;  %v3024_v10 = vshrl.u32 %v3023_v52, 7 }
 0x1ce   : > { %v3025_v17 = vsub.s32 0, %v3024_v10 }
 0x1d1   : > { %7255 = vmatmul.mubr.msk.bf16.gmra.mrb[16].mxu0 %vm560_vm2, %v2351_v39  ;;  %v2626_v39 = vor.u32 %v2625_v43, %v2624_v34 }
 0x1d2   : > { %7258 = vmatprep.mubr.msk.bf16.mxu0 %vm560_vm2, %v2353_v51  ;;  %v2623_v51 = vsel %vm2580_vm9, %v2618_v33, %v2622_v24 }
 0x1d3   : > { %v2627_v7 = vsel %vm2580_vm9, %v2622_v24, %v2626_v39  ;;  %v2631_v0 = vsel %vm2580_vm9, %v2626_v39, %v2630_v41 }
 0x1d9   : > { %7259 = vmatmul.mubr.msk.bf16.gmra.mrb[20].mxu0 %vm560_vm2, %v2355_v20  ;;  %v2635_v20 = vsel %vm2580_vm9, %v2630_v41, %v2634_v8 }
 0x1da   : > { %7262 = vmatprep.mubr.msk.bf16.mxu0 %vm560_vm2, %v2357_v13 }
 0x1e1   : > { %7263 = vmatmul.mubr.msk.bf16.gmra.mrb[24].mxu0 %vm560_vm2, %v2359_v35  ;;  %v8251_v35 = vld [vmem:[%s11646_s7 + $0x70] sm:$0xff]  }
 0x1e2   : > { %7268 = vmatprep.mubr.msk.bf16.mxu0 %vm560_vm2, %v2587_v14  ;;  %v8252_v14 = vld [vmem:[%s11646_s7 + $0x198] sm:$0xff]   ;;  %7317 = vmatpush3.bf16.msra.mxu1 %v8251_v35 }
 0x1e3   : > { %7318 = vmatprep.subr.bf16.mxu1 %v11681_v55 }
 0x1e6   : > { %7319 = vmatpush3.bf16.msra.mxu1 %v8253_v22 }
 0x1e7   : > { %7364 = vmatprep.subr.bf16.mxu1 %v11681_v55 }
 0x1e9   : > { %7269 = vmatmul.mubr.msk.bf16.vlgmr.msra.gmra.mrb[0].mxu0 %vm560_vm2, %v2591_v58  ;;  %v8257_v58 = vld [vmem:[%s11646_s7 + $0x1b0] sm:$0xff]  }
 0x1ea   : > { %7272 = vmatprep.mubr.msk.bf16.mxu0 %vm560_vm2, %v2595_v45  ;;  %7665 = vmatpush3.bf16.msra.mxu0 %v8246_v49 }
 0x1eb   : > { %v2987_v11 = vpop.f32.mrb[0].mxu1  ;;  %7666 = vmatprep.subr.bf16.mxu0 %v11681_v55 }
 0x1ec   : > { %v7302_v59 = vpop.f32.mrb[1].mxu1  ;;  %v2988_v54 = vadd.f32 %v2987_v11, %v2936_v60 }
 0x1ed   : > { %v2990_v13 = vpop.f32.mrb[2].mxu1 }
 0x1ee   : > { %v7303_v37 = vpop.f32.mrb[3].mxu1  ;;  %7667 = vmatpush3.bf16.msra.mxu0 %v8248_v48 }
 0x1ef   : > { %7668 = vmatprep.subr.bf16.mxu0 %v11681_v55 }
 0x1f1   : > { %7273 = vmatmul.mubr.msk.bf16.gmra.mrb[4].mxu0 %vm560_vm2, %v2599_v9 }
 0x1f2   : > { %7276 = vmatprep.mubr.msk.bf16.mxu0 %vm560_vm2, %v2603_v40  ;;  %7669 = vmatpush3.bf16.msra.mxu0 %v8250_v29 }
 0x1f3   : > { %7670 = vmatprep.subr.bf16.mxu0 %v11681_v55  ;;  %v3058_v27 = vpop.permute.xlu0 %3057 }
 0x1f6   : > { %7671 = vmatpush3.bf16.msra.mxu0 %v8252_v14 }
 0x1f7   : > { %7672 = vmatprep.subr.bf16.mxu0 %v11681_v55 }
 0x1f9   : > { %7277 = vmatmul.mubr.msk.bf16.gmra.mrb[8].mxu0 %vm560_vm2, %v2607_v4 }
 0x1fa   : > { %7280 = vmatprep.mubr.msk.bf16.mxu0 %vm560_vm2, %v2611_v28  ;;  %7673 = vmatpush3.bf16.msra.mxu0 %v8254_v30  ;;  %v3068_v45 = vpop.permute.xlu1 %3067  ;;  %v9561_v28 = vrot.slane %v2988_v54, %v3025_v17 }
 0x1fb   : > { %7674 = vmatprep.subr.bf16.mxu0 %v11681_v55 }
 0x1fe   : > { %7675 = vmatpush3.bf16.msra.mxu0 %v8256_v1 }
 0x1ff   : > { %7676 = vmatprep.subr.bf16.mxu0 %v11681_v55 }
 0x201   : > { %7281 = vmatmul.mubr.msk.bf16.gmra.mrb[12].mxu0 %vm560_vm2, %v2615_v21  ;;  %v3073_v25 = vpop.permute.xlu1 %3072 }
 0x202   : > { %7284 = vmatprep.mubr.msk.bf16.mxu0 %vm560_vm2, %v2619_v53  ;;  %7677 = vmatpush3.bf16.msra.mxu0 %v8257_v58  ;;  %v3063_v6 = vpop.permute.xlu0 %3062 }
 0x203   : > { %7678 = vmatprep.subr.bf16.mxu0 %v11681_v55 }
 0x206   : > { %7679 = vmatpush3.bf16.msra.mxu0 %v8258_v57  ;;  %v9546_v50 = vpop.permute.xlu0 %3077 }
 0x207   : > { %7784 = vmatprep.subr.bf16.mxu0 %v11681_v55 }
 0x209   : > { %7285 = vmatmul.mubr.msk.bf16.gmra.mrb[16].mxu0 %vm560_vm2, %v2623_v51 }
 0x20a   : > { %7288 = vmatprep.mubr.msk.bf16.mxu0 %vm560_vm2, %v2627_v7  ;;  %v9548_v9 = vpop.permute.xlu1 %3082  ;;  %v3088_v40 = vpop.permute.xlu0 %3087 }
 0x20e   : > { %v9558_v16 = vpop.permute.xlu0 %3097 }
 0x211   : > { %7289 = vmatmul.mubr.msk.bf16.gmra.mrb[20].mxu0 %vm560_vm2, %v2631_v0  ;;  %v3093_v15 = vpop.permute.xlu1 %3092 }
 0x212   : > { %7292 = vmatprep.mubr.msk.bf16.mxu0 %vm560_vm2, %v2635_v20  ;;  %v9570_v44 = vpop.permute.xlu0 %3107 }
 0x215   : > { %v9563_v23 = vpop.permute.xlu1 %3102 }
 0x219   : > { %7293 = vmatmul.mubr.msk.bf16.gmra.mrb[24].mxu0 %vm560_vm2, %v2641_v3 }
 0x21a   : > { %7680 = vmatprep.mubr.msk.bf16.mxu0 %vm8426_vm6, %v11681_v55  ;;  %v9573_v7 = vpop.permute.xlu1 %3112 }
 0x21e   : > { %v9587_v29 = vpop.permute.xlu1 %3122 }
 0x221   : > { %v9582_v49 = vpop.permute.xlu0 %3117 }
 0x2bc   : > { %v7270_v4 = vpop.f32.mrb[0].mxu0 }
 0x2bd   : > { %v2869_v2 = vadd.f32 %v7270_v4, %v9556_v32  ;;  %v2721_v18 = vpop.f32.mrb[1].mxu0 }
 0x2be   : > { %v2867_v61 = vadd.f32 %v9556_v32, %v2721_v18  ;;  %v7271_v33 = vpop.f32.mrb[2].mxu0 }
 0x2bf   : > { %v2897_v21 = vmax.f32 %v2869_v2, 0.0  ;;  %v2870_v31 = vadd.f32 %v7271_v33, %v9556_v32  ;;  %v2724_v19 = vpop.f32.mrb[3].mxu0  ;;  %v9603_v2 = vpop.permute.xlu0 %3127 }
 0x2c0   : > { %v2895_v53 = vmax.f32 %v2867_v61, 0.0  ;;  %v2868_v34 = vadd.f32 %v9556_v32, %v2724_v19  ;;  %v9608_v33 = vpop.permute.xlu1 %3132 }
 0x2c1   : > { %v2898_v43 = vmax.f32 %v2870_v31, 0.0  ;;  %v3029_v24 = vadd.f32 %v9561_v28, %v2897_v21 }
 0x2c2   : > { %v3027_v39 = vadd.f32 %v9561_v28, %v2895_v53  ;;  %v2896_v51 = vmax.f32 %v2868_v34, 0.0 }
 0x2c3   : > { %v3030_v5 = vadd.f32 %v9561_v28, %v2898_v43  ;;  %v3197_v41 = vmul.f32 %v3068_v45, %v3029_v24 }
 0x2c4   : > { %v3028_v46 = vadd.f32 %v9561_v28, %v2896_v51  ;;  %v7274_v26 = vpop.f32.mrb[4].mxu0  ;;  %v3195_v56 = vmul.f32 %v3058_v27, %v3027_v39 }
 0x2c5   : > { %v3198_v12 = vmul.f32 %v3073_v25, %v3030_v5  ;;  %v2873_v8 = vadd.f32 %v7274_v26, %v9556_v32  ;;  %v2737_v0 = vpop.f32.mrb[5].mxu0 }
 0x2c6   : > { %v3196_v36 = vmul.f32 %v3063_v6, %v3028_v46  ;;  %v2871_v20 = vadd.f32 %v9556_v32, %v2737_v0  ;;  %v7275_v47 = vpop.f32.mrb[6].mxu0  ;;  %v8255_v46 = vld [vmem:[%s11646_s7] sm:$0xff]  }
 0x2c7   : > { %v9578_v3 = vpack.c.bf16 %v3198_v12, %v3197_v41  ;;  %v2901_v11 = vmax.f32 %v2873_v8, 0.0  ;;  %v2874_v42 = vadd.f32 %v7275_v47, %v9556_v32  ;;  %v2740_v59 = vpop.f32.mrb[7].mxu0 }
 0x2c8   : > { %v3223_v13 = vpack.c.bf16 %v3196_v36, %v3195_v56  ;;  %v2899_v37 = vmax.f32 %v2871_v20, 0.0  ;;  %v2872_v38 = vadd.f32 %v9556_v32, %v2740_v59  ;;  %v9636_v20 = vpop.permute.xlu0 %3137 }
 0x2c9   : > { %3238 = vst [vmem:[#allocation2 + $0x8] sm:$0xff] %v9578_v3  ;;  %v3033_v63 = vadd.f32 %v9561_v28, %v2901_v11  ;;  %v2902_v48 = vmax.f32 %v2874_v42, 0.0  ;;  %v3521_v62 = vshrl.u32 %v9578_v3, 16  ;;  %v3524_v22 = vshll.u32 %v9578_v3, 16 }
 0x2ca   : > { %3237 = vst [vmem:[#allocation2] sm:$0xff] %v3223_v13  ;;  %v3031_v35 = vadd.f32 %v9561_v28, %v2899_v37  ;;  %v2900_v14 = vmax.f32 %v2872_v38, 0.0  ;;  %v3310_v5 = vrot.slane %v9578_v3, 3 }
 0x2cb   : > { %v3034_v30 = vadd.f32 %v9561_v28, %v2902_v48  ;;  %v3825_v1 = vrot.slane %v3521_v62, 3  ;;  %v3826_v27 = vrot.slane %v3524_v22, 4  ;;  %v3201_v45 = vmul.f32 %v3088_v40, %v3033_v63 }
 0x2cc   : > { %v3032_v58 = vadd.f32 %v9561_v28, %v2900_v14  ;;  %v7278_v57 = vpop.f32.mrb[8].mxu0  ;;  %v3199_v10 = vmul.f32 %v9546_v50, %v3031_v35 }
 0x2cd   : > { %v3202_v6 = vmul.f32 %v3093_v15, %v3034_v30  ;;  %v2877_v25 = vadd.f32 %v7278_v57, %v9556_v32  ;;  %v2753_v52 = vpop.f32.mrb[9].mxu0  ;;  %v9601_v4 = vor.u32 %v3826_v27, %v3825_v1 }
 0x2ce   : > { %v3200_v60 = vmul.f32 %v9548_v9, %v3032_v58  ;;  %v2875_v54 = vadd.f32 %v9556_v32, %v2753_v52  ;;  %v7279_v17 = vpop.f32.mrb[10].mxu0 }
 0x2cf   : > { %v9605_v18 = vpack.c.bf16 %v3202_v6, %v3201_v45  ;;  %v2905_v61 = vmax.f32 %v2877_v25, 0.0  ;;  %v2878_v40 = vadd.f32 %v7279_v17, %v9556_v32  ;;  %v2756_v15 = vpop.f32.mrb[11].mxu0 }
 0x2d0   : > { %v9610_v21 = vpack.c.bf16 %v3200_v60, %v3199_v10  ;;  %v2903_v50 = vmax.f32 %v2875_v54, 0.0  ;;  %v2876_v9 = vadd.f32 %v9556_v32, %v2756_v15  ;;  %v3148_v15 = vpop.permute.xlu0 %3147 }
 0x2d1   : > { %3240 = vst [vmem:[#allocation2 + $0x18] sm:$0xff] %v9605_v18  ;;  %v3037_v31 = vadd.f32 %v9561_v28, %v2905_v61  ;;  %v2906_v19 = vmax.f32 %v2878_v40, 0.0  ;;  %v9615_v53 = vld [vmem:[#allocation2] sm:$0xf8]  ;;  %v9618_v34 = vshrl.u32 %v9605_v18, 16  ;;  %v9621_v43 = vshll.u32 %v9605_v18, 16 }
 0x2d2   : > { %3239 = vst [vmem:[#allocation2 + $0x10] sm:$0xff] %v9610_v21  ;;  %v3035_v24 = vadd.f32 %v9561_v28, %v2903_v50  ;;  %v2904_v39 = vmax.f32 %v2876_v9, 0.0  ;;  %v3309_v51 = vrot.slane %v9615_v53, 3  ;;  %v3312_v41 = vrot.slane %v9610_v21, 3  ;;  %v8260_v40 = vld [vmem:[%s11646_s7 + $0x10] sm:$0xff]  }
 0x2d3   : > { %v3038_v26 = vadd.f32 %v9561_v28, %v2906_v19  ;;  %v3205_v12 = vmul.f32 %v9570_v44, %v3037_v31  ;;  %v4988_v36 = vrot.slane %v9618_v34, 4  ;;  %v4991_v13 = vrot.slane %v9621_v43, 5  ;;  %v9642_v44 = vpop.permute.xlu1 %3142 }
 0x2d4   : > { %v3036_v8 = vadd.f32 %v9561_v28, %v2904_v39  ;;  %v7282_v0 = vpop.f32.mrb[12].mxu0  ;;  %v3311_v56 = vsel %vm530_vm1, %v3309_v51, %v3310_v5  ;;  %v3313_v59 = vsel %vm530_vm1, %v3310_v5, %v3312_v41  ;;  %v3203_v37 = vmul.f32 %v9558_v16, %v3035_v24 }
 0x2d5   : > { %v3206_v47 = vmul.f32 %v9573_v7, %v3038_v26  ;;  %v2881_v11 = vadd.f32 %v7282_v0, %v9556_v32  ;;  %v2769_v42 = vpop.f32.mrb[13].mxu0  ;;  %7321 = vmatmul.mubr.bf16.vlgmr.msra.gmra.mrb[4].mxu1 %v3311_v56  ;;  %v8259_v7 = vld [vmem:[%s11646_s7 + $0x8] sm:$0xff]   ;;  %v3314_v35 = vrot.slane %v9605_v18, 3  ;;  %v4992_v52 = vor.u32 %v4991_v13, %v4988_v36 }
 0x2d6   : > { %v3204_v38 = vmul.f32 %v9563_v23, %v3036_v8  ;;  %v2879_v63 = vadd.f32 %v9556_v32, %v2769_v42  ;;  %7365 = vmatpush3.bf16.msra.mxu1 %v8255_v46  ;;  %v7283_v48 = vpop.f32.mrb[14].mxu0  ;;  %7324 = vmatprep.mubr.msk.bf16.mxu1 %vm8426_vm6, %v11681_v55 }
 0x2d7   : > { %v9653_v14 = vpack.c.bf16 %v3206_v47, %v3205_v12  ;;  %v2909_v30 = vmax.f32 %v2881_v11, 0.0  ;;  %v2882_v16 = vadd.f32 %v7283_v48, %v9556_v32  ;;  %v2772_v1 = vpop.f32.mrb[15].mxu0  ;;  %7366 = vmatprep.subr.bf16.mxu1 %v11681_v55  ;;  %v9663_v27 = vsel %vm530_vm1, %v3312_v41, %v3314_v35  ;;  %v3153_v24 = vpop.permute.xlu1 %3152  ;;  %v8261_v11 = vld [vmem:[%s11646_s7 + $0x18] sm:$0xff]  }
 0x2d8   : > { %v9657_v23 = vpack.c.bf16 %v3204_v38, %v3203_v37  ;;  %v2907_v58 = vmax.f32 %v2879_v63, 0.0  ;;  %v2880_v57 = vadd.f32 %v9556_v32, %v2772_v1  ;;  %v8265_v38 = vld [vmem:[%s11646_s7 + $0x200] sm:$0xff]  }
 0x2d9   : > { %3242 = vst [vmem:[#allocation2 + $0x28] sm:$0xff] %v9653_v14  ;;  %v3041_v45 = vadd.f32 %v9561_v28, %v2909_v30  ;;  %v2910_v6 = vmax.f32 %v2882_v16, 0.0  ;;  %v4948_v25 = vld [vmem:[#allocation2 + $0x10] sm:$0xf0]  ;;  %v9668_v10 = vshrl.u32 %v9653_v14, 16  ;;  %v9711_v16 = vpop.permute.xlu0 %3157 }
 0x2da   : > { %3241 = vst [vmem:[#allocation2 + $0x20] sm:$0xff] %v9657_v23  ;;  %v3039_v60 = vadd.f32 %v9561_v28, %v2907_v58  ;;  %v2908_v54 = vmax.f32 %v2880_v57, 0.0  ;;  %7367 = vmatpush3.bf16.msra.mxu1 %v8259_v7  ;;  %v4978_v17 = vshrl.u32 %v4948_v25, 16  ;;  %v4981_v61 = vshll.u32 %v4948_v25, 16 }
 0x2db   : > { %v3209_v50 = vmul.f32 %v9603_v2, %v3041_v45  ;;  %v3042_v9 = vadd.f32 %v9561_v28, %v2910_v6  ;;  %v9678_v31 = vshrl.u32 %v9657_v23, 16  ;;  %v9681_v19 = vshll.u32 %v9657_v23, 16  ;;  %7368 = vmatprep.subr.bf16.mxu1 %v11681_v55  ;;  %v9717_v6 = vpop.permute.xlu1 %3162 }
 0x2dc   : > { %v3207_v39 = vmul.f32 %v9582_v49, %v3039_v60  ;;  %v3040_v51 = vadd.f32 %v9561_v28, %v2908_v54  ;;  %v7286_v5 = vpop.f32.mrb[16].mxu0  ;;  %v4980_v46 = vrot.slane %v4978_v17, 4  ;;  %v4983_v26 = vrot.slane %v4981_v61, 5 }
 0x2dd   : > { %v3210_v2 = vmul.f32 %v9608_v33, %v3042_v9  ;;  %v2885_v41 = vadd.f32 %v7286_v5, %v9556_v32  ;;  %v2785_v12 = vpop.f32.mrb[17].mxu0  ;;  %7325 = vmatmul.mubr.bf16.gmra.mrb[8].mxu1 %v3313_v59  ;;  %v4997_v8 = vrot.slane %v9678_v31, 4  ;;  %v5000_v0 = vrot.slane %v9681_v19, 5  ;;  %v8266_v9 = vld [vmem:[%s11646_s7 + $0x208] sm:$0xff]  }
 0x2de   : > { %v3208_v56 = vmul.f32 %v9587_v29, %v3040_v51  ;;  %v2883_v36 = vadd.f32 %v9556_v32, %v2785_v12  ;;  %v7287_v49 = vpop.f32.mrb[18].mxu0  ;;  %v4984_v47 = vor.u32 %v4983_v26, %v4980_v46  ;;  %7328 = vmatprep.mubr.msk.bf16.mxu1 %vm8426_vm6, %v11681_v55  ;;  %7369 = vmatpush3.bf16.msra.mxu1 %v8260_v40  ;;  %v9695_v33 = vshll.u32 %v9653_v14, 16 }
 0x2df   : > { %v9700_v42 = vpack.c.bf16 %v3210_v2, %v3209_v50  ;;  %v2913_v59 = vmax.f32 %v2885_v41, 0.0  ;;  %v2886_v29 = vadd.f32 %v7287_v49, %v9556_v32  ;;  %v2788_v13 = vpop.f32.mrb[19].mxu0  ;;  %v5001_v37 = vor.u32 %v5000_v0, %v4997_v8  ;;  %7370 = vmatprep.subr.bf16.mxu1 %v11681_v55  ;;  %v8262_v50 = vld [vmem:[%s11646_s7 + $0x20] sm:$0xff]  }
 0x2e0   : > { %v9707_v63 = vpack.c.bf16 %v3208_v56, %v3207_v39  ;;  %v2911_v48 = vmax.f32 %v2883_v36, 0.0  ;;  %v2884_v7 = vadd.f32 %v9556_v32, %v2788_v13  ;;  %v4993_v30 = vsel %vm4688_vm10, %v4984_v47, %v4992_v52  ;;  %v3173_v13 = vpop.permute.xlu1 %3172 }
 0x2e1   : > { %3244 = vst [vmem:[#allocation2 + $0x38] sm:$0xff] %v9700_v42  ;;  %v3045_v1 = vadd.f32 %v9561_v28, %v2913_v59  ;;  %v2914_v58 = vmax.f32 %v2886_v29, 0.0  ;;  %7681 = vmatmul.mubr.bf16.vlgmr.msra.gmra.mrb[28].mxu0 %v4993_v30  ;;  %v5002_v57 = vsel %vm4688_vm10, %v4992_v52, %v5001_v37  ;;  %v3316_v45 = vrot.slane %v9657_v23, 3  ;;  %v8263_v59 = vld [vmem:[%s11646_s7 + $0x28] sm:$0xff]   ;;  %v8268_v29 = vld [vmem:[%s11646_s7 + $0x210] sm:$0xff]  }
 0x2e2   : > { %3243 = vst [vmem:[#allocation2 + $0x30] sm:$0xff] %v9707_v63  ;;  %v3043_v25 = vadd.f32 %v9561_v28, %v2911_v48  ;;  %v2912_v60 = vmax.f32 %v2884_v7, 0.0  ;;  %7684 = vmatprep.mubr.msk.bf16.mxu0 %vm8426_vm6, %v11681_v55  ;;  %v5006_v54 = vrot.slane %v9668_v10, 4  ;;  %v5009_v17 = vrot.slane %v9695_v33, 5  ;;  %7371 = vmatpush3.bf16.msra.mxu1 %v8261_v11 }
 0x2e3   : > { %v3213_v61 = vmul.f32 %v3148_v15, %v3045_v1  ;;  %v3046_v52 = vadd.f32 %v9561_v28, %v2914_v58  ;;  %v9729_v40 = vsel %vm530_vm1, %v3314_v35, %v3316_v45  ;;  %7372 = vmatprep.subr.bf16.mxu1 %v11681_v55  ;;  %7785 = vmatpush3.bf16.msra.mxu0 %v8265_v38  ;;  %v3318_v35 = vrot.slane %v9653_v14, 3 }
 0x2e4   : > { %v3211_v15 = vmul.f32 %v9636_v20, %v3043_v25  ;;  %v3044_v39 = vadd.f32 %v9561_v28, %v2912_v60  ;;  %v7290_v51 = vpop.f32.mrb[20].mxu0  ;;  %v5010_v5 = vor.u32 %v5009_v17, %v5006_v54  ;;  %7786 = vmatprep.subr.bf16.mxu0 %v11681_v55  ;;  %v9745_v41 = vshrl.u32 %v9707_v63, 16 }
 0x2e5   : > { %v3214_v46 = vmul.f32 %v3153_v24, %v3046_v52  ;;  %v2889_v26 = vadd.f32 %v7290_v51, %v9556_v32  ;;  %v2801_v2 = vpop.f32.mrb[21].mxu0  ;;  %7329 = vmatmul.mubr.bf16.gmra.mrb[12].mxu1 %v9663_v27  ;;  %v9748_v12 = vshll.u32 %v9707_v63, 16  ;;  %v9758_v56 = vsel %vm530_vm1, %v3316_v45, %v3318_v35  ;;  %v3168_v27 = vpop.permute.xlu0 %3167  ;;  %v8264_v52 = vld [vmem:[%s11646_s7 + $0x30] sm:$0xff]  }
 0x2e6   : > { %v3212_v20 = vmul.f32 %v9642_v44, %v3044_v39  ;;  %v2887_v8 = vadd.f32 %v9556_v32, %v2801_v2  ;;  %v7291_v0 = vpop.f32.mrb[22].mxu0  ;;  %7332 = vmatprep.mubr.msk.bf16.mxu1 %vm8426_vm6, %v11681_v55  ;;  %v9755_v24 = vsel %vm4688_vm10, %v5001_v37, %v5010_v5  ;;  %v5015_v44 = vrot.slane %v9745_v41, 4  ;;  %7373 = vmatpush3.bf16.msra.mxu1 %v8262_v50  ;;  %v8269_v50 = vld [vmem:[%s11646_s7 + $0x218] sm:$0xff]  }
 0x2e7   : > { %v9760_v36 = vpack.c.bf16 %v3214_v46, %v3213_v61  ;;  %v2917_v49 = vmax.f32 %v2889_v26, 0.0  ;;  %v2890_v47 = vadd.f32 %v7291_v0, %v9556_v32  ;;  %v2804_v11 = vpop.f32.mrb[23].mxu0  ;;  %7787 = vmatpush3.bf16.msra.mxu0 %v8266_v9  ;;  %v5018_v7 = vrot.slane %v9748_v12, 5  ;;  %7374 = vmatprep.subr.bf16.mxu1 %v11681_v55 }
 0x2e8   : > { %v9770_v37 = vpack.c.bf16 %v3212_v20, %v3211_v15  ;;  %v2915_v38 = vmax.f32 %v2887_v8, 0.0  ;;  %v2888_v48 = vadd.f32 %v9556_v32, %v2804_v11  ;;  %7788 = vmatprep.subr.bf16.mxu0 %v11681_v55  ;;  %v3320_v58 = vrot.slane %v9707_v63, 3 }
 0x2e9   : > { %3246 = vst [vmem:[#allocation2 + $0x48] sm:$0xff] %v9760_v36  ;;  %v3049_v30 = vadd.f32 %v9561_v28, %v2917_v49  ;;  %v2918_v1 = vmax.f32 %v2890_v47, 0.0  ;;  %7685 = vmatmul.mubr.bf16.gmra.mrb[32].mxu0 %v5002_v57  ;;  %v5019_v60 = vor.u32 %v5018_v7, %v5015_v44  ;;  %v9784_v54 = vshrl.u32 %v9700_v42, 16  ;;  %v3178_v46 = vpop.permute.xlu0 %3177 }
 0x2ea   : > { %3245 = vst [vmem:[#allocation2 + $0x40] sm:$0xff] %v9770_v37  ;;  %v3047_v45 = vadd.f32 %v9561_v28, %v2915_v38  ;;  %v2916_v25 = vmax.f32 %v2888_v48, 0.0  ;;  %7688 = vmatprep.mubr.msk.bf16.mxu0 %vm8426_vm6, %v11681_v55  ;;  %v9788_v61 = vsel %vm530_vm1, %v3318_v35, %v3320_v58  ;;  %v9791_v57 = vshll.u32 %v9700_v42, 16  ;;  %7375 = vmatpush3.bf16.msra.mxu1 %v8263_v59  ;;  %v8270_v38 = vld [vmem:[%s11646_s7 + $0x220] sm:$0xff]  }
 0x2eb   : > { %v3050_v17 = vadd.f32 %v9561_v28, %v2918_v1  ;;  %7789 = vmatpush3.bf16.msra.mxu0 %v8268_v29  ;;  %v3217_v9 = vmul.f32 %v3168_v27, %v3049_v30  ;;  %v9801_v51 = vsel %vm4688_vm10, %v5010_v5, %v5019_v60  ;;  %v5024_v35 = vrot.slane %v9784_v54, 4  ;;  %7376 = vmatprep.subr.bf16.mxu1 %v11681_v55  ;;  %v3183_v27 = vpop.permute.xlu1 %3182 }
 0x2ec   : > { %v3048_v15 = vadd.f32 %v9561_v28, %v2916_v25  ;;  %v7294_v39 = vpop.f32.mrb[24].mxu0  ;;  %7790 = vmatprep.subr.bf16.mxu0 %v11681_v55  ;;  %v3215_v26 = vmul.f32 %v9711_v16, %v3047_v45  ;;  %v5027_v0 = vrot.slane %v9791_v57, 5  ;;  %v3322_v11 = vrot.slane %v9700_v42, 3 }
 0x2ed   : > { %v3218_v2 = vmul.f32 %v3173_v13, %v3050_v17  ;;  %v2893_v20 = vadd.f32 %v7294_v39, %v9556_v32  ;;  %v2817_v8 = vpop.f32.mrb[25].mxu0  ;;  %7333 = vmatmul.mubr.bf16.gmra.mrb[16].mxu1 %v9729_v40  ;;  %v9816_v16 = vshrl.u32 %v9770_v37, 16  ;;  %v8272_v39 = vld [vmem:[%s11646_s7 + $0x228] sm:$0xff]  }
 0x2ee   : > { %v3216_v5 = vmul.f32 %v9717_v6, %v3048_v15  ;;  %v2891_v49 = vadd.f32 %v9556_v32, %v2817_v8  ;;  %v7295_v47 = vpop.f32.mrb[26].mxu0  ;;  %7336 = vmatprep.mubr.msk.bf16.mxu1 %vm8426_vm6, %v11681_v55  ;;  %v5028_v13 = vor.u32 %v5027_v0, %v5024_v35  ;;  %7377 = vmatpush3.bf16.msra.mxu1 %v8264_v52  ;;  %v8267_v6 = vld [vmem:[%s11646_s7 + $0x38] sm:$0xff]   ;;  %v9860_v8 = vshll.u32 %v9760_v36, 16 }
 0x2ef   : > { %v9818_v44 = vpack.c.bf16 %v3218_v2, %v3217_v9  ;;  %v2921_v59 = vmax.f32 %v2893_v20, 0.0  ;;  %v2894_v40 = vadd.f32 %v7295_v47, %v9556_v32  ;;  %v2820_v29 = vpop.f32.mrb[27].mxu0  ;;  %7791 = vmatpush3.bf16.msra.mxu0 %v8269_v50  ;;  %v9831_v1 = vsel %vm530_vm1, %v3320_v58, %v3322_v11  ;;  %7378 = vmatprep.subr.bf16.mxu1 %v11681_v55  ;;  %v3188_v9 = vpop.permute.xlu0 %3187 }
 0x2f0   : > { %v9827_v48 = vpack.c.bf16 %v3216_v5, %v3215_v26  ;;  %v2919_v7 = vmax.f32 %v2891_v49, 0.0  ;;  %v2892_v30 = vadd.f32 %v9556_v32, %v2820_v29  ;;  %7792 = vmatprep.subr.bf16.mxu0 %v11681_v55  ;;  %v9839_v17 = vsel %vm4688_vm10, %v5019_v60, %v5028_v13  ;;  %v3193_v35 = vpop.permute.xlu1 %3192 }
 0x2f1   : > { %11742 = vst [vmem:[#allocation11_spill] sm:$0xff] %v9818_v44  ;;  %3248 = vst [vmem:[#allocation2 + $0x58] sm:$0xff] %v9818_v44  ;;  %v3053_v45 = vadd.f32 %v9561_v28, %v2921_v59  ;;  %v2922_v25 = vmax.f32 %v2894_v40, 0.0  ;;  %7689 = vmatmul.mubr.bf16.gmra.mrb[36].mxu0 %v9755_v24  ;;  %v5033_v52 = vrot.slane %v9816_v16, 4  ;;  %v9847_v50 = vshll.u32 %v9770_v37, 16 }
 0x2f2   : > { %3247 = vst [vmem:[#allocation2 + $0x50] sm:$0xff] %v9827_v48  ;;  %v3051_v32 = vadd.f32 %v9561_v28, %v2919_v7  ;;  %v2920_v58 = vmax.f32 %v2892_v30, 0.0  ;;  %7692 = vmatprep.mubr.msk.bf16.mxu0 %vm8426_vm6, %v11681_v55  ;;  %v3324_v24 = vrot.slane %v9770_v37, 3  ;;  %v9852_v60 = vshrl.u32 %v9760_v36, 16  ;;  %7379 = vmatpush3.bf16.msra.mxu1 %v8267_v6 }
 0x2f3   : > { %v3054_v15 = vadd.f32 %v9561_v28, %v2922_v25  ;;  %7793 = vmatpush3.bf16.msra.mxu0 %v8270_v38  ;;  %v3221_v26 = vmul.f32 %v3188_v9, %v3053_v45  ;;  %v5036_v20 = vrot.slane %v9847_v50, 5  ;;  %7424 = vmatprep.subr.bf16.mxu1 %v11681_v55  ;;  %v5045_v40 = vrot.slane %v9860_v8, 5 }
 0x2f4   : > { %v3052_v2 = vadd.f32 %v9561_v28, %v2920_v58  ;;  %7794 = vmatprep.subr.bf16.mxu0 %v11681_v55  ;;  %v3219_v0 = vmul.f32 %v3178_v46, %v3051_v32  ;;  %v9866_v49 = vsel %vm530_vm1, %v3322_v11, %v3324_v24  ;;  %v5042_v47 = vrot.slane %v9852_v60, 4 }
 0x2f5   : > { %v3222_v5 = vmul.f32 %v3193_v35, %v3054_v15  ;;  %7337 = vmatmul.mubr.bf16.gmra.mrb[20].mxu1 %v9758_v56  ;;  %v5037_v28 = vor.u32 %v5036_v20, %v5033_v52  ;;  %v3326_v29 = vrot.slane %v9760_v36, 3  ;;  %v9874_v46 = vshrl.u32 %v9827_v48, 16 }
 0x2f6   : > { %v3220_v59 = vmul.f32 %v3183_v27, %v3052_v2  ;;  %7340 = vmatprep.mubr.msk.bf16.mxu1 %vm8426_vm6, %v11681_v55  ;;  %v9877_v56 = vshll.u32 %v9827_v48, 16  ;;  %v8273_v27 = vld [vmem:[%s11646_s7 + $0x230] sm:$0xff]   ;;  %v5046_v7 = vor.u32 %v5045_v40, %v5042_v47  ;;  %v11674_v32 = vrot.slane %v9827_v48, 3 }
 0x2f7   : > { %v3236_v6 = vpack.c.bf16 %v3222_v5, %v3221_v26  ;;  %7795 = vmatpush3.bf16.msra.mxu0 %v8272_v39  ;;  %v5038_v38 = vsel %vm4688_vm10, %v5028_v13, %v5037_v28  ;;  %v9886_v30 = vsel %vm530_vm1, %v3324_v24, %v3326_v29  ;;  %v5051_v45 = vrot.slane %v9874_v46, 4  ;;  %v8274_v39 = vld [vmem:[%s11646_s7 + $0x238] sm:$0xff]  }
 0x2f8   : > { %v9882_v11 = vpack.c.bf16 %v3220_v59, %v3219_v0  ;;  %7796 = vmatprep.subr.bf16.mxu0 %v11681_v55  ;;  %v5054_v25 = vrot.slane %v9877_v56, 5  ;;  %v11680_v58 = vshrl.u32 %v9818_v44, 16  ;;  %v9898_v13 = vsel %vm4688_vm10, %v5037_v28, %v5046_v7 }
 0x2f9   : > { %3250 = vst [vmem:[#allocation2 + $0x68] sm:$0xff] %v3236_v6  ;;  %7693 = vmatmul.mubr.bf16.gmra.mrb[40].mxu0 %v9801_v51  ;;  %v11679_v52 = vshll.u32 %v9818_v44, 16  ;;  %v9904_v51 = vsel %vm530_vm1, %v3326_v29, %v11674_v32  ;;  %v3523_v0 = vrot.slane %v3521_v62, 2  ;;  %v3526_v5 = vrot.slane %v3524_v22, 3 }
 0x2fa   : > { %3249 = vst [vmem:[#allocation2 + $0x60] sm:$0xff] %v9882_v11  ;;  %7696 = vmatprep.mubr.msk.bf16.mxu0 %vm8426_vm6, %v11681_v55  ;;  %v5055_v9 = vor.u32 %v5054_v25, %v5051_v45  ;;  %v5060_v15 = vrot.slane %v11680_v58, 4  ;;  %v11678_v24 = vshrl.u32 %v9882_v11, 16  ;;  %v11677_v26 = vshll.u32 %v9882_v11, 16 }
 0x2fb   : > { %7797 = vmatpush3.bf16.msra.mxu0 %v8273_v27  ;;  %v5063_v35 = vrot.slane %v11679_v52, 5  ;;  %v11675_v28 = vshll.u32 %v9610_v21, 16  ;;  %v9949_v6 = vor.u32 %v3526_v5, %v3523_v0  ;;  %v5574_v45 = vrot.slane %v9681_v19, 6 }
 0x2fc   : > { %7798 = vmatprep.subr.bf16.mxu0 %v11681_v55  ;;  %v9918_v2 = vsel %vm4688_vm10, %v5046_v7, %v5055_v9  ;;  %v5069_v20 = vrot.slane %v11678_v24, 4  ;;  %v5072_v59 = vrot.slane %v11677_v26, 5  ;;  %v3550_v25 = vrot.slane %v9678_v31, 2 }
 0x2fd   : > { %7341 = vmatmul.mubr.bf16.gmra.mrb[24].mxu1 %v9788_v61  ;;  %v5064_v47 = vor.u32 %v5063_v35, %v5060_v15  ;;  %v11676_v61 = vshrl.u32 %v9610_v21, 16  ;;  %v3535_v62 = vrot.slane %v11675_v28, 3  ;;  %v3562_v5 = vrot.slane %v9695_v33, 3 }
 0x2fe   : > { %7344 = vmatprep.mubr.msk.bf16.mxu1 %vm8426_vm6, %v11681_v55  ;;  %v9935_v29 = vor.u32 %v5072_v59, %v5069_v20  ;;  %v5578_v20 = vrot.slane %v9695_v33, 6  ;;  %v3821_v59 = vshll.u32 %v9615_v53, 16  ;;  %v5589_v0 = vrot.slane %v9816_v16, 5 }
 0x2ff   : > { %7799 = vmatpush3.bf16.msra.mxu0 %v8274_v39  ;;  %v9933_v40 = vsel %vm4688_vm10, %v5055_v9, %v5064_v47  ;;  %v3532_v3 = vrot.slane %v11676_v61, 2  ;;  %v3553_v9 = vrot.slane %v9681_v19, 3  ;;  %v5577_v39 = vrot.slane %v9668_v10, 5 }
 0x300   : > { %7844 = vmatprep.subr.bf16.mxu0 %v11681_v55  ;;  %v9947_v22 = vsel %vm4688_vm10, %v5064_v47, %v9935_v29  ;;  %v5581_v47 = vrot.slane %v9745_v41, 5  ;;  %v3577_v61 = vrot.slane %v9784_v54, 2  ;;  %v3586_v24 = vrot.slane %v9816_v16, 2 }
 0x301   : > { %7697 = vmatmul.mubr.bf16.gmra.mrb[44].mxu0 %v9839_v17  ;;  %v9951_v27 = vor.u32 %v3535_v62, %v3532_v3  ;;  %v5573_v17 = vrot.slane %v9678_v31, 5  ;;  %v9968_v35 = vor.u32 %v3553_v9, %v3550_v25  ;;  %v5579_v3 = vor.u32 %v5578_v20, %v5577_v39 }
 0x302   : > { %7700 = vmatprep.mubr.msk.bf16.mxu0 %vm8426_vm6, %v11681_v55  ;;  %v5582_v62 = vrot.slane %v9748_v12, 6  ;;  %v3571_v25 = vrot.slane %v9748_v12, 3  ;;  %v5586_v9 = vrot.slane %v9791_v57, 6  ;;  %v3580_v39 = vrot.slane %v9791_v57, 3 }
 0x303   : > { %v9956_v7 = vsel %vm752_vm3, %v9949_v6, %v9951_v27  ;;  %v9965_v15 = vor.u32 %v5574_v45, %v5573_v17  ;;  %v3568_v17 = vrot.slane %v9745_v41, 2  ;;  %v5597_v58 = vrot.slane %v9874_v46, 5 }
 0x304   : > { %v5583_v28 = vor.u32 %v5582_v62, %v5581_v47  ;;  %v3581_v47 = vor.u32 %v3580_v39, %v3577_v61  ;;  %v5590_v62 = vrot.slane %v9847_v50, 6  ;;  %v5594_v61 = vrot.slane %v9860_v8, 6  ;;  %v10016_v39 = vld [vmem:[#allocation2 + $0x58] sm:$0x7] }
 0x305   : > { %7345 = vmatmul.mubr.bf16.gmra.mrb[28].mxu1 %v9831_v1  ;;  %v3559_v1 = vrot.slane %v9668_v10, 2  ;;  %v9985_v32 = vsel %vm5560_vm11, %v9965_v15, %v5579_v3 }
 0x306   : > { %7348 = vmatprep.mubr.msk.bf16.mxu1 %vm8426_vm6, %v11681_v55  ;;  %11743 = vst [vmem:[#allocation13_spill] sm:$0xff] %v9985_v32  ;;  %v9998_v26 = vsel %vm5560_vm11, %v5579_v3, %v5583_v28  ;;  %v5591_v3 = vor.u32 %v5590_v62, %v5589_v0  ;;  %v3604_v62 = vrot.slane %v9874_v46, 2 }
 0x307   : > { %v3563_v45 = vor.u32 %v3562_v5, %v3559_v1  ;;  %v3572_v1 = vor.u32 %v3571_v25, %v3568_v17  ;;  %11745 = vst [vmem:[#allocation15_spill] sm:$0xff] %v9998_v26  ;;  %v3589_v17 = vrot.slane %v9847_v50, 3  ;;  %v5593_v25 = vrot.slane %v9852_v60, 5 }
 0x309   : > { %7701 = vmatmul.mubr.bf16.gmra.mrb[48].mxu0 %v5038_v38  ;;  %v5585_v38 = vrot.slane %v9784_v54, 5  ;;  %v9992_v20 = vsel %vm752_vm3, %v9968_v35, %v3563_v45 }
 0x30a   : > { %7704 = vmatprep.mubr.msk.bf16.mxu0 %vm8426_vm6, %v11681_v55  ;;  %11744 = vst [vmem:[#allocation12_spill] sm:$0xff] %v9992_v20 }
 0x30b   : > { %v5587_v5 = vor.u32 %v5586_v9, %v5585_v38  ;;  %v10011_v38 = vsel %vm752_vm3, %v3572_v1, %v3581_v47  ;;  %v3595_v9 = vrot.slane %v9852_v60, 2 }
 0x30c   : > { %11748 = vst [vmem:[#allocation17_spill] sm:$0xff] %v10011_v38 }
 0x30d   : > { %7349 = vmatmul.mubr.bf16.gmra.mrb[32].mxu1 %v9866_v49  ;;  %v10003_v49 = vsel %vm752_vm3, %v3563_v45, %v3572_v1  ;;  %v10006_v52 = vsel %vm5560_vm11, %v5583_v28, %v5587_v5  ;;  %v3590_v45 = vor.u32 %v3589_v17, %v3586_v24  ;;  %v3598_v28 = vrot.slane %v9860_v8, 3 }
 0x30e   : > { %7352 = vmatprep.mubr.msk.bf16.mxu1 %vm8426_vm6, %v11681_v55  ;;  %11746 = vst [vmem:[#allocation14_spill] sm:$0xff] %v10003_v49  ;;  %11747 = vst [vmem:[#allocation16_spill] sm:$0xff] %v10006_v52  ;;  %v5598_v55 = vrot.slane %v9877_v56, 6  ;;  %v11749_v52 = vmov 0.0   ;;  %v10024_v0 = vsel %vm5560_vm11, %v5587_v5, %v5591_v3  ;;  %v5595_v1 = vor.u32 %v5594_v61, %v5593_v25  ;;  %v5542_v61 = vld [vmem:[#allocation2 + $0x68] sm:$0x3f] }
 0x30f   : > { %11750 = vst [vmem:[#allocation18_spill] sm:$0xff] %v10024_v0  ;;  %v10029_v38 = vsel %vm752_vm3, %v3581_v47, %v3590_v45  ;;  %v3599_v24 = vor.u32 %v3598_v28, %v3595_v9  ;;  %v11752_v49 = vshrl.u32 %v9818_v44, 16  ;;  %v11754_v5 = vshll.u32 %v9818_v44, 16 }
 0x310   : > { %11751 = vst [vmem:[#allocation19_spill] sm:$0xff] %v10029_v38  ;;  %v5599_v17 = vor.u32 %v5598_v55, %v5597_v58  ;;  %v10034_v20 = vsel %vm5560_vm11, %v5591_v3, %v5595_v1  ;;  %v3611_v25 = vshrl.u32 %v10016_v39, 16  ;;  %v3614_v58 = vshll.u32 %v10016_v39, 16 }
 0x311   : > { %7705 = vmatmul.mubr.bf16.gmra.mrb[52].mxu0 %v9898_v13  ;;  %v3607_v13 = vrot.slane %v9877_v56, 3  ;;  %v5601_v26 = vrot.slane %v11752_v49, 5  ;;  %11753 = vst [vmem:[#allocation20_spill] sm:$0xff] %v10034_v20  ;;  %v5602_v0 = vrot.slane %v11754_v5, 6  ;;  %v10041_v47 = vsel %vm752_vm3, %v3590_v45, %v3599_v24 }
 0x312   : > { %7708 = vmatprep.mubr.msk.bf16.mxu0 %vm8426_vm6, %v11749_v52  ;;  %11755 = vst [vmem:[#allocation21_spill] sm:$0xff] %v10041_v47  ;;  %v10044_v55 = vsel %vm5560_vm11, %v5595_v1, %v5599_v17  ;;  %v11757_v49 = vshrl.u32 %v9882_v11, 16  ;;  %v11759_v1 = vshrl.u32 %v9615_v53, 16  ;;  %v5610_v47 = vshrl.u32 %v5542_v61, 16 }
 0x313   : > { %v3608_v32 = vor.u32 %v3607_v13, %v3604_v62  ;;  %11756 = vst [vmem:[#allocation22_spill] sm:$0xff] %v10044_v55  ;;  %v5603_v28 = vor.u32 %v5602_v0, %v5601_v26  ;;  %v3613_v62 = vrot.slane %v3611_v25, 2  ;;  %v3616_v13 = vrot.slane %v3614_v58, 3  ;;  %v3251_v26 = vld [vmem:[#allocation2] sm:$0xfc] }
 0x314   : > { %v5605_v3 = vrot.slane %v11757_v49, 5  ;;  %v3820_v5 = vrot.slane %v11759_v1, 3  ;;  %v3823_v55 = vrot.slane %v3821_v59, 4  ;;  %v5613_v38 = vshll.u32 %v5542_v61, 16 }
 0x315   : > { %7353 = vmatmul.mubr.bf16.gmra.mrb[36].mxu1 %v9886_v30  ;;  %v10052_v9 = vsel %vm752_vm3, %v3599_v24, %v3608_v32  ;;  %v11758_v30 = vshll.u32 %v9882_v11, 16  ;;  %v10059_v20 = vsel %vm5560_vm11, %v5599_v17, %v5603_v28  ;;  %v11760_v44 = vshrl.u32 %v9610_v21, 16 }
 0x316   : > { %7356 = vmatprep.mubr.msk.bf16.mxu1 %vm8426_vm6, %v11749_v52  ;;  %v3617_v0 = vor.u32 %v3616_v13, %v3613_v62  ;;  %v3824_v25 = vor.u32 %v3823_v55, %v3820_v5  ;;  %v11761_v58 = vshll.u32 %v9610_v21, 16  ;;  %v3330_v59 = vrot.slane %v10016_v39, 3 }
 0x317   : > { %v5606_v45 = vrot.slane %v11758_v30, 6  ;;  %v3829_v24 = vrot.slane %v11760_v44, 3  ;;  %v5612_v30 = vrot.slane %v5610_v47, 5  ;;  %v5615_v61 = vrot.slane %v5613_v38, 6 }
 0x318   : > { %v3830_v53 = vrot.slane %v11761_v58, 4  ;;  %v10073_v44 = vsel %vm752_vm3, %v3608_v32, %v3617_v0  ;;  %v3837_v21 = vrot.slane %v9678_v31, 3  ;;  %v3513_v55 = vshrl.u32 %v3251_v26, 16  ;;  %v10124_v58 = vld [vmem:[#allocation2 + $0x10] sm:$0xe0] }
 0x319   : > { %v5607_v49 = vor.u32 %v5606_v45, %v5605_v3  ;;  %7709 = vmatmul.mubr.bf16.gmra.mrb[56].mxu0 %v9918_v2  ;;  %v10077_v2 = vsel %vm1079_vm4, %v3824_v25, %v9601_v4  ;;  %v5616_v3 = vor.u32 %v5615_v61, %v5612_v30  ;;  %v3838_v62 = vrot.slane %v9681_v19, 4 }
 0x31a   : > { %7712 = vmatprep.mubr.msk.bf16.mxu0 %vm8426_vm6, %v11749_v52  ;;  %v10079_v47 = vor.u32 %v3830_v53, %v3829_v24  ;;  %v3841_v39 = vrot.slane %v9668_v10, 3  ;;  %v3842_v38 = vrot.slane %v9695_v33, 4  ;;  %v3846_v45 = vrot.slane %v9748_v12, 4 }
 0x31b   : > { %v10070_v17 = vsel %vm5560_vm11, %v5603_v28, %v5607_v49  ;;  %v3845_v28 = vrot.slane %v9745_v41, 3  ;;  %v3516_v31 = vshll.u32 %v3251_v26, 16  ;;  %v10096_v19 = vsel %vm5560_vm11, %v5607_v49, %v5616_v3  ;;  %v10103_v41 = vld [vmem:[#allocation2 + $0x68] sm:$0x1f] }
 0x31c   : > { %v10088_v32 = vsel %vm1079_vm4, %v9601_v4, %v10079_v47  ;;  %v10098_v10 = vor.u32 %v3838_v62, %v3837_v21  ;;  %v3843_v13 = vor.u32 %v3842_v38, %v3841_v39  ;;  %v3850_v1 = vrot.slane %v9791_v57, 4 }
 0x31d   : > { %7357 = vmatmul.mubr.bf16.gmra.mrb[40].mxu1 %v9904_v51  ;;  %v3849_v51 = vrot.slane %v9784_v54, 3  ;;  %v3847_v4 = vor.u32 %v3846_v45, %v3845_v28  ;;  %v3853_v33 = vrot.slane %v9816_v16, 3  ;;  %v3854_v12 = vrot.slane %v9847_v50, 4  ;;  %v8271_v28 = vld [vmem:[%s11646_s7 + $0x80] sm:$0xff]  }
 0x31e   : > { %7360 = vmatprep.mubr.msk.bf16.mxu1 %vm8426_vm6, %v11749_v52  ;;  %v3857_v5 = vrot.slane %v9852_v60, 3  ;;  %v3858_v24 = vrot.slane %v9860_v8, 4  ;;  %v10111_v49 = vsel %vm1079_vm4, %v10098_v10, %v3843_v13  ;;  %v3861_v16 = vrot.slane %v9874_v46, 3 }
 0x31f   : > { %v10114_v54 = vsel %vm1079_vm4, %v3843_v13, %v3847_v4  ;;  %v3851_v57 = vor.u32 %v3850_v1, %v3849_v51  ;;  %v11762_v26 = vrot.slane %v9827_v48, 3  ;;  %v3855_v60 = vor.u32 %v3854_v12, %v3853_v33  ;;  %v10158_v12 = vld [vmem:[#allocation2 + $0x50] sm:$0xff] }
 0x320   : > { %v3859_v8 = vor.u32 %v3858_v24, %v3857_v5  ;;  %v3515_v0 = vrot.slane %v3513_v55, 2  ;;  %v3518_v25 = vrot.slane %v3516_v31, 3  ;;  %v5076_v30 = vshrl.u32 %v10103_v41, 16  ;;  %11763 = vst [vmem:[#allocation23_spill] sm:$0xff] %v10158_v12  ;;  %v8275_v24 = vld [vmem:[%s11646_s7 + $0x88] sm:$0xff]  }
 0x321   : > { %7713 = vmatmul.mubr.bf16.gmra.mrb[60].mxu0 %v9933_v40  ;;  %v3331_v50 = vsel %vm530_vm1, %v11762_v26, %v3330_v59  ;;  %v3862_v40 = vrot.slane %v9877_v56, 4  ;;  %v10127_v53 = vsel %vm1079_vm4, %v3847_v4, %v3851_v57  ;;  %v5079_v46 = vshll.u32 %v10103_v41, 16 }
 0x322   : > { %7716 = vmatprep.mubr.msk.bf16.mxu0 %vm8426_vm6, %v11749_v52  ;;  %v10131_v59 = vsel %vm1079_vm4, %v3851_v57, %v3855_v60  ;;  %v10134_v61 = vsel %vm1079_vm4, %v3855_v60, %v3859_v8  ;;  %v5562_v56 = vshrl.u32 %v10124_v58, 16  ;;  %v5565_v55 = vshll.u32 %v10124_v58, 16  ;;  %v10170_v60 = vld [vmem:[#allocation2 + $0x58] sm:$0xff] }
 0x323   : > { %v10136_v21 = vor.u32 %v3862_v40, %v3861_v16  ;;  %v3519_v62 = vor.u32 %v3518_v25, %v3515_v0  ;;  %v5078_v39 = vrot.slane %v5076_v30, 4  ;;  %v5081_v38 = vrot.slane %v5079_v46, 5  ;;  %11764 = vst [vmem:[#allocation24_spill] sm:$0xff] %v10170_v60  ;;  %v10234_v30 = vld [vmem:[#allocation2 + $0x40] sm:$0xff] }
 0x324   : > { %v5564_v45 = vrot.slane %v5562_v56, 5  ;;  %v5567_v31 = vrot.slane %v5565_v55, 6  ;;  %v3541_v51 = vrot.slane %v9618_v34, 2  ;;  %v3544_v13 = vrot.slane %v9621_v43, 3  ;;  %v10179_v55 = vld [vmem:[#allocation2 + $0x10] sm:$0xff] }
 0x325   : > { %7361 = vmatmul.mubr.bf16.gmra.mrb[44].mxu1 %v3331_v50  ;;  %v10144_v3 = vsel %vm1079_vm4, %v3859_v8, %v10136_v21  ;;  %v3528_v4 = vsel %vm752_vm3, %v3519_v62, %v9949_v6  ;;  %v5082_v1 = vor.u32 %v5081_v38, %v5078_v39  ;;  %v5569_v33 = vrot.slane %v9618_v34, 5  ;;  %v8276_v38 = vld [vmem:[%s11646_s7 + $0x90] sm:$0xff]   ;;  %v10241_v8 = vld [vmem:[#allocation2 + $0x48] sm:$0xff]  ;;  %v10267_v46 = vld [vmem:[#allocation2 + $0x60] sm:$0xf] }
 0x326   : > { %7380 = vmatprep.mubr.msk.bf16.mxu1 %vm8426_vm6, %v11749_v52  ;;  %v5568_v57 = vor.u32 %v5567_v31, %v5564_v45  ;;  %v3545_v50 = vor.u32 %v3544_v13, %v3541_v51  ;;  %v11685_v25 = vshrl.u32 %v10158_v12, 16  ;;  %v11684_v62 = vshll.u32 %v10158_v12, 16  ;;  %v10191_v45 = vld [vmem:[#allocation2 + $0x20] sm:$0xff]  ;;  %11768 = vst [vmem:[#allocation28_spill] sm:$0xff] %v10267_v46 }
 0x327   : > { %v5083_v40 = vsel %vm4688_vm10, %v9935_v29, %v5082_v1  ;;  %v11686_v51 = vshrl.u32 %v10170_v60, 16  ;;  %v11688_v26 = vrot.slane %v10179_v55, 4 }
 0x328   : > { %v4729_v31 = vrot.slane %v11685_v25, 4  ;;  %v3546_v13 = vsel %vm752_vm3, %v9951_v27, %v3545_v50  ;;  %v10205_v1 = vsel %vm752_vm3, %v3545_v50, %v9968_v35  ;;  %v10213_v27 = vld [vmem:[#allocation2 + $0x30] sm:$0xff]  ;;  %v4464_v35 = vrot.slane %v10170_v60, 4 }
 0x329   : > { %7717 = vmatmul.mubr.bf16.gmra.mrb[64].mxu0 %v9947_v22  ;;  %v5570_v22 = vrot.slane %v9621_v43, 6  ;;  %v4454_v6 = vrot.slane %v10213_v27, 4 }
 0x32a   : > { %7720 = vmatprep.mubr.msk.bf16.mxu0 %vm8426_vm6, %v11749_v52 }
 0x32b   : > { %v5571_v0 = vor.u32 %v5570_v22, %v5569_v33  ;;  %v10207_v33 = vld [vmem:[#allocation2 + $0x28] sm:$0xff]  ;;  %v4730_v22 = vrot.slane %v11684_v62, 5  ;;  %v10222_v62 = vld [vmem:[#allocation2 + $0x38] sm:$0xff] }
 0x32c   : > { %11765 = vst [vmem:[#allocation25_spill] sm:$0xff] %v10207_v33  ;;  %v4452_v56 = vrot.slane %v10207_v33, 4  ;;  %v4456_v29 = vrot.slane %v10222_v62, 4 }
 0x32d   : > { %7381 = vmatmul.mubr.bf16.vlgmr.msra.gmra.mrb[48].mxu1 %v3528_v4  ;;  %v5572_v39 = vsel %vm5560_vm11, %v5568_v57, %v5571_v0  ;;  %v10200_v4 = vsel %vm5560_vm11, %v5571_v0, %v9965_v15  ;;  %v11687_v15 = vshll.u32 %v10170_v60, 16  ;;  %v10224_v25 = vor.u32 %v4730_v22, %v4729_v31  ;;  %v10251_v22 = vld [vmem:[#allocation2 + $0x8] sm:$0xf0] }
 0x32e   : > { %7425 = vmatpush3.bf16.msra.mxu1 %v8271_v28  ;;  %7384 = vmatprep.mubr.msk.bf16.mxu1 %vm8426_vm6, %v11749_v52  ;;  %v10189_v28 = vld [vmem:[#allocation2 + $0x18] sm:$0xff]  ;;  %11766 = vst [vmem:[#allocation26_spill] sm:$0xff] %v10251_v22  ;;  %v4458_v0 = vrot.slane %v10234_v30, 4  ;;  %v10284_v50 = vsel %vm4444_vm12, %v4454_v6, %v4456_v29  ;;  %v4466_v57 = vrot.slane %v10267_v46, 4  ;;  %v11789_v46 = vshll.u32 %v10222_v62, 16 }
 0x32f   : > { %7426 = vmatprep.subr.bf16.mxu1 %v11749_v52  ;;  %v4734_v31 = vrot.slane %v11687_v15, 5  ;;  %v4448_v16 = vrot.slane %v10189_v28, 4  ;;  %v4450_v15 = vrot.slane %v10191_v45, 4  ;;  %11772 = vst [vmem:[#allocation32_spill] sm:$0xff] %v10284_v50  ;;  %v11779_v50 = vshll.u32 %v10179_v55, 16 }
 0x330   : > { %v4718_v60 = vrot.slane %v11789_v46, 5  ;;  %v11791_v46 = vshll.u32 %v10234_v30, 16 }
 0x331   : > { %7721 = vmatmul.mubr.bf16.gmra.mrb[68].mxu0 %v5083_v40  ;;  %v4733_v40 = vrot.slane %v11686_v51, 4  ;;  %v8277_v51 = vld [vmem:[%s11646_s7 + $0x98] sm:$0xff]  }
 0x332   : > { %7427 = vmatpush3.bf16.msra.mxu1 %v8275_v24  ;;  %7800 = vmatprep.mubr.msk.bf16.mxu0 %vm8426_vm6, %v11749_v52  ;;  %v4690_v24 = vshrl.u32 %v10251_v22, 16 }
 0x333   : > { %7428 = vmatprep.subr.bf16.mxu1 %v11749_v52  ;;  %v10247_v5 = vor.u32 %v4734_v31, %v4733_v40  ;;  %v4460_v40 = vrot.slane %v10241_v8, 4  ;;  %v11777_v31 = vshrl.u32 %v10179_v55, 16 }
 0x335   : > { %7385 = vmatmul.mubr.bf16.gmra.mrb[52].mxu1 %v9956_v7  ;;  %v10275_v7 = vsel %vm4444_vm12, %v4450_v15, %v4452_v56 }
 0x336   : > { %7388 = vmatprep.mubr.msk.bf16.mxu1 %vm8426_vm6, %v11749_v52  ;;  %7429 = vmatpush3.bf16.msra.mxu1 %v8276_v38  ;;  %v10256_v38 = vsel %vm4444_vm12, %v11688_v26, %v4448_v16  ;;  %v10270_v26 = vsel %vm4444_vm12, %v4448_v16, %v4450_v15  ;;  %11770 = vst [vmem:[#allocation30_spill] sm:$0xff] %v10275_v7  ;;  %v4462_v16 = vrot.slane %v10158_v12, 4 }
 0x337   : > { %7430 = vmatprep.subr.bf16.mxu1 %v11749_v52  ;;  %11767 = vst [vmem:[#allocation27_spill] sm:$0xff] %v10256_v38  ;;  %11769 = vst [vmem:[#allocation29_spill] sm:$0xff] %v10270_v26  ;;  %v10289_v15 = vsel %vm4444_vm12, %v4456_v29, %v4458_v0  ;;  %v11782_v26 = vshrl.u32 %v10191_v45, 16 }
 0x338   : > { %11773 = vst [vmem:[#allocation33_spill] sm:$0xff] %v10289_v15  ;;  %v10305_v29 = vsel %vm4444_vm12, %v4462_v16, %v4464_v35  ;;  %v10312_v15 = vsel %vm4444_vm12, %v4464_v35, %v4466_v57 }
 0x339   : > { %7801 = vmatmul.mubr.bf16.vlgmr.msra.gmra.mrb[72].mxu0 %v5572_v39  ;;  %v8278_v39 = vld [vmem:[%s11646_s7 + $0xa0] sm:$0xff]   ;;  %11776 = vst [vmem:[#allocation36_spill] sm:$0xff] %v10305_v29  ;;  %11778 = vst [vmem:[#allocation37_spill] sm:$0xff] %v10312_v15  ;;  %v4705_v38 = vrot.slane %v11782_v26, 4  ;;  %v8280_v26 = vld [vmem:[%s11646_s7 + $0xb0] sm:$0xff]  }
 0x33a   : > { %7804 = vmatprep.mubr.msk.bf16.mxu0 %vm8426_vm6, %v11749_v52  ;;  %7431 = vmatpush3.bf16.msra.mxu1 %v8277_v51  ;;  %v10278_v51 = vsel %vm4444_vm12, %v4452_v56, %v4454_v6  ;;  %v10292_v56 = vsel %vm4444_vm12, %v4458_v0, %v4460_v40  ;;  %v8279_v6 = vld [vmem:[%s11646_s7 + $0xa8] sm:$0xff]   ;;  %v4693_v0 = vshll.u32 %v10251_v22, 16 }
 0x33b   : > { %7432 = vmatprep.subr.bf16.mxu1 %v11749_v52  ;;  %11771 = vst [vmem:[#allocation31_spill] sm:$0xff] %v10278_v51  ;;  %11774 = vst [vmem:[#allocation34_spill] sm:$0xff] %v10292_v56  ;;  %v4697_v56 = vrot.slane %v11777_v31, 4  ;;  %v4698_v51 = vrot.slane %v11779_v50, 5  ;;  %v11783_v31 = vshll.u32 %v10191_v45, 16  ;;  %v11785_v50 = vshll.u32 %v10207_v33, 16 }
 0x33c   : > { %v4695_v7 = vrot.slane %v4693_v0, 5  ;;  %v11786_v0 = vshrl.u32 %v10213_v27, 16 }
 0x33d   : > { %7389 = vmatmul.mubr.bf16.gmra.mrb[56].mxu1 %v3546_v13  ;;  %v10302_v13 = vsel %vm4444_vm12, %v4460_v40, %v4462_v16  ;;  %v11780_v40 = vshrl.u32 %v10189_v28, 16  ;;  %v11781_v16 = vshll.u32 %v10189_v28, 16  ;;  %v4706_v22 = vrot.slane %v11783_v31, 5 }
 0x33e   : > { %7392 = vmatprep.mubr.msk.bf16.mxu1 %vm8426_vm6, %v11749_v52  ;;  %7433 = vmatpush3.bf16.msra.mxu1 %v8278_v39  ;;  %11775 = vst [vmem:[#allocation35_spill] sm:$0xff] %v10302_v13  ;;  %v4692_v39 = vrot.slane %v4690_v24, 4  ;;  %v4699_v57 = vor.u32 %v4698_v51, %v4697_v56  ;;  %v11784_v24 = vshrl.u32 %v10207_v33, 16  ;;  %v4710_v15 = vrot.slane %v11785_v50, 5 }
 0x33f   : > { %7434 = vmatprep.subr.bf16.mxu1 %v11749_v52  ;;  %v4701_v13 = vrot.slane %v11780_v40, 4  ;;  %v4702_v29 = vrot.slane %v11781_v16, 5  ;;  %v4713_v40 = vrot.slane %v11786_v0, 4  ;;  %v4707_v51 = vor.u32 %v4706_v22, %v4705_v38 }
 0x340   : > { %v4709_v35 = vrot.slane %v11784_v24, 4  ;;  %v4696_v16 = vor.u32 %v4695_v7, %v4692_v39  ;;  %v11787_v56 = vshll.u32 %v10213_v27, 16  ;;  %v11788_v50 = vshrl.u32 %v10222_v62, 16 }
 0x341   : > { %7805 = vmatmul.mubr.bf16.gmra.mrb[76].mxu0 %v10200_v4  ;;  %v4703_v4 = vor.u32 %v4702_v29, %v4701_v13  ;;  %v4722_v29 = vrot.slane %v11791_v46, 5  ;;  %v11792_v39 = vshrl.u32 %v10241_v8, 16 }
 0x342   : > { %7808 = vmatprep.mubr.msk.bf16.mxu0 %vm8426_vm6, %v11749_v52  ;;  %7435 = vmatpush3.bf16.msra.mxu1 %v8279_v6  ;;  %v4714_v31 = vrot.slane %v11787_v56, 5  ;;  %v4711_v24 = vor.u32 %v4710_v15, %v4709_v35  ;;  %v4717_v0 = vrot.slane %v11788_v50, 4  ;;  %v11790_v6 = vshrl.u32 %v10234_v30, 16 }
 0x343   : > { %7436 = vmatprep.subr.bf16.mxu1 %v11749_v52  ;;  %v10346_v33 = vsel %vm4688_vm10, %v4696_v16, %v4699_v57  ;;  %v10349_v7 = vsel %vm4688_vm10, %v4699_v57, %v4703_v4  ;;  %v10352_v22 = vsel %vm4688_vm10, %v4703_v4, %v4707_v51  ;;  %v4725_v35 = vrot.slane %v11792_v39, 4  ;;  %v11793_v16 = vld [vmem:[#allocation11_spill] sm:$0xff] }
 0x344   : > { %v4721_v12 = vrot.slane %v11790_v6, 4  ;;  %v4715_v38 = vor.u32 %v4714_v31, %v4713_v40  ;;  %v10356_v15 = vsel %vm4688_vm10, %v4707_v51, %v4711_v24  ;;  %v4719_v13 = vor.u32 %v4718_v60, %v4717_v0 }
 0x345   : > { %7393 = vmatmul.mubr.bf16.gmra.mrb[60].mxu1 %v10205_v1  ;;  %v5334_v56 = vrot.slane %v11793_v16, 5  ;;  %v8281_v1 = vld [vmem:[%s11646_s7 + $0xb8] sm:$0xff]   ;;  %v11794_v60 = vshll.u32 %v10241_v8, 16  ;;  %v10376_v4 = vsel %vm4688_vm10, %v10224_v25, %v10247_v5  ;;  %v5336_v51 = vrot.slane %v9882_v11, 5 }
 0x346   : > { %7396 = vmatprep.mubr.msk.bf16.mxu1 %vm8426_vm6, %v11749_v52  ;;  %7437 = vmatpush3.bf16.msra.mxu1 %v8280_v26  ;;  %v10369_v57 = vsel %vm4688_vm10, %v4711_v24, %v4715_v38  ;;  %v10381_v26 = vsel %vm4688_vm10, %v4715_v38, %v4719_v13  ;;  %v4723_v31 = vor.u32 %v4722_v29, %v4721_v12  ;;  %v11795_v50 = vrot.slane %v9605_v18, 5 }
 0x347   : > { %v4726_v40 = vrot.slane %v11794_v60, 5  ;;  %7438 = vmatprep.subr.bf16.mxu1 %v11749_v52  ;;  %v11796_v24 = vrot.slane %v10124_v58, 5  ;;  %v5338_v6 = vrot.slane %v10103_v41, 5  ;;  %v11797_v39 = vrot.slane %v9657_v23, 5  ;;  %v11801_v58 = vld [vmem:[#allocation13_spill] sm:$0xff] }
 0x348   : > { %v11798_v11 = vmov %v11795_v50  ;;  %v11799_v38 = vrot.slane %v9653_v14, 5  ;;  %v10407_v60 = vsel %vm4688_vm10, %v4719_v13, %v4723_v31  ;;  %v11802_v41 = vrot.slane %v9707_v63, 5 }
 0x349   : > { %v10388_v0 = vsel %vm5316_vm13, %v11796_v24, %v11795_v50  ;;  %v4727_v46 = vor.u32 %v4726_v40, %v4725_v35  ;;  %v10396_v16 = vsel %vm5316_vm13, %v11798_v11, %v11797_v39  ;;  %v11800_v12 = vmov %v11797_v39  ;;  %7809 = vmatmul.mubr.bf16.gmra.mrb[80].mxu0 %v11801_v58 }
 0x34a   : > { %v10403_v29 = vsel %vm5316_vm13, %v11800_v12, %v11799_v38  ;;  %v11803_v35 = vmov %v11799_v38  ;;  %v11804_v40 = vrot.slane %v9700_v42, 5  ;;  %v11805_v50 = vmov %v11802_v41  ;;  %7812 = vmatprep.mubr.msk.bf16.mxu0 %vm8426_vm6, %v11749_v52  ;;  %7439 = vmatpush3.bf16.msra.mxu1 %v8281_v1 }
 0x34b   : > { %v10414_v18 = vsel %vm5316_vm13, %v11803_v35, %v11802_v41  ;;  %v10426_v13 = vsel %vm4688_vm10, %v4723_v31, %v4727_v46  ;;  %v10430_v14 = vsel %vm4688_vm10, %v4727_v46, %v10224_v25  ;;  %v11806_v24 = vrot.slane %v9770_v37, 5  ;;  %7484 = vmatprep.subr.bf16.mxu1 %v11749_v52  ;;  %v11813_v41 = vld [vmem:[#allocation12_spill] sm:$0xff]  ;;  %v11819_v35 = vld [vmem:[#allocation19_spill] sm:$0xff] }
 0x34c   : > { %v10421_v23 = vsel %vm5316_vm13, %v11805_v50, %v11804_v40  ;;  %v11807_v39 = vmov %v11804_v40  ;;  %v11808_v11 = vrot.slane %v9760_v36, 5  ;;  %v11810_v38 = vrot.slane %v9827_v48, 5  ;;  %v11814_v36 = vld [vmem:[#allocation15_spill] sm:$0xff]  ;;  %v11815_v48 = vld [vmem:[#allocation14_spill] sm:$0xff]  ;;  %v11820_v40 = vld [vmem:[#allocation20_spill] sm:$0xff] }
 0x34d   : > { %v10437_v63 = vsel %vm5316_vm13, %v11807_v39, %v11806_v24  ;;  %v11809_v1 = vmov %v11806_v24  ;;  %v10460_v58 = vsel %vm5316_vm13, %v5334_v56, %v5336_v51  ;;  %v10463_v37 = vsel %vm5316_vm13, %v5336_v51, %v5338_v6  ;;  %7397 = vmatmul.mubr.bf16.gmra.mrb[64].mxu1 %v11813_v41  ;;  %v11817_v51 = vld [vmem:[#allocation17_spill] sm:$0xff]  ;;  %v11818_v6 = vld [vmem:[#allocation18_spill] sm:$0xff] }
 0x34e   : > { %v10445_v31 = vsel %vm5316_vm13, %v11809_v1, %v11808_v11  ;;  %v11811_v25 = vmov %v11808_v11  ;;  %v11812_v42 = vmov %v11810_v38  ;;  %7400 = vmatprep.mubr.msk.bf16.mxu1 %vm8426_vm6, %v11749_v52  ;;  %v11821_v50 = vld [vmem:[#allocation21_spill] sm:$0xff]  ;;  %v11822_v24 = vld [vmem:[#allocation22_spill] sm:$0xff]  ;;  %v8288_v11 = vld [vmem:[%s11646_s7 + $0xf0] sm:$0xff]  }
 0x34f   : > { %v10452_v46 = vsel %vm5316_vm13, %v11811_v25, %v11810_v38  ;;  %v10457_v12 = vsel %vm5316_vm13, %v11812_v42, %v5334_v56  ;;  %v11816_v56 = vld [vmem:[#allocation16_spill] sm:$0xff]  ;;  %v8282_v39 = vld [vmem:[%s11646_s7 + $0xc0] sm:$0xff]  }
 0x350   : > { %v8289_v1 = vld [vmem:[%s11646_s7 + $0xf8] sm:$0xff]  }
 0x351   : > { %7813 = vmatmul.mubr.bf16.gmra.mrb[84].mxu0 %v11814_v36 }
 0x352   : > { %7816 = vmatprep.mubr.msk.bf16.mxu0 %vm8426_vm6, %v11749_v52 }
 0x355   : > { %7401 = vmatmul.mubr.bf16.gmra.mrb[68].mxu1 %v11815_v48 }
 0x356   : > { %7404 = vmatprep.mubr.msk.bf16.mxu1 %vm8426_vm6, %v11749_v52 }
 0x359   : > { %7817 = vmatmul.mubr.bf16.gmra.mrb[88].mxu0 %v11816_v56 }
 0x35a   : > { %7820 = vmatprep.mubr.msk.bf16.mxu0 %vm8426_vm6, %v11749_v52 }
 0x35d   : > { %7405 = vmatmul.mubr.bf16.gmra.mrb[72].mxu1 %v11817_v51 }
 0x35e   : > { %7408 = vmatprep.mubr.msk.bf16.mxu1 %vm8426_vm6, %v11749_v52 }
 0x361   : > { %7821 = vmatmul.mubr.bf16.gmra.mrb[92].mxu0 %v11818_v6 }
 0x362   : > { %7824 = vmatprep.mubr.msk.bf16.mxu0 %vm8426_vm6, %v11749_v52 }
 0x365   : > { %7409 = vmatmul.mubr.bf16.gmra.mrb[76].mxu1 %v11819_v35 }
 0x366   : > { %7412 = vmatprep.mubr.msk.bf16.mxu1 %vm8426_vm6, %v11749_v52 }
 0x369   : > { %7825 = vmatmul.mubr.bf16.gmra.mrb[96].mxu0 %v11820_v40 }
 0x36a   : > { %7828 = vmatprep.mubr.msk.bf16.mxu0 %vm8426_vm6, %v11749_v52 }
 0x36d   : > { %7413 = vmatmul.mubr.bf16.gmra.mrb[80].mxu1 %v11821_v50 }
 0x36e   : > { %7416 = vmatprep.mubr.msk.bf16.mxu1 %vm8426_vm6, %v11749_v52 }
 0x371   : > { %7829 = vmatmul.mubr.bf16.gmra.mrb[100].mxu0 %v11822_v24 }
 0x372   : > { %7832 = vmatprep.mubr.msk.bf16.mxu0 %vm8426_vm6, %v11749_v52 }
 0x375   : > { %7417 = vmatmul.mubr.bf16.gmra.mrb[84].mxu1 %v10052_v9  ;;  %v8284_v9 = vld [vmem:[%s11646_s7 + $0xd0] sm:$0xff]  }
 0x376   : > { %7420 = vmatprep.mubr.msk.bf16.mxu1 %vm8426_vm6, %v11749_v52 }
 0x379   : > { %7833 = vmatmul.mubr.bf16.gmra.mrb[104].mxu0 %v10059_v20  ;;  %v8283_v20 = vld [vmem:[%s11646_s7 + $0xc8] sm:$0xff]  }
 0x37a   : > { %7836 = vmatprep.mubr.msk.bf16.mxu0 %vm8426_vm6, %v11749_v52 }
 0x37d   : > { %7421 = vmatmul.mubr.bf16.gmra.mrb[88].mxu1 %v10073_v44  ;;  %v3834_v44 = vrot.slane %v9621_v43, 4 }
 0x37e   : > { %7440 = vmatprep.mubr.msk.bf16.mxu1 %vm8426_vm6, %v11749_v52 }
 0x381   : > { %7837 = vmatmul.mubr.bf16.gmra.mrb[108].mxu0 %v10070_v17  ;;  %v3833_v17 = vrot.slane %v9618_v34, 3  ;;  %v8286_v34 = vld [vmem:[%s11646_s7 + $0xe0] sm:$0xff]  }
 0x382   : > { %7840 = vmatprep.mubr.msk.bf16.mxu0 %vm8426_vm6, %v11749_v52 }
 0x385   : > { %7441 = vmatmul.mubr.bf16.vlgmr.msra.gmra.mrb[92].mxu1 %v10077_v2  ;;  %v8285_v2 = vld [vmem:[%s11646_s7 + $0xd8] sm:$0xff]  }
 0x386   : > { %7485 = vmatpush3.bf16.msra.mxu1 %v8282_v39  ;;  %7444 = vmatprep.mubr.msk.bf16.mxu1 %vm8426_vm6, %v11749_v52 }
 0x387   : > { %7486 = vmatprep.subr.bf16.mxu1 %v11749_v52 }
 0x389   : > { %7841 = vmatmul.mubr.bf16.gmra.mrb[112].mxu0 %v10096_v19  ;;  %v3835_v19 = vor.u32 %v3834_v44, %v3833_v17 }
 0x38a   : > { %7487 = vmatpush3.bf16.msra.mxu1 %v8283_v20  ;;  %7846 = vmatprep.mubr.msk.bf16.mxu0 %vm8426_vm6, %v11749_v52 }
 0x38b   : > { %7488 = vmatprep.subr.bf16.mxu1 %v11749_v52  ;;  %v3836_v43 = vsel %vm1079_vm4, %v10079_v47, %v3835_v19  ;;  %v3840_v47 = vsel %vm1079_vm4, %v3835_v19, %v10098_v10 }
 0x38d   : > { %7445 = vmatmul.mubr.bf16.gmra.mrb[96].mxu1 %v10088_v32  ;;  %v8287_v32 = vld [vmem:[%s11646_s7 + $0xe8] sm:$0xff]  }
 0x38e   : > { %7448 = vmatprep.mubr.msk.bf16.mxu1 %vm8426_vm6, %v11749_v52  ;;  %7489 = vmatpush3.bf16.msra.mxu1 %v8284_v9 }
 0x38f   : > { %7490 = vmatprep.subr.bf16.mxu1 %v11749_v52 }
 0x392   : > { %7491 = vmatpush3.bf16.msra.mxu1 %v8285_v2 }
 0x393   : > { %7492 = vmatprep.subr.bf16.mxu1 %v11749_v52 }
 0x395   : > { %7449 = vmatmul.mubr.bf16.gmra.mrb[100].mxu1 %v3836_v43 }
 0x396   : > { %7452 = vmatprep.mubr.msk.bf16.mxu1 %vm8426_vm6, %v11749_v52  ;;  %7493 = vmatpush3.bf16.msra.mxu1 %v8286_v34 }
 0x397   : > { %7494 = vmatprep.subr.bf16.mxu1 %v11749_v52 }
 0x39a   : > { %7495 = vmatpush3.bf16.msra.mxu1 %v8287_v32  ;;  %v3799_v32 = vld [vmem:[#allocation2 + $0x58] sm:$0xf] }
 0x39b   : > { %7496 = vmatprep.subr.bf16.mxu1 %v11749_v52 }
 0x39d   : > { %7453 = vmatmul.mubr.bf16.gmra.mrb[104].mxu1 %v3840_v47 }
 0x39e   : > { %7456 = vmatprep.mubr.msk.bf16.mxu1 %vm8426_vm6, %v11749_v52  ;;  %7497 = vmatpush3.bf16.msra.mxu1 %v8288_v11 }
 0x39f   : > { %7498 = vmatprep.subr.bf16.mxu1 %v11749_v52 }
 0x3a2   : > { %7499 = vmatpush3.bf16.msra.mxu1 %v8289_v1  ;;  %v3866_v1 = vshrl.u32 %v3799_v32, 16 }
 0x3a3   : > { %7544 = vmatprep.subr.bf16.mxu1 %v11749_v52 }
 0x3a5   : > { %7457 = vmatmul.mubr.bf16.gmra.mrb[108].mxu1 %v10111_v49 }
 0x3a6   : > { %7460 = vmatprep.mubr.msk.bf16.mxu1 %vm8426_vm6, %v11749_v52 }
 0x3a8   : > { %v10561_v10 = vpop.f32.mrb[4].mxu1 }
 0x3a9   : > { %v7322_v38 = vpop.f32.mrb[5].mxu1 }
 0x3aa   : > { %v10563_v25 = vpop.f32.mrb[6].mxu1  ;;  %v3869_v38 = vshll.u32 %v3799_v32, 16 }
 0x3ab   : > { %v7323_v42 = vpop.f32.mrb[7].mxu1 }
 0x3ad   : > { %7461 = vmatmul.mubr.bf16.gmra.mrb[112].mxu1 %v10114_v54 }
 0x3ae   : > { %7464 = vmatprep.mubr.msk.bf16.mxu1 %vm8426_vm6, %v11749_v52 }
 0x3b0   : > { %v10568_v41 = vpop.f32.mrb[8].mxu1 }
 0x3b1   : > { %v7326_v36 = vpop.f32.mrb[9].mxu1 }
 0x3b2   : > { %v10570_v48 = vpop.f32.mrb[10].mxu1 }
 0x3b3   : > { %v7327_v49 = vpop.f32.mrb[11].mxu1 }
 0x3b4   : > { %v10572_v56 = vpop.f32.mrb[28].mxu0 }
 0x3b5   : > { %11823 = vst [vmem:[#allocation11_spill] sm:$0xff] %v10572_v56  ;;  %7465 = vmatmul.mubr.bf16.gmra.mrb[116].mxu1 %v10127_v53  ;;  %v7682_v51 = vpop.f32.mrb[29].mxu0 }
 0x3b6   : > { %v10575_v6 = vpop.f32.mrb[30].mxu0  ;;  %7468 = vmatprep.mubr.msk.bf16.mxu1 %vm8426_vm6, %v11749_v52 }
 0x3b7   : > { %11824 = vst [vmem:[#allocation13_spill] sm:$0xff] %v10575_v6  ;;  %v7683_v54 = vpop.f32.mrb[31].mxu0 }
 0x3b8   : > { %v10579_v35 = vpop.f32.mrb[12].mxu1  ;;  %v3868_v54 = vrot.slane %v3866_v1, 3 }
 0x3b9   : > { %v7330_v40 = vpop.f32.mrb[13].mxu1 }
 0x3ba   : > { %v10581_v50 = vpop.f32.mrb[14].mxu1 }
 0x3bb   : > { %v7331_v24 = vpop.f32.mrb[15].mxu1 }
 0x3bc   : > { %v10583_v39 = vpop.f32.mrb[32].mxu0 }
 0x3bd   : > { %11825 = vst [vmem:[#allocation12_spill] sm:$0xff] %v10583_v39  ;;  %7469 = vmatmul.mubr.bf16.gmra.mrb[120].mxu1 %v10131_v59  ;;  %v7686_v20 = vpop.f32.mrb[33].mxu0 }
 0x3be   : > { %v10586_v9 = vpop.f32.mrb[34].mxu0  ;;  %7472 = vmatprep.mubr.msk.bf16.mxu1 %vm8426_vm6, %v11749_v52 }
 0x3bf   : > { %11826 = vst [vmem:[#allocation15_spill] sm:$0xff] %v10586_v9  ;;  %v7687_v53 = vpop.f32.mrb[35].mxu0 }
 0x3c0   : > { %v10590_v17 = vpop.f32.mrb[16].mxu1  ;;  %v4076_v53 = vld [vmem:[#allocation2 + $0x8] sm:$0xf8] }
 0x3c1   : > { %v7334_v44 = vpop.f32.mrb[17].mxu1 }
 0x3c2   : > { %v10592_v2 = vpop.f32.mrb[18].mxu1 }
 0x3c3   : > { %v7335_v19 = vpop.f32.mrb[19].mxu1 }
 0x3c4   : > { %v10594_v34 = vpop.f32.mrb[36].mxu0 }
 0x3c5   : > { %11827 = vst [vmem:[#allocation14_spill] sm:$0xff] %v10594_v34  ;;  %7473 = vmatmul.mubr.bf16.gmra.mrb[124].mxu1 %v10134_v61  ;;  %v7690_v43 = vpop.f32.mrb[37].mxu0  ;;  %v3871_v61 = vrot.slane %v3869_v38, 4 }
 0x3c6   : > { %v10597_v59 = vpop.f32.mrb[38].mxu0  ;;  %7476 = vmatprep.mubr.msk.bf16.mxu1 %vm8426_vm6, %v11749_v52 }
 0x3c7   : > { %11828 = vst [vmem:[#allocation16_spill] sm:$0xff] %v10597_v59  ;;  %v7691_v11 = vpop.f32.mrb[39].mxu0  ;;  %v3872_v19 = vor.u32 %v3871_v61, %v3868_v54 }
 0x3c8   : > { %v10601_v47 = vpop.f32.mrb[20].mxu1  ;;  %v4106_v11 = vshrl.u32 %v4076_v53, 16 }
 0x3c9   : > { %v7338_v42 = vpop.f32.mrb[21].mxu1 }
 0x3ca   : > { %v10603_v36 = vpop.f32.mrb[22].mxu1  ;;  %v4109_v42 = vshll.u32 %v4076_v53, 16  ;;  %v4108_v61 = vrot.slane %v4106_v11, 3  ;;  %v11836_v11 = vshrl.u32 %v10189_v28, 16 }
 0x3cb   : > { %v7339_v49 = vpop.f32.mrb[23].mxu1 }
 0x3cc   : > { %v10605_v51 = vpop.f32.mrb[40].mxu0  ;;  %v11832_v49 = vshrl.u32 %v10179_v55, 16  ;;  %v4111_v53 = vrot.slane %v4109_v42, 4  ;;  %v4125_v42 = vrot.slane %v11836_v11, 3 }
 0x3cd   : > { %11829 = vst [vmem:[#allocation17_spill] sm:$0xff] %v10605_v51  ;;  %7477 = vmatmul.mubr.bf16.gmra.mrb[128].mxu1 %v10144_v3  ;;  %v7694_v40 = vpop.f32.mrb[41].mxu0  ;;  %v3873_v3 = vsel %vm1079_vm4, %v10136_v21, %v3872_v19 }
 0x3ce   : > { %v10608_v24 = vpop.f32.mrb[42].mxu0  ;;  %7480 = vmatprep.mubr.msk.bf16.mxu1 %vm8426_vm6, %v11749_v52  ;;  %v4116_v40 = vrot.slane %v11832_v49, 3  ;;  %v4112_v49 = vor.u32 %v4111_v53, %v4108_v61  ;;  %v8291_v61 = vld [vmem:[%s11646_s7 + $0x108] sm:$0xff]  }
 0x3cf   : > { %11830 = vst [vmem:[#allocation18_spill] sm:$0xff] %v10608_v24  ;;  %v7695_v20 = vpop.f32.mrb[43].mxu0 }
 0x3d0   : > { %v10612_v44 = vpop.f32.mrb[24].mxu1  ;;  %v11833_v20 = vshll.u32 %v10179_v55, 16 }
 0x3d1   : > { %v7342_v43 = vpop.f32.mrb[25].mxu1 }
 0x3d2   : > { %v10614_v32 = vpop.f32.mrb[26].mxu1  ;;  %v4119_v24 = vrot.slane %v11833_v20, 4 }
 0x3d3   : > { %v7343_v1 = vpop.f32.mrb[27].mxu1 }
 0x3d4   : > { %v10616_v38 = vpop.f32.mrb[44].mxu0 }
 0x3d5   : > { %11831 = vst [vmem:[#allocation19_spill] sm:$0xff] %v10616_v38  ;;  %7481 = vmatmul.mubr.bf16.gmra.mrb[132].mxu1 %v3873_v3  ;;  %v7698_v51 = vpop.f32.mrb[45].mxu0  ;;  %v4120_v38 = vor.u32 %v4119_v24, %v4116_v40  ;;  %v8290_v3 = vld [vmem:[%s11646_s7 + $0x100] sm:$0xff]  }
 0x3d6   : > { %v10624_v54 = vpop.f32.mrb[46].mxu0  ;;  %7500 = vmatprep.mubr.msk.bf16.mxu1 %vm8426_vm6, %v11749_v52 }
 0x3d7   : > { %11834 = vst [vmem:[#allocation20_spill] sm:$0xff] %v10624_v54  ;;  %v7699_v43 = vpop.f32.mrb[47].mxu0  ;;  %v4121_v54 = vsel %vm1079_vm4, %v4112_v49, %v4120_v38 }
 0x3d8   : > { %v10628_v1 = vpop.f32.mrb[28].mxu1  ;;  %v11837_v43 = vshll.u32 %v10189_v28, 16 }
 0x3d9   : > { %v7346_v21 = vpop.f32.mrb[29].mxu1 }
 0x3da   : > { %v10630_v19 = vpop.f32.mrb[30].mxu1  ;;  %v4128_v59 = vrot.slane %v11837_v43, 4 }
 0x3db   : > { %v7347_v51 = vpop.f32.mrb[31].mxu1 }
 0x3dc   : > { %v10635_v20 = vpop.f32.mrb[48].mxu0  ;;  %v4129_v49 = vor.u32 %v4128_v59, %v4125_v42  ;;  %v11841_v59 = vshll.u32 %v10191_v45, 16 }
 0x3dd   : > { %11835 = vst [vmem:[#allocation21_spill] sm:$0xff] %v10635_v20  ;;  %7501 = vmatmul.mubr.bf16.vlgmr.msra.gmra.mrb[136].mxu1 %v4121_v54  ;;  %v7702_v24 = vpop.f32.mrb[49].mxu0  ;;  %v8292_v54 = vld [vmem:[%s11646_s7 + $0x110] sm:$0xff]  }
 0x3de   : > { %7545 = vmatpush3.bf16.msra.mxu1 %v8290_v3  ;;  %v10642_v40 = vpop.f32.mrb[50].mxu0  ;;  %7504 = vmatprep.mubr.msk.bf16.mxu1 %vm8426_vm6, %v11749_v52  ;;  %v4130_v43 = vsel %vm1079_vm4, %v4120_v38, %v4129_v49  ;;  %v11840_v24 = vshrl.u32 %v10191_v45, 16  ;;  %v4137_v42 = vrot.slane %v11841_v59, 4 }
 0x3df   : > { %11838 = vst [vmem:[#allocation22_spill] sm:$0xff] %v10642_v40  ;;  %v7703_v53 = vpop.f32.mrb[51].mxu0  ;;  %7546 = vmatprep.subr.bf16.mxu1 %v11749_v52 }
 0x3e0   : > { %v10650_v21 = vpop.f32.mrb[32].mxu1  ;;  %v4134_v53 = vrot.slane %v11840_v24, 3 }
 0x3e1   : > { %v7350_v28 = vpop.f32.mrb[33].mxu1 }
 0x3e2   : > { %v10652_v51 = vpop.f32.mrb[34].mxu1  ;;  %7547 = vmatpush3.bf16.msra.mxu1 %v8291_v61  ;;  %v4138_v24 = vor.u32 %v4137_v42, %v4134_v53 }
 0x3e3   : > { %v7351_v3 = vpop.f32.mrb[35].mxu1  ;;  %7548 = vmatprep.subr.bf16.mxu1 %v11749_v52 }
 0x3e4   : > { %v10658_v11 = vpop.f32.mrb[52].mxu0  ;;  %v8293_v3 = vld [vmem:[%s11646_s7 + $0x118] sm:$0xff]  }
 0x3e5   : > { %11839 = vst [vmem:[#allocation38_spill] sm:$0xff] %v10658_v11  ;;  %7505 = vmatmul.mubr.bf16.gmra.mrb[140].mxu1 %v4130_v43  ;;  %v7706_v28 = vpop.f32.mrb[53].mxu0  ;;  %v8294_v43 = vld [vmem:[%s11646_s7 + $0x120] sm:$0xff]  }
 0x3e6   : > { %v10665_v61 = vpop.f32.mrb[54].mxu0  ;;  %7508 = vmatprep.mubr.msk.bf16.mxu1 %vm8426_vm6, %v11749_v52  ;;  %7549 = vmatpush3.bf16.msra.mxu1 %v8292_v54 }
 0x3e7   : > { %11842 = vst [vmem:[#allocation39_spill] sm:$0xff] %v10665_v61  ;;  %v7707_v11 = vpop.f32.mrb[55].mxu0  ;;  %7550 = vmatprep.subr.bf16.mxu1 %v11749_v52  ;;  %v11844_v61 = vld [vmem:[#allocation25_spill] sm:$0xff] }
 0x3e8   : > { %v10673_v38 = vpop.f32.mrb[36].mxu1  ;;  %v4139_v11 = vsel %vm1079_vm4, %v4129_v49, %v4138_v24  ;;  %v11845_v40 = vshrl.u32 %v11844_v61, 16  ;;  %v11846_v53 = vshll.u32 %v11844_v61, 16 }
 0x3e9   : > { %v7354_v45 = vpop.f32.mrb[37].mxu1 }
 0x3ea   : > { %v10675_v59 = vpop.f32.mrb[38].mxu1  ;;  %7551 = vmatpush3.bf16.msra.mxu1 %v8293_v3  ;;  %v4143_v20 = vrot.slane %v11845_v40, 3  ;;  %v4146_v42 = vrot.slane %v11846_v53, 4 }
 0x3eb   : > { %v7355_v28 = vpop.f32.mrb[39].mxu1  ;;  %7552 = vmatprep.subr.bf16.mxu1 %v11749_v52 }
 0x3ec   : > { %v10681_v54 = vpop.f32.mrb[56].mxu0  ;;  %v8295_v28 = vld [vmem:[%s11646_s7 + $0x128] sm:$0xff]   ;;  %v4147_v40 = vor.u32 %v4146_v42, %v4143_v20  ;;  %v11850_v20 = vshll.u32 %v10213_v27, 16 }
 0x3ed   : > { %11843 = vst [vmem:[#allocation40_spill] sm:$0xff] %v10681_v54  ;;  %7509 = vmatmul.mubr.bf16.gmra.mrb[144].mxu1 %v4139_v11  ;;  %v7710_v45 = vpop.f32.mrb[57].mxu0  ;;  %v8296_v11 = vld [vmem:[%s11646_s7 + $0x130] sm:$0xff]  }
 0x3ee   : > { %v10688_v3 = vpop.f32.mrb[58].mxu0  ;;  %7512 = vmatprep.mubr.msk.bf16.mxu1 %vm8426_vm6, %v11749_v52  ;;  %7553 = vmatpush3.bf16.msra.mxu1 %v8294_v43  ;;  %v4155_v42 = vrot.slane %v11850_v20, 4 }
 0x3ef   : > { %11847 = vst [vmem:[#allocation25_spill] sm:$0xff] %v10688_v3  ;;  %v7711_v54 = vpop.f32.mrb[59].mxu0  ;;  %7554 = vmatprep.subr.bf16.mxu1 %v11749_v52  ;;  %v11849_v3 = vshrl.u32 %v10213_v27, 16 }
 0x3f0   : > { %v10696_v49 = vpop.f32.mrb[40].mxu1  ;;  %v4148_v54 = vsel %vm1079_vm4, %v4138_v24, %v4147_v40 }
 0x3f1   : > { %v7358_v61 = vpop.f32.mrb[41].mxu1  ;;  %v4152_v34 = vrot.slane %v11849_v3, 3 }
 0x3f2   : > { %v10698_v53 = vpop.f32.mrb[42].mxu1  ;;  %7555 = vmatpush3.bf16.msra.mxu1 %v8295_v28 }
 0x3f3   : > { %v7359_v45 = vpop.f32.mrb[43].mxu1  ;;  %7556 = vmatprep.subr.bf16.mxu1 %v11749_v52  ;;  %v4156_v3 = vor.u32 %v4155_v42, %v4152_v34 }
 0x3f4   : > { %v10704_v43 = vpop.f32.mrb[60].mxu0  ;;  %v8297_v45 = vld [vmem:[%s11646_s7 + $0x138] sm:$0xff]  }
 0x3f5   : > { %11848 = vst [vmem:[#allocation41_spill] sm:$0xff] %v10704_v43  ;;  %7513 = vmatmul.mubr.bf16.gmra.mrb[148].mxu1 %v4148_v54  ;;  %v7714_v61 = vpop.f32.mrb[61].mxu0 }
 0x3f6   : > { %v10711_v28 = vpop.f32.mrb[62].mxu0  ;;  %7516 = vmatprep.mubr.msk.bf16.mxu1 %vm8426_vm6, %v11749_v52  ;;  %7557 = vmatpush3.bf16.msra.mxu1 %v8296_v11  ;;  %v4157_v11 = vsel %vm1079_vm4, %v4147_v40, %v4156_v3 }
 0x3f7   : > { %11851 = vst [vmem:[#allocation42_spill] sm:$0xff] %v10711_v28  ;;  %v7715_v43 = vpop.f32.mrb[63].mxu0  ;;  %7558 = vmatprep.subr.bf16.mxu1 %v11749_v52  ;;  %v11853_v28 = vshrl.u32 %v10222_v62, 16 }
 0x3f8   : > { %v10719_v24 = vpop.f32.mrb[44].mxu1  ;;  %v11854_v43 = vshll.u32 %v10222_v62, 16 }
 0x3f9   : > { %v7362_v27 = vpop.f32.mrb[45].mxu1  ;;  %v4161_v9 = vrot.slane %v11853_v28, 3 }
 0x3fa   : > { %v10721_v20 = vpop.f32.mrb[46].mxu1  ;;  %7559 = vmatpush3.bf16.msra.mxu1 %v8297_v45  ;;  %v4164_v39 = vrot.slane %v11854_v43, 4 }
 0x3fb   : > { %v7363_v54 = vpop.f32.mrb[47].mxu1  ;;  %7604 = vmatprep.subr.bf16.mxu1 %v11749_v52 }
 0x3fc   : > { %v10724_v61 = vpop.f32.mrb[64].mxu0  ;;  %v4165_v27 = vor.u32 %v4164_v39, %v4161_v9 }
 0x3fd   : > { %11852 = vst [vmem:[#allocation43_spill] sm:$0xff] %v10724_v61  ;;  %7517 = vmatmul.mubr.bf16.gmra.mrb[152].mxu1 %v4157_v11  ;;  %v7718_v6 = vpop.f32.mrb[65].mxu0  ;;  %v11856_v11 = vshrl.u32 %v10234_v30, 16 }
 0x3fe   : > { %v10731_v34 = vpop.f32.mrb[66].mxu0  ;;  %7520 = vmatprep.mubr.msk.bf16.mxu1 %vm8426_vm6, %v11749_v52  ;;  %v4166_v6 = vsel %vm1079_vm4, %v4156_v3, %v4165_v27 }
 0x3ff   : > { %11855 = vst [vmem:[#allocation44_spill] sm:$0xff] %v10731_v34  ;;  %v7719_v42 = vpop.f32.mrb[67].mxu0  ;;  %v4170_v43 = vrot.slane %v11856_v11, 3 }
 0x400   : > { %v3712_v45 = vpop.f32.mrb[48].mxu1  ;;  %v11857_v42 = vshll.u32 %v10234_v30, 16 }
 0x401   : > { %v7382_v54 = vpop.f32.mrb[49].mxu1  ;;  %v10736_v61 = vadd.f32 %v3712_v45, %v10561_v10 }
 0x402   : > { %v3715_v40 = vpop.f32.mrb[50].mxu1  ;;  %v4173_v34 = vrot.slane %v11857_v42, 4  ;;  %v11860_v42 = vshrl.u32 %v10241_v8, 16 }
 0x403   : > { %v7383_v56 = vpop.f32.mrb[51].mxu1  ;;  %v10739_v28 = vadd.f32 %v3715_v40, %v10563_v25 }
 0x404   : > { %v10741_v62 = vpop.f32.mrb[68].mxu0  ;;  %v4174_v56 = vor.u32 %v4173_v34, %v4170_v43 }
 0x405   : > { %7521 = vmatmul.mubr.bf16.gmra.mrb[156].mxu1 %v4166_v6  ;;  %v7722_v39 = vpop.f32.mrb[69].mxu0 }
 0x406   : > { %v10748_v9 = vpop.f32.mrb[70].mxu0  ;;  %7524 = vmatprep.mubr.msk.bf16.mxu1 %vm8426_vm6, %v11749_v52  ;;  %v4175_v6 = vsel %vm1079_vm4, %v4165_v27, %v4174_v56  ;;  %v4179_v39 = vrot.slane %v11860_v42, 3 }
 0x407   : > { %11858 = vst [vmem:[#allocation45_spill] sm:$0xff] %v10748_v9  ;;  %v7723_v10 = vpop.f32.mrb[71].mxu0 }
 0x408   : > { %v3720_v25 = vpop.f32.mrb[52].mxu1  ;;  %v11861_v10 = vshll.u32 %v10241_v8, 16 }
 0x409   : > { %v7386_v45 = vpop.f32.mrb[53].mxu1  ;;  %v10753_v54 = vadd.f32 %v3720_v25, %v10568_v41 }
 0x40a   : > { %v3723_v3 = vpop.f32.mrb[54].mxu1  ;;  %v4182_v9 = vrot.slane %v11861_v10, 4  ;;  %v11864_v10 = vld [vmem:[#allocation23_spill] sm:$0xff] }
 0x40b   : > { %v7387_v40 = vpop.f32.mrb[55].mxu1  ;;  %v10756_v11 = vadd.f32 %v3723_v3, %v10570_v48 }
 0x40c   : > { %v10758_v30 = vpop.f32.mrb[72].mxu0  ;;  %v4183_v25 = vor.u32 %v4182_v9, %v4179_v39 }
 0x40d   : > { %11859 = vst [vmem:[#allocation46_spill] sm:$0xff] %v10758_v30  ;;  %7525 = vmatmul.mubr.bf16.gmra.mrb[160].mxu1 %v4175_v6  ;;  %v7802_v34 = vpop.f32.mrb[73].mxu0 }
 0x40e   : > { %v10765_v43 = vpop.f32.mrb[74].mxu0  ;;  %7528 = vmatprep.mubr.msk.bf16.mxu1 %vm8426_vm6, %v11749_v52  ;;  %v4184_v6 = vsel %vm1079_vm4, %v4174_v56, %v4183_v25  ;;  %v11865_v34 = vshrl.u32 %v11864_v10, 16 }
 0x40f   : > { %11862 = vst [vmem:[#allocation47_spill] sm:$0xff] %v10765_v43  ;;  %v7803_v41 = vpop.f32.mrb[75].mxu0 }
 0x410   : > { %v3728_v48 = vpop.f32.mrb[56].mxu1  ;;  %v4188_v43 = vrot.slane %v11865_v34, 3  ;;  %v11866_v41 = vshll.u32 %v11864_v10, 16 }
 0x411   : > { %v7390_v45 = vpop.f32.mrb[57].mxu1  ;;  %v10770_v3 = vadd.f32 %v3728_v48, %v10579_v35 }
 0x412   : > { %v3731_v27 = vpop.f32.mrb[58].mxu1  ;;  %v4191_v30 = vrot.slane %v11866_v41, 4  ;;  %v11869_v41 = vld [vmem:[#allocation24_spill] sm:$0xff] }
 0x413   : > { %v7391_v40 = vpop.f32.mrb[59].mxu1  ;;  %v10773_v42 = vadd.f32 %v3731_v27, %v10581_v50 }
 0x414   : > { %v10775_v8 = vpop.f32.mrb[76].mxu0  ;;  %v4192_v48 = vor.u32 %v4191_v30, %v4188_v43 }
 0x415   : > { %11863 = vst [vmem:[#allocation48_spill] sm:$0xff] %v10775_v8  ;;  %7529 = vmatmul.mubr.bf16.gmra.mrb[164].mxu1 %v4184_v6  ;;  %v7806_v9 = vpop.f32.mrb[77].mxu0 }
 0x416   : > { %v10782_v39 = vpop.f32.mrb[78].mxu0  ;;  %7532 = vmatprep.mubr.msk.bf16.mxu1 %vm8426_vm6, %v11749_v52  ;;  %v4193_v6 = vsel %vm1079_vm4, %v4183_v25, %v4192_v48  ;;  %v11870_v9 = vshrl.u32 %v11869_v41, 16 }
 0x417   : > { %11867 = vst [vmem:[#allocation23_spill] sm:$0xff] %v10782_v39  ;;  %v7807_v35 = vpop.f32.mrb[79].mxu0 }
 0x418   : > { %v3736_v50 = vpop.f32.mrb[60].mxu1  ;;  %v4197_v39 = vrot.slane %v11870_v9, 3  ;;  %v11871_v35 = vshll.u32 %v11869_v41, 16 }
 0x419   : > { %v7394_v45 = vpop.f32.mrb[61].mxu1  ;;  %v10787_v27 = vadd.f32 %v3736_v50, %v10590_v17 }
 0x41a   : > { %v3739_v56 = vpop.f32.mrb[62].mxu1  ;;  %v4200_v8 = vrot.slane %v11871_v35, 4  ;;  %v11873_v45 = vld [vmem:[#allocation28_spill] sm:$0xff] }
 0x41b   : > { %v7395_v40 = vpop.f32.mrb[63].mxu1  ;;  %v10790_v34 = vadd.f32 %v3739_v56, %v10592_v2  ;;  %v4204_v56 = vshrl.u32 %v11873_v45, 16  ;;  %v4207_v25 = vshll.u32 %v11873_v45, 16 }
 0x41c   : > { %v10792_v10 = vpop.f32.mrb[80].mxu0  ;;  %v4201_v50 = vor.u32 %v4200_v8, %v4197_v39 }
 0x41d   : > { %11868 = vst [vmem:[#allocation49_spill] sm:$0xff] %v10792_v10  ;;  %7533 = vmatmul.mubr.bf16.gmra.mrb[168].mxu1 %v4193_v6  ;;  %v7810_v30 = vpop.f32.mrb[81].mxu0  ;;  %v4209_v10 = vrot.slane %v4207_v25, 4 }
 0x41e   : > { %v10799_v43 = vpop.f32.mrb[82].mxu0  ;;  %7536 = vmatprep.mubr.msk.bf16.mxu1 %vm8426_vm6, %v11749_v52 }
 0x41f   : > { %11872 = vst [vmem:[#allocation24_spill] sm:$0xff] %v10799_v43  ;;  %v7811_v17 = vpop.f32.mrb[83].mxu0  ;;  %v4202_v43 = vsel %vm1079_vm4, %v4192_v48, %v4201_v50 }
 0x420   : > { %v3744_v2 = vpop.f32.mrb[64].mxu1  ;;  %v4206_v17 = vrot.slane %v4204_v56, 3 }
 0x421   : > { %v7398_v40 = vpop.f32.mrb[65].mxu1  ;;  %v10806_v9 = vadd.f32 %v3744_v2, %v10601_v47 }
 0x422   : > { %v3747_v41 = vpop.f32.mrb[66].mxu1  ;;  %v4210_v45 = vor.u32 %v4209_v10, %v4206_v17 }
 0x423   : > { %v7399_v35 = vpop.f32.mrb[67].mxu1  ;;  %v10809_v6 = vadd.f32 %v3747_v41, %v10603_v36 }
 0x424   : > { %v10811_v30 = vpop.f32.mrb[84].mxu0 }
 0x425   : > { %7537 = vmatmul.mubr.bf16.gmra.mrb[172].mxu1 %v4202_v43  ;;  %v7814_v8 = vpop.f32.mrb[85].mxu0  ;;  %v4211_v43 = vsel %vm1079_vm4, %v4201_v50, %v4210_v45  ;;  %v8298_v50 = vld [vmem:[%s11646_s7 + $0x140] sm:$0xff]  }
 0x426   : > { %v10814_v39 = vpop.f32.mrb[86].mxu0  ;;  %7540 = vmatprep.mubr.msk.bf16.mxu1 %vm8426_vm6, %v11749_v52 }
 0x427   : > { %v7815_v47 = vpop.f32.mrb[87].mxu0 }
 0x428   : > { %v3752_v2 = vpop.f32.mrb[68].mxu1 }
 0x429   : > { %v7402_v40 = vpop.f32.mrb[69].mxu1  ;;  %v10819_v36 = vadd.f32 %v3752_v2, %v10612_v44 }
 0x42a   : > { %v3755_v41 = vpop.f32.mrb[70].mxu1 }
 0x42b   : > { %v7403_v35 = vpop.f32.mrb[71].mxu1  ;;  %v10822_v48 = vadd.f32 %v3755_v41, %v10614_v32  ;;  %v11874_v32 = vld [vmem:[#allocation26_spill] sm:$0xff] }
 0x42c   : > { %v10824_v56 = vpop.f32.mrb[88].mxu0  ;;  %v4445_v40 = vrot.slane %v11874_v32, 4 }
 0x42d   : > { %7541 = vmatmul.mubr.bf16.gmra.mrb[176].mxu1 %v4211_v43  ;;  %v7818_v25 = vpop.f32.mrb[89].mxu0  ;;  %v11875_v43 = vrot.slane %v10179_v55, 4 }
 0x42e   : > { %v10827_v8 = vpop.f32.mrb[90].mxu0  ;;  %7560 = vmatprep.mubr.msk.bf16.mxu1 %vm8426_vm6, %v11749_v52 }
 0x42f   : > { %v7819_v10 = vpop.f32.mrb[91].mxu0  ;;  %v4447_v25 = vsel %vm4444_vm12, %v4445_v40, %v11875_v43  ;;  %v8300_v40 = vld [vmem:[%s11646_s7 + $0x150] sm:$0xff]  }
 0x430   : > { %v3760_v17 = vpop.f32.mrb[72].mxu1 }
 0x431   : > { %v7406_v44 = vpop.f32.mrb[73].mxu1  ;;  %v10832_v47 = vadd.f32 %v3760_v17, %v10628_v1  ;;  %v8299_v17 = vld [vmem:[%s11646_s7 + $0x148] sm:$0xff]  }
 0x432   : > { %v3763_v2 = vpop.f32.mrb[74].mxu1 }
 0x433   : > { %v7407_v45 = vpop.f32.mrb[75].mxu1  ;;  %v10839_v41 = vadd.f32 %v3763_v2, %v10630_v19 }
 0x434   : > { %v10841_v35 = vpop.f32.mrb[92].mxu0 }
 0x435   : > { %7561 = vmatmul.mubr.bf16.vlgmr.msra.gmra.mrb[180].mxu1 %v4447_v25  ;;  %v7822_v1 = vpop.f32.mrb[93].mxu0  ;;  %v11877_v25 = vld [vmem:[#allocation27_spill] sm:$0xff] }
 0x436   : > { %7605 = vmatpush3.bf16.msra.mxu1 %v8298_v50  ;;  %v10846_v10 = vpop.f32.mrb[94].mxu0  ;;  %7564 = vmatprep.mubr.msk.bf16.mxu1 %vm8426_vm6, %v11749_v52 }
 0x437   : > { %v7823_v19 = vpop.f32.mrb[95].mxu0  ;;  %7606 = vmatprep.subr.bf16.mxu1 %v11749_v52 }
 0x438   : > { %v3768_v44 = vpop.f32.mrb[76].mxu1 }
 0x439   : > { %v7410_v2 = vpop.f32.mrb[77].mxu1  ;;  %v10855_v55 = vadd.f32 %v3768_v44, %v10650_v21  ;;  %v8301_v21 = vld [vmem:[%s11646_s7 + $0x158] sm:$0xff]  }
 0x43a   : > { %v3771_v32 = vpop.f32.mrb[78].mxu1  ;;  %7607 = vmatpush3.bf16.msra.mxu1 %v8299_v17 }
 0x43b   : > { %v7411_v50 = vpop.f32.mrb[79].mxu1  ;;  %7608 = vmatprep.subr.bf16.mxu1 %v11749_v52  ;;  %v10862_v45 = vadd.f32 %v3771_v32, %v10652_v51 }
 0x43c   : > { %v10864_v43 = vpop.f32.mrb[96].mxu0  ;;  %v8302_v50 = vld [vmem:[%s11646_s7 + $0x160] sm:$0xff]  }
 0x43d   : > { %11876 = vst [vmem:[#allocation28_spill] sm:$0xff] %v10864_v43  ;;  %7565 = vmatmul.mubr.bf16.gmra.mrb[184].mxu1 %v11877_v25  ;;  %v7826_v1 = vpop.f32.mrb[97].mxu0 }
 0x43e   : > { %v10867_v19 = vpop.f32.mrb[98].mxu0  ;;  %7568 = vmatprep.mubr.msk.bf16.mxu1 %vm8426_vm6, %v11749_v52  ;;  %7609 = vmatpush3.bf16.msra.mxu1 %v8300_v40 }
 0x43f   : > { %11878 = vst [vmem:[#allocation26_spill] sm:$0xff] %v10867_v19  ;;  %v7827_v17 = vpop.f32.mrb[99].mxu0  ;;  %7610 = vmatprep.subr.bf16.mxu1 %v11749_v52 }
 0x440   : > { %v3776_v51 = vpop.f32.mrb[80].mxu1  ;;  %v11880_v17 = vld [vmem:[#allocation29_spill] sm:$0xff] }
 0x441   : > { %v7414_v44 = vpop.f32.mrb[81].mxu1  ;;  %v10876_v2 = vadd.f32 %v3776_v51, %v10673_v38  ;;  %v8303_v38 = vld [vmem:[%s11646_s7 + $0x168] sm:$0xff]  }
 0x442   : > { %v3779_v32 = vpop.f32.mrb[82].mxu1  ;;  %7611 = vmatpush3.bf16.msra.mxu1 %v8301_v21 }
 0x443   : > { %v7415_v25 = vpop.f32.mrb[83].mxu1  ;;  %7612 = vmatprep.subr.bf16.mxu1 %v11749_v52  ;;  %v10883_v40 = vadd.f32 %v3779_v32, %v10675_v59 }
 0x444   : > { %v10885_v1 = vpop.f32.mrb[100].mxu0 }
 0x445   : > { %11879 = vst [vmem:[#allocation27_spill] sm:$0xff] %v10885_v1  ;;  %7569 = vmatmul.mubr.bf16.gmra.mrb[188].mxu1 %v11880_v17  ;;  %v7830_v44 = vpop.f32.mrb[101].mxu0  ;;  %v8304_v17 = vld [vmem:[%s11646_s7 + $0x170] sm:$0xff]  }
 0x446   : > { %v10888_v19 = vpop.f32.mrb[102].mxu0  ;;  %7572 = vmatprep.mubr.msk.bf16.mxu1 %vm8426_vm6, %v11749_v52  ;;  %7613 = vmatpush3.bf16.msra.mxu1 %v8302_v50 }
 0x447   : > { %11881 = vst [vmem:[#allocation29_spill] sm:$0xff] %v10888_v19  ;;  %v7831_v21 = vpop.f32.mrb[103].mxu0  ;;  %7614 = vmatprep.subr.bf16.mxu1 %v11749_v52  ;;  %v11883_v19 = vld [vmem:[#allocation30_spill] sm:$0xff] }
 0x448   : > { %v3784_v59 = vpop.f32.mrb[84].mxu1 }
 0x449   : > { %v7418_v51 = vpop.f32.mrb[85].mxu1  ;;  %v10897_v32 = vadd.f32 %v3784_v59, %v10696_v49  ;;  %v8305_v49 = vld [vmem:[%s11646_s7 + $0x178] sm:$0xff]  }
 0x44a   : > { %v3787_v25 = vpop.f32.mrb[86].mxu1  ;;  %7615 = vmatpush3.bf16.msra.mxu1 %v8303_v38 }
 0x44b   : > { %v7419_v44 = vpop.f32.mrb[87].mxu1  ;;  %7616 = vmatprep.subr.bf16.mxu1 %v11749_v52  ;;  %v10904_v50 = vadd.f32 %v3787_v25, %v10698_v53 }
 0x44c   : > { %v10906_v21 = vpop.f32.mrb[104].mxu0 }
 0x44d   : > { %11882 = vst [vmem:[#allocation50_spill] sm:$0xff] %v10906_v21  ;;  %7573 = vmatmul.mubr.bf16.gmra.mrb[192].mxu1 %v11883_v19  ;;  %v7834_v51 = vpop.f32.mrb[105].mxu0 }
 0x44e   : > { %v10909_v1 = vpop.f32.mrb[106].mxu0  ;;  %7576 = vmatprep.mubr.msk.bf16.mxu1 %vm8426_vm6, %v11749_v52  ;;  %7617 = vmatpush3.bf16.msra.mxu1 %v8304_v17 }
 0x44f   : > { %11884 = vst [vmem:[#allocation30_spill] sm:$0xff] %v10909_v1  ;;  %v7835_v38 = vpop.f32.mrb[107].mxu0  ;;  %7618 = vmatprep.subr.bf16.mxu1 %v11749_v52  ;;  %v11886_v1 = vld [vmem:[#allocation31_spill] sm:$0xff] }
 0x450   : > { %v3792_v53 = vpop.f32.mrb[88].mxu1 }
 0x451   : > { %v10918_v59 = vadd.f32 %v3792_v53, %v10719_v24  ;;  %v7422_v25 = vpop.f32.mrb[89].mxu1 }
 0x452   : > { %v3795_v19 = vpop.f32.mrb[90].mxu1  ;;  %7619 = vmatpush3.bf16.msra.mxu1 %v8305_v49 }
 0x453   : > { %v10921_v44 = vadd.f32 %v3795_v19, %v10721_v20  ;;  %v7423_v51 = vpop.f32.mrb[91].mxu1  ;;  %7724 = vmatprep.subr.bf16.mxu1 %v11749_v52 }
 0x454   : > { %v10924_v17 = vpop.f32.mrb[108].mxu0 }
 0x455   : > { %11885 = vst [vmem:[#allocation51_spill] sm:$0xff] %v10924_v17  ;;  %7577 = vmatmul.mubr.bf16.gmra.mrb[196].mxu1 %v11886_v1  ;;  %v7838_v38 = vpop.f32.mrb[109].mxu0  ;;  %v11889_v1 = vld [vmem:[#allocation32_spill] sm:$0xff] }
 0x456   : > { %v10927_v21 = vpop.f32.mrb[110].mxu0  ;;  %7580 = vmatprep.mubr.msk.bf16.mxu1 %vm8426_vm6, %v11749_v52 }
 0x457   : > { %11887 = vst [vmem:[#allocation31_spill] sm:$0xff] %v10927_v21  ;;  %v7839_v24 = vpop.f32.mrb[111].mxu0 }
 0x458   : > { %v3967_v53 = vpop.f32.mrb[92].mxu1 }
 0x459   : > { %v10932_v49 = vadd.f32 %v3967_v53, %v10736_v61  ;;  %v7442_v20 = vpop.f32.mrb[93].mxu1 }
 0x45a   : > { %v3970_v25 = vpop.f32.mrb[94].mxu1 }
 0x45b   : > { %v10935_v19 = vadd.f32 %v3970_v25, %v10739_v28  ;;  %v7443_v51 = vpop.f32.mrb[95].mxu1 }
 0x45c   : > { %v10937_v17 = vpop.f32.mrb[112].mxu0  ;;  %v11891_v51 = vld [vmem:[#allocation33_spill] sm:$0xff] }
 0x45d   : > { %11888 = vst [vmem:[#allocation52_spill] sm:$0xff] %v10937_v17  ;;  %7581 = vmatmul.mubr.bf16.gmra.mrb[200].mxu1 %v11889_v1  ;;  %v7842_v38 = vpop.f32.mrb[113].mxu0  ;;  %v5898_v1 = vld [vmem:[%s11648_s9] sm:$0x3] }
 0x45e   : > { %v10940_v21 = vpop.f32.mrb[114].mxu0  ;;  %7584 = vmatprep.mubr.msk.bf16.mxu1 %vm8426_vm6, %v11749_v52 }
 0x45f   : > { %11890 = vst [vmem:[#allocation32_spill] sm:$0xff] %v10940_v21  ;;  %v7843_v24 = vpop.f32.mrb[115].mxu0 }
 0x460   : > { %v3975_v43 = vpop.f32.mrb[96].mxu1 }
 0x461   : > { %v10945_v61 = vadd.f32 %v3975_v43, %v10753_v54  ;;  %v7446_v53 = vpop.f32.mrb[97].mxu1  ;;  %v10957_v54 = vsel %vm603_vm0, %v5898_v1, 0 }
 0x462   : > { %v3978_v28 = vpop.f32.mrb[98].mxu1  ;;  %7845 = vmatpush3.bf16.msra.mxu0 %v10957_v54 }
 0x463   : > { %v10948_v20 = vadd.f32 %v3978_v28, %v10756_v11  ;;  %v7447_v25 = vpop.f32.mrb[99].mxu1 }
 0x464   : > { %v11892_v25 = vld [vmem:[#allocation34_spill] sm:$0xff] }
 0x465   : > { %7585 = vmatmul.mubr.bf16.gmra.mrb[204].mxu1 %v11891_v51 }
 0x466   : > { %7588 = vmatprep.mubr.msk.bf16.mxu1 %vm8426_vm6, %v11749_v52 }
 0x468   : > { %v3983_v43 = vpop.f32.mrb[100].mxu1 }
 0x469   : > { %v10961_v11 = vadd.f32 %v3983_v43, %v10770_v3  ;;  %v7450_v38 = vpop.f32.mrb[101].mxu1  ;;  %v8314_v3 = vld [vmem:[%s10971_s29] sm:$0xff]  }
 0x46a   : > { %v3986_v24 = vpop.f32.mrb[102].mxu1  ;;  %7847 = vmatmul.mubr.msk.bf16.vlgmr.msra.gmra.mrb[116].mxu0 %vm560_vm2, %v8314_v3 }
 0x46b   : > { %v10964_v53 = vadd.f32 %v3986_v24, %v10773_v42  ;;  %v7451_v28 = vpop.f32.mrb[103].mxu1  ;;  %7850 = vmatprep.mubr.msk.bf16.mxu0 %vm8426_vm6, %v11749_v52 }
 0x46c   : > { %v8315_v28 = vld [vmem:[%s10971_s29 + $0x8] sm:$0xff]  }
 0x46d   : > { %7589 = vmatmul.mubr.bf16.gmra.mrb[208].mxu1 %v11892_v25  ;;  %v11893_v25 = vld [vmem:[#allocation35_spill] sm:$0xff] }
 0x46e   : > { %7592 = vmatprep.mubr.msk.bf16.mxu1 %vm8426_vm6, %v11749_v52 }
 0x470   : > { %v3991_v51 = vpop.f32.mrb[104].mxu1 }
 0x471   : > { %v10975_v1 = vadd.f32 %v3991_v51, %v10787_v27  ;;  %v7454_v42 = vpop.f32.mrb[105].mxu1 }
 0x472   : > { %v3994_v43 = vpop.f32.mrb[106].mxu1  ;;  %7851 = vmatmul.mubr.msk.bf16.gmra.mrb[120].mxu0 %vm560_vm2, %v8315_v28 }
 0x473   : > { %v10981_v38 = vadd.f32 %v3994_v43, %v10790_v34  ;;  %v7455_v24 = vpop.f32.mrb[107].mxu1  ;;  %7854 = vmatprep.mubr.msk.bf16.mxu0 %vm8426_vm6, %v11749_v52 }
 0x474   : > { %v11894_v24 = vld [vmem:[#allocation36_spill] sm:$0xff] }
 0x475   : > { %7593 = vmatmul.mubr.bf16.gmra.mrb[212].mxu1 %v11893_v25  ;;  %v8316_v25 = vld [vmem:[%s10971_s29 + $0x10] sm:$0xff]  }
 0x476   : > { %7596 = vmatprep.mubr.msk.bf16.mxu1 %vm8426_vm6, %v11749_v52 }
 0x478   : > { %v3999_v27 = vpop.f32.mrb[108].mxu1 }
 0x479   : > { %v10988_v51 = vadd.f32 %v3999_v27, %v10806_v9  ;;  %v7458_v3 = vpop.f32.mrb[109].mxu1 }
 0x47a   : > { %v4002_v42 = vpop.f32.mrb[110].mxu1  ;;  %7855 = vmatmul.mubr.msk.bf16.gmra.mrb[124].mxu0 %vm560_vm2, %v8316_v25 }
 0x47b   : > { %v10994_v34 = vadd.f32 %v4002_v42, %v10809_v6  ;;  %v7459_v43 = vpop.f32.mrb[111].mxu1  ;;  %v11895_v42 = vld [vmem:[#allocation37_spill] sm:$0xff] }
 0x47d   : > { %7597 = vmatmul.mubr.bf16.gmra.mrb[216].mxu1 %v11894_v24 }
 0x47e   : > { %7600 = vmatprep.mubr.msk.bf16.mxu1 %vm8426_vm6, %v11749_v52 }
 0x480   : > { %v4007_v21 = vpop.f32.mrb[112].mxu1 }
 0x481   : > { %v11001_v9 = vadd.f32 %v4007_v21, %v10819_v36  ;;  %v7462_v27 = vpop.f32.mrb[113].mxu1  ;;  %v8306_v21 = vld [vmem:[%s11646_s7 + $0x1c0] sm:$0xff]  }
 0x482   : > { %v4010_v28 = vpop.f32.mrb[114].mxu1 }
 0x483   : > { %v11005_v3 = vadd.f32 %v4010_v28, %v10822_v48  ;;  %v7463_v6 = vpop.f32.mrb[115].mxu1 }
 0x485   : > { %7601 = vmatmul.mubr.bf16.gmra.mrb[220].mxu1 %v11895_v42 }
 0x486   : > { %7620 = vmatprep.mubr.msk.bf16.mxu1 %vm8426_vm6, %v11749_v52 }
 0x488   : > { %v4015_v43 = vpop.f32.mrb[116].mxu1 }
 0x489   : > { %v11011_v24 = vadd.f32 %v4015_v43, %v10832_v47  ;;  %v7466_v17 = vpop.f32.mrb[117].mxu1  ;;  %v8307_v47 = vld [vmem:[%s11646_s7 + $0x1c8] sm:$0xff]  }
 0x48a   : > { %v4018_v36 = vpop.f32.mrb[118].mxu1 }
 0x48b   : > { %v11017_v25 = vadd.f32 %v4018_v36, %v10839_v41  ;;  %v7467_v48 = vpop.f32.mrb[119].mxu1 }
 0x48d   : > { %7621 = vmatmul.mubr.bf16.vlgmr.msra.gmra.mrb[224].mxu1 %v10346_v33  ;;  %v8308_v33 = vld [vmem:[%s11646_s7 + $0x1d0] sm:$0xff]  }
 0x48e   : > { %7725 = vmatpush3.bf16.msra.mxu1 %v8306_v21  ;;  %7624 = vmatprep.mubr.msk.bf16.mxu1 %vm8426_vm6, %v11749_v52 }
 0x48f   : > { %7726 = vmatprep.subr.bf16.mxu1 %v11749_v52 }
 0x490   : > { %v4023_v17 = vpop.f32.mrb[120].mxu1 }
 0x491   : > { %v11027_v27 = vadd.f32 %v4023_v17, %v10855_v55  ;;  %v7470_v28 = vpop.f32.mrb[121].mxu1  ;;  %v8309_v55 = vld [vmem:[%s11646_s7 + $0x1d8] sm:$0xff]  }
 0x492   : > { %v4026_v41 = vpop.f32.mrb[122].mxu1  ;;  %7727 = vmatpush3.bf16.msra.mxu1 %v8307_v47 }
 0x493   : > { %v11033_v6 = vadd.f32 %v4026_v41, %v10862_v45  ;;  %v7471_v42 = vpop.f32.mrb[123].mxu1  ;;  %7728 = vmatprep.subr.bf16.mxu1 %v11749_v52 }
 0x495   : > { %7625 = vmatmul.mubr.bf16.gmra.mrb[228].mxu1 %v10349_v7  ;;  %v8310_v7 = vld [vmem:[%s11646_s7 + $0x1e0] sm:$0xff]  }
 0x496   : > { %7628 = vmatprep.mubr.msk.bf16.mxu1 %vm8426_vm6, %v11749_v52  ;;  %7729 = vmatpush3.bf16.msra.mxu1 %v8308_v33 }
 0x497   : > { %7730 = vmatprep.subr.bf16.mxu1 %v11749_v52 }
 0x498   : > { %v4031_v43 = vpop.f32.mrb[124].mxu1 }
 0x499   : > { %v11044_v36 = vadd.f32 %v4031_v43, %v10876_v2  ;;  %v7474_v45 = vpop.f32.mrb[125].mxu1  ;;  %v8311_v2 = vld [vmem:[%s11646_s7 + $0x1e8] sm:$0xff]  }
 0x49a   : > { %v4034_v21 = vpop.f32.mrb[126].mxu1  ;;  %7731 = vmatpush3.bf16.msra.mxu1 %v8309_v55 }
 0x49b   : > { %v11050_v48 = vadd.f32 %v4034_v21, %v10883_v40  ;;  %v7475_v47 = vpop.f32.mrb[127].mxu1  ;;  %7732 = vmatprep.subr.bf16.mxu1 %v11749_v52 }
 0x49d   : > { %7629 = vmatmul.mubr.bf16.gmra.mrb[232].mxu1 %v10352_v22  ;;  %v8312_v22 = vld [vmem:[%s11646_s7 + $0x1f0] sm:$0xff]  }
 0x49e   : > { %7632 = vmatprep.mubr.msk.bf16.mxu1 %vm8426_vm6, %v11749_v52  ;;  %7733 = vmatpush3.bf16.msra.mxu1 %v8310_v7 }
 0x49f   : > { %7734 = vmatprep.subr.bf16.mxu1 %v11749_v52 }
 0x4a0   : > { %v4039_v17 = vpop.f32.mrb[128].mxu1 }
 0x4a1   : > { %v11061_v28 = vadd.f32 %v4039_v17, %v10897_v32  ;;  %v7478_v40 = vpop.f32.mrb[129].mxu1  ;;  %v8313_v32 = vld [vmem:[%s11646_s7 + $0x1f8] sm:$0xff]  }
 0x4a2   : > { %v4042_v41 = vpop.f32.mrb[130].mxu1  ;;  %7735 = vmatpush3.bf16.msra.mxu1 %v8311_v2 }
 0x4a3   : > { %v11067_v33 = vadd.f32 %v4042_v41, %v10904_v50  ;;  %v7479_v42 = vpop.f32.mrb[131].mxu1  ;;  %7736 = vmatprep.subr.bf16.mxu1 %v11749_v52 }
 0x4a5   : > { %7633 = vmatmul.mubr.bf16.gmra.mrb[236].mxu1 %v10356_v15 }
 0x4a6   : > { %7636 = vmatprep.mubr.msk.bf16.mxu1 %vm8426_vm6, %v11749_v52  ;;  %7737 = vmatpush3.bf16.msra.mxu1 %v8312_v22 }
 0x4a7   : > { %7738 = vmatprep.subr.bf16.mxu1 %v11749_v52 }
 0x4a8   : > { %v4047_v55 = vpop.f32.mrb[132].mxu1 }
 0x4a9   : > { %v11078_v43 = vadd.f32 %v4047_v55, %v10918_v59  ;;  %v7482_v50 = vpop.f32.mrb[133].mxu1 }
 0x4aa   : > { %v4050_v45 = vpop.f32.mrb[134].mxu1  ;;  %7739 = vmatpush3.bf16.msra.mxu1 %v8313_v32 }
 0x4ab   : > { %v11081_v21 = vadd.f32 %v4050_v45, %v10921_v44  ;;  %v7483_v15 = vpop.f32.mrb[135].mxu1  ;;  %7890 = vmatprep.subr.bf16.mxu1 %v11749_v52 }
 0x4ad   : > { %7637 = vmatmul.mubr.bf16.gmra.mrb[240].mxu1 %v10369_v57 }
 0x4ae   : > { %7640 = vmatprep.mubr.msk.bf16.mxu1 %vm8426_vm6, %v11749_v52 }
 0x4b0   : > { %v4305_v7 = vpop.f32.mrb[136].mxu1 }
 0x4b1   : > { %v11088_v47 = vadd.f32 %v4305_v7, %v10932_v49  ;;  %v7502_v59 = vpop.f32.mrb[137].mxu1 }
 0x4b2   : > { %v4308_v2 = vpop.f32.mrb[138].mxu1 }
 0x4b3   : > { %v11091_v17 = vadd.f32 %v4308_v2, %v10935_v19  ;;  %v7503_v40 = vpop.f32.mrb[139].mxu1 }
 0x4b5   : > { %7641 = vmatmul.mubr.bf16.gmra.mrb[244].mxu1 %v10381_v26 }
 0x4b6   : > { %7644 = vmatprep.mubr.msk.bf16.mxu1 %vm8426_vm6, %v11749_v52 }
 0x4b8   : > { %v4313_v44 = vpop.f32.mrb[140].mxu1 }
 0x4b9   : > { %v11097_v57 = vadd.f32 %v4313_v44, %v10945_v61  ;;  %v7506_v41 = vpop.f32.mrb[141].mxu1 }
 0x4ba   : > { %v4316_v22 = vpop.f32.mrb[142].mxu1 }
 0x4bb   : > { %v11100_v49 = vadd.f32 %v4316_v22, %v10948_v20  ;;  %v7507_v42 = vpop.f32.mrb[143].mxu1 }
 0x4bd   : > { %7645 = vmatmul.mubr.bf16.gmra.mrb[248].mxu1 %v10407_v60 }
 0x4be   : > { %7648 = vmatprep.mubr.msk.bf16.mxu1 %vm8426_vm6, %v11749_v52 }
 0x4c0   : > { %v4321_v19 = vpop.f32.mrb[144].mxu1 }
 0x4c1   : > { %v11106_v26 = vadd.f32 %v4321_v19, %v10961_v11  ;;  %v7510_v32 = vpop.f32.mrb[145].mxu1 }
 0x4c2   : > { %v4324_v55 = vpop.f32.mrb[146].mxu1 }
 0x4c3   : > { %v11109_v61 = vadd.f32 %v4324_v55, %v10964_v53  ;;  %v7511_v50 = vpop.f32.mrb[147].mxu1  ;;  %v4670_v53 = vld [vmem:[#allocation2 + $0x60] sm:$0x1f] }
 0x4c4   : > { %v4738_v59 = vshrl.u32 %v4670_v53, 16  ;;  %v4741_v2 = vshll.u32 %v4670_v53, 16 }
 0x4c5   : > { %7649 = vmatmul.mubr.bf16.gmra.mrb[252].mxu1 %v10426_v13 }
 0x4c6   : > { %7652 = vmatprep.mubr.msk.bf16.mxu1 %vm8426_vm6, %v11749_v52  ;;  %v4740_v22 = vrot.slane %v4738_v59, 4  ;;  %v4743_v42 = vrot.slane %v4741_v2, 5 }
 0x4c8   : > { %v4329_v20 = vpop.f32.mrb[148].mxu1  ;;  %v4744_v19 = vor.u32 %v4743_v42, %v4740_v22 }
 0x4c9   : > { %v11115_v60 = vadd.f32 %v4329_v20, %v10975_v1  ;;  %v7514_v45 = vpop.f32.mrb[149].mxu1 }
 0x4ca   : > { %v4332_v15 = vpop.f32.mrb[150].mxu1  ;;  %v4745_v20 = vsel %vm4688_vm10, %v10247_v5, %v4744_v19 }
 0x4cb   : > { %v11118_v11 = vadd.f32 %v4332_v15, %v10981_v38  ;;  %v7515_v7 = vpop.f32.mrb[151].mxu1 }
 0x4cd   : > { %7653 = vmatmul.mubr.bf16.gmra.mrb[0].mxu1 %v10430_v14 }
 0x4ce   : > { %7656 = vmatprep.mubr.msk.bf16.mxu1 %vm8426_vm6, %v11749_v52 }
 0x4d0   : > { %v4337_v13 = vpop.f32.mrb[152].mxu1 }
 0x4d1   : > { %v11124_v40 = vadd.f32 %v4337_v13, %v10988_v51  ;;  %v7518_v1 = vpop.f32.mrb[153].mxu1 }
 0x4d2   : > { %v4340_v44 = vpop.f32.mrb[154].mxu1 }
 0x4d3   : > { %v11127_v41 = vadd.f32 %v4340_v44, %v10994_v34  ;;  %v7519_v38 = vpop.f32.mrb[155].mxu1 }
 0x4d5   : > { %7657 = vmatmul.mubr.bf16.gmra.mrb[4].mxu1 %v10376_v4 }
 0x4d6   : > { %7660 = vmatprep.mubr.msk.bf16.mxu1 %vm8426_vm6, %v11749_v52 }
 0x4d8   : > { %v4345_v14 = vpop.f32.mrb[156].mxu1 }
 0x4d9   : > { %v11133_v32 = vadd.f32 %v4345_v14, %v11001_v9  ;;  %v7522_v51 = vpop.f32.mrb[157].mxu1 }
 0x4da   : > { %v4348_v55 = vpop.f32.mrb[158].mxu1 }
 0x4db   : > { %v11136_v50 = vadd.f32 %v4348_v55, %v11005_v3  ;;  %v7523_v34 = vpop.f32.mrb[159].mxu1 }
 0x4dd   : > { %7661 = vmatmul.mubr.bf16.gmra.mrb[8].mxu1 %v4745_v20 }
 0x4de   : > { %7740 = vmatprep.mubr.msk.bf16.mxu1 %vm8426_vm6, %v11749_v52 }
 0x4e0   : > { %v4353_v4 = vpop.f32.mrb[160].mxu1 }
 0x4e1   : > { %v11143_v45 = vadd.f32 %v4353_v4, %v11011_v24  ;;  %v7526_v15 = vpop.f32.mrb[161].mxu1 }
 0x4e2   : > { %v4356_v9 = vpop.f32.mrb[162].mxu1 }
 0x4e3   : > { %v11146_v7 = vadd.f32 %v4356_v9, %v11017_v25  ;;  %v7527_v53 = vpop.f32.mrb[163].mxu1 }
 0x4e5   : > { %7741 = vmatmul.mubr.bf16.vlgmr.msra.gmra.mrb[12].mxu1 %v10388_v0 }
 0x4e6   : > { %7891 = vmatpush3.bf16.msra.mxu1 %v10957_v54  ;;  %7744 = vmatprep.mubr.msk.bf16.mxu1 %vm8426_vm6, %v11749_v52 }
 0x4e8   : > { %v4361_v5 = vpop.f32.mrb[164].mxu1 }
 0x4e9   : > { %v11153_v3 = vadd.f32 %v4361_v5, %v11027_v27  ;;  %v7530_v13 = vpop.f32.mrb[165].mxu1 }
 0x4ea   : > { %v4364_v24 = vpop.f32.mrb[166].mxu1 }
 0x4eb   : > { %v11156_v59 = vadd.f32 %v4364_v24, %v11033_v6  ;;  %v7531_v2 = vpop.f32.mrb[167].mxu1 }
 0x4ed   : > { %7745 = vmatmul.mubr.bf16.gmra.mrb[16].mxu1 %v10396_v16 }
 0x4ee   : > { %7748 = vmatprep.mubr.msk.bf16.mxu1 %vm8426_vm6, %v11749_v52 }
 0x4f0   : > { %v4369_v0 = vpop.f32.mrb[168].mxu1 }
 0x4f1   : > { %v11162_v54 = vadd.f32 %v4369_v0, %v11044_v36  ;;  %v7534_v25 = vpop.f32.mrb[169].mxu1 }
 0x4f2   : > { %v4372_v1 = vpop.f32.mrb[170].mxu1 }
 0x4f3   : > { %v11165_v27 = vadd.f32 %v4372_v1, %v11050_v48  ;;  %v7535_v44 = vpop.f32.mrb[171].mxu1 }
 0x4f5   : > { %7749 = vmatmul.mubr.bf16.gmra.mrb[20].mxu1 %v10403_v29 }
 0x4f6   : > { %7752 = vmatprep.mubr.msk.bf16.mxu1 %vm8426_vm6, %v11749_v52 }
 0x4f8   : > { %v4377_v6 = vpop.f32.mrb[172].mxu1 }
 0x4f9   : > { %v11171_v16 = vadd.f32 %v4377_v6, %v11061_v28  ;;  %v7538_v38 = vpop.f32.mrb[173].mxu1 }
 0x4fa   : > { %v4380_v22 = vpop.f32.mrb[174].mxu1 }
 0x4fb   : > { %v11174_v36 = vadd.f32 %v4380_v22, %v11067_v33  ;;  %v7539_v42 = vpop.f32.mrb[175].mxu1 }
 0x4fd   : > { %7753 = vmatmul.mubr.bf16.gmra.mrb[24].mxu1 %v10414_v18 }
 0x4fe   : > { %7756 = vmatprep.mubr.msk.bf16.mxu1 %vm8426_vm6, %v11749_v52 }
 0x500   : > { %v4385_v48 = vpop.f32.mrb[176].mxu1 }
 0x501   : > { %v11180_v29 = vadd.f32 %v4385_v48, %v11078_v43  ;;  %v7542_v14 = vpop.f32.mrb[177].mxu1  ;;  %v8317_v48 = vld [vmem:[%s10971_s29 + $0x18] sm:$0xff]  }
 0x502   : > { %v4388_v19 = vpop.f32.mrb[178].mxu1 }
 0x503   : > { %v11183_v28 = vadd.f32 %v4388_v19, %v11081_v21  ;;  %v7543_v51 = vpop.f32.mrb[179].mxu1 }
 0x505   : > { %7757 = vmatmul.mubr.bf16.gmra.mrb[28].mxu1 %v10421_v23 }
 0x506   : > { %7760 = vmatprep.mubr.msk.bf16.mxu1 %vm8426_vm6, %v11749_v52 }
 0x508   : > { %v4561_v33 = vpop.f32.mrb[180].mxu1 }
 0x509   : > { %v11189_v18 = vadd.f32 %v4561_v33, %v11088_v47  ;;  %v7562_v55 = vpop.f32.mrb[181].mxu1 }
 0x50a   : > { %v4564_v34 = vpop.f32.mrb[182].mxu1 }
 0x50b   : > { %v11192_v43 = vadd.f32 %v4564_v34, %v11091_v17  ;;  %v7563_v20 = vpop.f32.mrb[183].mxu1 }
 0x50d   : > { %7761 = vmatmul.mubr.bf16.gmra.mrb[32].mxu1 %v10437_v63 }
 0x50e   : > { %7764 = vmatprep.mubr.msk.bf16.mxu1 %vm8426_vm6, %v11749_v52 }
 0x510   : > { %v4569_v21 = vpop.f32.mrb[184].mxu1 }
 0x511   : > { %v11198_v23 = vadd.f32 %v4569_v21, %v11097_v57  ;;  %v7566_v4 = vpop.f32.mrb[185].mxu1 }
 0x512   : > { %v4572_v15 = vpop.f32.mrb[186].mxu1 }
 0x513   : > { %v11201_v47 = vadd.f32 %v4572_v15, %v11100_v49  ;;  %v7567_v9 = vpop.f32.mrb[187].mxu1 }
 0x515   : > { %7765 = vmatmul.mubr.bf16.gmra.mrb[36].mxu1 %v10445_v31 }
 0x516   : > { %7768 = vmatprep.mubr.msk.bf16.mxu1 %vm8426_vm6, %v11749_v52 }
 0x518   : > { %v4577_v17 = vpop.f32.mrb[188].mxu1 }
 0x519   : > { %v11207_v63 = vadd.f32 %v4577_v17, %v11106_v26  ;;  %v7570_v53 = vpop.f32.mrb[189].mxu1 }
 0x51a   : > { %v4580_v5 = vpop.f32.mrb[190].mxu1 }
 0x51b   : > { %v11210_v57 = vadd.f32 %v4580_v5, %v11109_v61  ;;  %v7571_v13 = vpop.f32.mrb[191].mxu1 }
 0x51d   : > { %7769 = vmatmul.mubr.bf16.gmra.mrb[40].mxu1 %v10452_v46 }
 0x51e   : > { %7772 = vmatprep.mubr.msk.bf16.mxu1 %vm8426_vm6, %v11749_v52 }
 0x520   : > { %v4585_v49 = vpop.f32.mrb[192].mxu1 }
 0x521   : > { %v11216_v31 = vadd.f32 %v4585_v49, %v11115_v60  ;;  %v7574_v24 = vpop.f32.mrb[193].mxu1 }
 0x522   : > { %v4588_v2 = vpop.f32.mrb[194].mxu1 }
 0x523   : > { %v11219_v26 = vadd.f32 %v4588_v2, %v11118_v11  ;;  %v7575_v0 = vpop.f32.mrb[195].mxu1 }
 0x525   : > { %7773 = vmatmul.mubr.bf16.gmra.mrb[44].mxu1 %v10457_v12 }
 0x526   : > { %7776 = vmatprep.mubr.msk.bf16.mxu1 %vm8426_vm6, %v11749_v52 }
 0x528   : > { %v4593_v61 = vpop.f32.mrb[196].mxu1 }
 0x529   : > { %v11225_v46 = vadd.f32 %v4593_v61, %v11124_v40  ;;  %v7578_v25 = vpop.f32.mrb[197].mxu1 }
 0x52a   : > { %v4596_v1 = vpop.f32.mrb[198].mxu1 }
 0x52b   : > { %v11228_v60 = vadd.f32 %v4596_v1, %v11127_v41  ;;  %v7579_v44 = vpop.f32.mrb[199].mxu1 }
 0x52d   : > { %7777 = vmatmul.mubr.bf16.gmra.mrb[48].mxu1 %v10460_v58 }
 0x52e   : > { %7780 = vmatprep.mubr.msk.bf16.mxu1 %vm8426_vm6, %v11749_v52 }
 0x530   : > { %v4601_v12 = vpop.f32.mrb[200].mxu1 }
 0x531   : > { %v11234_v11 = vadd.f32 %v4601_v12, %v11133_v32  ;;  %v7582_v6 = vpop.f32.mrb[201].mxu1 }
 0x532   : > { %v4604_v38 = vpop.f32.mrb[202].mxu1 }
 0x533   : > { %v11237_v40 = vadd.f32 %v4604_v38, %v11136_v50  ;;  %v7583_v22 = vpop.f32.mrb[203].mxu1 }
 0x535   : > { %7781 = vmatmul.mubr.bf16.gmra.mrb[52].mxu1 %v10463_v37 }
 0x536   : > { %7858 = vmatprep.mubr.msk.bf16.mxu1 %vm8426_vm6, %v11749_v52 }
 0x538   : > { %v4609_v58 = vpop.f32.mrb[204].mxu1 }
 0x539   : > { %v11243_v41 = vadd.f32 %v4609_v58, %v11143_v45  ;;  %v7586_v42 = vpop.f32.mrb[205].mxu1  ;;  %v8318_v45 = vld [vmem:[%s10971_s29 + $0x20] sm:$0xff]  }
 0x53a   : > { %v4612_v32 = vpop.f32.mrb[206].mxu1 }
 0x53b   : > { %v11247_v14 = vadd.f32 %v4612_v32, %v11146_v7  ;;  %v7587_v19 = vpop.f32.mrb[207].mxu1 }
 0x53d   : > { %7859 = vmatmul.mubr.msk.bf16.vlgmr.msra.gmra.mrb[56].mxu1 %vm560_vm2, %v8317_v48  ;;  %v11259_v7 = vpop.f32.mrb[116].mxu0 }
 0x53e   : > { %7862 = vmatprep.mubr.msk.bf16.mxu1 %vm8426_vm6, %v11749_v52  ;;  %v7848_v20 = vpop.f32.mrb[117].mxu0 }
 0x53f   : > { %v11264_v21 = vpop.f32.mrb[118].mxu0 }
 0x540   : > { %v4617_v37 = vpop.f32.mrb[208].mxu1  ;;  %v7849_v4 = vpop.f32.mrb[119].mxu0 }
 0x541   : > { %v11253_v50 = vadd.f32 %v4617_v37, %v11153_v3  ;;  %v7590_v51 = vpop.f32.mrb[209].mxu1  ;;  %v11896_v4 = vld [vmem:[#allocation11_spill] sm:$0xff] }
 0x542   : > { %v4620_v33 = vpop.f32.mrb[210].mxu1 }
 0x543   : > { %v11257_v55 = vadd.f32 %v4620_v33, %v11156_v59  ;;  %v7591_v34 = vpop.f32.mrb[211].mxu1  ;;  %v8319_v59 = vld [vmem:[%s10971_s29 + $0x28] sm:$0xff]   ;;  %v8322_v33 = vld [vmem:[%s10971_s29 + $0x40] sm:$0xff]  }
 0x545   : > { %7863 = vmatmul.mubr.msk.bf16.gmra.mrb[60].mxu1 %vm560_vm2, %v8318_v45  ;;  %v11273_v13 = vpop.f32.mrb[120].mxu0 }
 0x546   : > { %7866 = vmatprep.mubr.msk.bf16.mxu1 %vm8426_vm6, %v11749_v52  ;;  %v7852_v49 = vpop.f32.mrb[121].mxu0 }
 0x547   : > { %v11278_v24 = vpop.f32.mrb[122].mxu0 }
 0x548   : > { %v4625_v3 = vpop.f32.mrb[212].mxu1  ;;  %v7853_v2 = vpop.f32.mrb[123].mxu0 }
 0x549   : > { %v11267_v15 = vadd.f32 %v4625_v3, %v11162_v54  ;;  %v7594_v9 = vpop.f32.mrb[213].mxu1 }
 0x54a   : > { %v4628_v17 = vpop.f32.mrb[214].mxu1 }
 0x54b   : > { %v11271_v53 = vadd.f32 %v4628_v17, %v11165_v27  ;;  %v7595_v5 = vpop.f32.mrb[215].mxu1  ;;  %v8320_v27 = vld [vmem:[%s10971_s29 + $0x30] sm:$0xff]  }
 0x54c   : > { %v8323_v5 = vld [vmem:[%s10971_s29 + $0x48] sm:$0xff]  }
 0x54d   : > { %7867 = vmatmul.mubr.msk.bf16.gmra.mrb[64].mxu1 %vm560_vm2, %v8319_v59  ;;  %v11287_v12 = vpop.f32.mrb[124].mxu0 }
 0x54e   : > { %7870 = vmatprep.mubr.msk.bf16.mxu1 %vm8426_vm6, %v11749_v52  ;;  %v7856_v6 = vpop.f32.mrb[125].mxu0 }
 0x54f   : > { %v11292_v38 = vpop.f32.mrb[126].mxu0 }
 0x550   : > { %v4633_v54 = vpop.f32.mrb[216].mxu1 }
 0x551   : > { %v11281_v0 = vadd.f32 %v4633_v54, %v11171_v16  ;;  %v7598_v61 = vpop.f32.mrb[217].mxu1  ;;  %v7857_v16 = vpop.f32.mrb[127].mxu0  ;;  %v11898_v54 = vld [vmem:[#allocation12_spill] sm:$0xff] }
 0x552   : > { %v4636_v25 = vpop.f32.mrb[218].mxu1  ;;  %v8324_v16 = vld [vmem:[%s10971_s29 + $0x50] sm:$0xff]  }
 0x553   : > { %v11285_v1 = vadd.f32 %v4636_v25, %v11174_v36  ;;  %v7599_v44 = vpop.f32.mrb[219].mxu1  ;;  %v8321_v36 = vld [vmem:[%s10971_s29 + $0x38] sm:$0xff]   ;;  %s402_s29 = sand.u32 1, %s8399_s18  }
 0x554   : > { %s8125_s22 = smul.u32 176, %s402_s29  ;;  %s11587_s16 = scalar_lea.sflag [#allocation4], %s402_s29 }
 0x555   : > { %7871 = vmatmul.mubr.msk.bf16.gmra.mrb[68].mxu1 %vm560_vm2, %v8320_v27  ;;  %v11899_v27 = vld [vmem:[#allocation15_spill] sm:$0xff] }
 0x556   : > { %7874 = vmatprep.mubr.msk.bf16.mxu1 %vm8426_vm6, %v11749_v52  ;;  %s11426_s26 = scalar_lea.vmem [#allocation3], %s8125_s22  ;;  %s8428_s22 = smov [#allocation3]  }
 0x557   : > { %s6178_s20 = sshll.u32 %s11426_s26, 4  ;;  %s8333_s13 = sshll.u32 %s8428_s22, 4  ;;  %s11576_s20 = int_to_ptr.vmem [resolvable:$true] %s6178_s20  ;;  %s8334_s13 = int_to_ptr.vmem [resolvable:$false] %s8333_s13 }
 0x558   : > { %v4641_v22 = vpop.f32.mrb[220].mxu1  ;;  %s8329_s28 = scalar_lea.vmem %s11576_s20, 2816  ;;  %s8335_s27 = scalar_lea.vmem %s8334_s13, 5632 }
 0x559   : > { %v11295_v58 = vadd.f32 %v4641_v22, %v11180_v29  ;;  %v7602_v42 = vpop.f32.mrb[221].mxu1  ;;  %p8330_p13 = scmp.ne.s32.totalorder %s11576_s20, %s8329_s28  ;;  %p8336_p2 = scmp.lt.s32.totalorder %s11576_s20, %s8334_s13 }
 0x55a   : > { %v4644_v48 = vpop.f32.mrb[222].mxu1  ;;  %p8337_p4 = scmp.lt.s32.totalorder %s8335_s27, %s8329_s28 }
 0x55b   : > { %v11299_v32 = vadd.f32 %v4644_v48, %v11183_v28  ;;  %v7603_v19 = vpop.f32.mrb[223].mxu1  ;;  %v11897_v28 = vld [vmem:[#allocation13_spill] sm:$0xff]  ;;  %p8331_p0 = pnand %p8330_p13, %p8542_p3 }
 0x55c   : > { %v11901_v19 = vld [vmem:[#allocation16_spill] sm:$0xff]  ;;  %p8338_p5 = por %p8337_p4, %p8336_p2 }
 0x55d   : > { %7875 = vmatmul.mubr.msk.bf16.gmra.mrb[72].mxu1 %vm560_vm2, %v8321_v36  ;;  %v11900_v36 = vld [vmem:[#allocation14_spill] sm:$0xff]  ;;  %p8332_p1 = pneg %p8331_p0 }
 0x55e   : > { %7878 = vmatprep.mubr.msk.bf16.mxu1 %vm8426_vm6, %v11749_v52 }
 0x55f   : > { %p8339_p6 = pnand %p8338_p5, %p8332_p1 }
 0x560   : > { %v4839_v37 = vpop.f32.mrb[224].mxu1 }
 0x561   : > { %v4926_v51 = vadd.f32 %v4839_v37, %v11189_v18  ;;  %v7622_v45 = vpop.f32.mrb[225].mxu1 }
 0x562   : > { %v4842_v29 = vpop.f32.mrb[226].mxu1 }
 0x563   : > { %v4927_v34 = vadd.f32 %v4842_v29, %v11192_v43  ;;  %v7623_v20 = vpop.f32.mrb[227].mxu1  ;;  %v11308_v3 = vadd.f32 %v11896_v4, %v4926_v51 }
 0x565   : > { %7879 = vmatmul.mubr.msk.bf16.gmra.mrb[76].mxu1 %vm560_vm2, %v8322_v33  ;;  %v11312_v9 = vadd.f32 %v11897_v28, %v4927_v34  ;;  %v11902_v34 = vld [vmem:[#allocation17_spill] sm:$0xff] }
 0x566   : > { %7882 = vmatprep.mubr.msk.bf16.mxu1 %vm8426_vm6, %v11749_v52 }
 0x568   : > { %v4847_v59 = vpop.f32.mrb[228].mxu1 }
 0x569   : > { %v4928_v18 = vadd.f32 %v4847_v59, %v11198_v23  ;;  %v7626_v17 = vpop.f32.mrb[229].mxu1 }
 0x56a   : > { %v4850_v49 = vpop.f32.mrb[230].mxu1 }
 0x56b   : > { %v4929_v43 = vadd.f32 %v4850_v49, %v11201_v47  ;;  %v7627_v2 = vpop.f32.mrb[231].mxu1  ;;  %v11320_v61 = vadd.f32 %v11898_v54, %v4928_v18 }
 0x56c   : > { %v11905_v2 = vld [vmem:[#allocation20_spill] sm:$0xff] }
 0x56d   : > { %7883 = vmatmul.mubr.msk.bf16.gmra.mrb[80].mxu1 %vm560_vm2, %v8323_v5  ;;  %v11324_v25 = vadd.f32 %v11899_v27, %v4929_v43 }
 0x56e   : > { %7886 = vmatprep.mubr.msk.bf16.mxu1 %vm8426_vm6, %v11749_v52 }
 0x570   : > { %v4855_v44 = vpop.f32.mrb[232].mxu1 }
 0x571   : > { %v4930_v23 = vadd.f32 %v4855_v44, %v11207_v63  ;;  %v7630_v6 = vpop.f32.mrb[233].mxu1 }
 0x572   : > { %v4858_v22 = vpop.f32.mrb[234].mxu1 }
 0x573   : > { %v4931_v47 = vadd.f32 %v4858_v22, %v11210_v57  ;;  %v7631_v42 = vpop.f32.mrb[235].mxu1  ;;  %v11332_v48 = vadd.f32 %v11900_v36, %v4930_v23  ;;  %v11903_v57 = vld [vmem:[#allocation18_spill] sm:$0xff] }
 0x575   : > { %7887 = vmatmul.mubr.msk.bf16.gmra.mrb[84].mxu1 %vm560_vm2, %v8324_v16  ;;  %v11336_v37 = vadd.f32 %v11901_v19, %v4931_v47  ;;  %v11907_v47 = vld [vmem:[#allocation22_spill] sm:$0xff] }
 0x578   : > { %v4863_v51 = vpop.f32.mrb[236].mxu1 }
 0x579   : > { %v4932_v52 = vadd.f32 %v4863_v51, %v11216_v31  ;;  %v7634_v45 = vpop.f32.mrb[237].mxu1  ;;  %v11904_v31 = vld [vmem:[#allocation19_spill] sm:$0xff] }
 0x57a   : > { %v4866_v33 = vpop.f32.mrb[238].mxu1 }
 0x57b   : > { %v4933_v63 = vadd.f32 %v4866_v33, %v11219_v26  ;;  %v7635_v29 = vpop.f32.mrb[239].mxu1  ;;  %v11341_v20 = vadd.f32 %v11902_v34, %v4932_v52 }
 0x57d   : > { %v11344_v4 = vadd.f32 %v11903_v57, %v4933_v63  ;;  %v11909_v63 = vld [vmem:[#allocation39_spill] sm:$0xff] }
 0x580   : > { %v4871_v28 = vpop.f32.mrb[240].mxu1 }
 0x581   : > { %v4934_v59 = vadd.f32 %v4871_v28, %v11225_v46  ;;  %v7638_v18 = vpop.f32.mrb[241].mxu1  ;;  %v11906_v46 = vld [vmem:[#allocation21_spill] sm:$0xff] }
 0x582   : > { %v4874_v17 = vpop.f32.mrb[242].mxu1 }
 0x583   : > { %v4935_v5 = vadd.f32 %v4874_v17, %v11228_v60  ;;  %v7639_v49 = vpop.f32.mrb[243].mxu1  ;;  %v11349_v43 = vadd.f32 %v11904_v31, %v4934_v59 }
 0x585   : > { %v11352_v26 = vadd.f32 %v11905_v2, %v4935_v5  ;;  %v11911_v5 = vld [vmem:[#allocation25_spill] sm:$0xff] }
 0x588   : > { %v4879_v54 = vpop.f32.mrb[244].mxu1 }
 0x589   : > { %v4936_v27 = vadd.f32 %v4879_v54, %v11234_v11  ;;  %v7642_v44 = vpop.f32.mrb[245].mxu1  ;;  %v11908_v11 = vld [vmem:[#allocation38_spill] sm:$0xff] }
 0x58a   : > { %v4882_v23 = vpop.f32.mrb[246].mxu1 }
 0x58b   : > { %v4937_v6 = vadd.f32 %v4882_v23, %v11237_v40  ;;  %v7643_v16 = vpop.f32.mrb[247].mxu1  ;;  %v11357_v22 = vadd.f32 %v11906_v46, %v4936_v27 }
 0x58d   : > { %v11360_v60 = vadd.f32 %v11907_v47, %v4937_v6  ;;  %v11913_v6 = vld [vmem:[#allocation42_spill] sm:$0xff] }
 0x590   : > { %v4887_v42 = vpop.f32.mrb[248].mxu1 }
 0x591   : > { %v4938_v36 = vadd.f32 %v4887_v42, %v11243_v41  ;;  %v7646_v19 = vpop.f32.mrb[249].mxu1  ;;  %v11910_v41 = vld [vmem:[#allocation40_spill] sm:$0xff] }
 0x592   : > { %v4890_v51 = vpop.f32.mrb[250].mxu1  ;;  %v11914_v19 = vld [vmem:[#allocation43_spill] sm:$0xff] }
 0x593   : > { %v4939_v52 = vadd.f32 %v4890_v51, %v11247_v14  ;;  %v7647_v45 = vpop.f32.mrb[251].mxu1  ;;  %v11365_v33 = vadd.f32 %v11908_v11, %v4938_v36 }
 0x595   : > { %v11368_v40 = vadd.f32 %v11909_v63, %v4939_v52 }
 0x598   : > { %v4895_v29 = vpop.f32.mrb[252].mxu1 }
 0x599   : > { %v4940_v34 = vadd.f32 %v4895_v29, %v11253_v50  ;;  %v7650_v57 = vpop.f32.mrb[253].mxu1  ;;  %v11912_v50 = vld [vmem:[#allocation41_spill] sm:$0xff] }
 0x59a   : > { %v4898_v28 = vpop.f32.mrb[254].mxu1 }
 0x59b   : > { %v4941_v59 = vadd.f32 %v4898_v28, %v11257_v55  ;;  %v7651_v18 = vpop.f32.mrb[255].mxu1  ;;  %v11373_v17 = vadd.f32 %v11910_v41, %v4940_v34 }
 0x59d   : > { %v11376_v14 = vadd.f32 %v11911_v5, %v4941_v59 }
 0x5a0   : > { %v4903_v49 = vpop.f32.mrb[0].mxu1 }
 0x5a1   : > { %v4942_v31 = vadd.f32 %v4903_v49, %v11267_v15  ;;  %v7654_v2 = vpop.f32.mrb[1].mxu1 }
 0x5a2   : > { %v4906_v54 = vpop.f32.mrb[2].mxu1 }
 0x5a3   : > { %v4943_v27 = vadd.f32 %v4906_v54, %v11271_v53  ;;  %v7655_v44 = vpop.f32.mrb[3].mxu1  ;;  %v11381_v23 = vadd.f32 %v11912_v50, %v4942_v31  ;;  %v11915_v53 = vld [vmem:[#allocation44_spill] sm:$0xff]  ;;  %v11918_v54 = vld [vmem:[#allocation47_spill] sm:$0xff] }
 0x5a5   : > { %v11384_v55 = vadd.f32 %v11913_v6, %v4943_v27 }
 0x5a8   : > { %v4911_v16 = vpop.f32.mrb[4].mxu1 }
 0x5a9   : > { %v4944_v46 = vadd.f32 %v4911_v16, %v11281_v0  ;;  %v7658_v47 = vpop.f32.mrb[5].mxu1 }
 0x5aa   : > { %v4914_v42 = vpop.f32.mrb[6].mxu1 }
 0x5ab   : > { %v4945_v36 = vadd.f32 %v4914_v42, %v11285_v1  ;;  %v7659_v15 = vpop.f32.mrb[7].mxu1  ;;  %v11389_v51 = vadd.f32 %v11914_v19, %v4944_v46  ;;  %v11916_v1 = vld [vmem:[#allocation45_spill] sm:$0xff]  ;;  %v11919_v19 = vld [vmem:[#allocation48_spill] sm:$0xff] }
 0x5ad   : > { %v11392_v52 = vadd.f32 %v11915_v53, %v4945_v36 }
 0x5b0   : > { %v4919_v45 = vpop.f32.mrb[8].mxu1 }
 0x5b1   : > { %v4946_v11 = vadd.f32 %v4919_v45, %v11295_v58  ;;  %v7662_v63 = vpop.f32.mrb[9].mxu1  ;;  %v11407_v58 = vld [vmem:[%s11647_s8] ss:$0 sm:$0xff] }
 0x5b2   : > { %v4922_v29 = vpop.f32.mrb[10].mxu1  ;;  %v11920_v63 = vld [vmem:[#allocation23_spill] sm:$0xff] }
 0x5b3   : > { %v4947_v0 = vadd.f32 %v4922_v29, %v11299_v32  ;;  %v7663_v34 = vpop.f32.mrb[11].mxu1  ;;  %v11397_v57 = vadd.f32 %v10741_v62, %v4946_v11  ;;  %v11412_v32 = vld [vmem:[%s11649_s10] ss:$0 sm:$0xff]  ;;  %v11917_v62 = vld [vmem:[#allocation46_spill] sm:$0xff] }
 0x5b4   : > { %v6032_v44 = vadd.f32 %v11412_v32, %v11259_v7  ;;  %v6035_v16 = vadd.f32 %v11412_v32, %v11264_v21  ;;  %v6040_v29 = vadd.f32 %v11412_v32, %v11273_v13 }
 0x5b5   : > { %v11400_v28 = vadd.f32 %v11916_v1, %v4947_v0  ;;  %v6043_v1 = vadd.f32 %v11412_v32, %v11278_v24 }
 0x5b8   : > { %v5433_v59 = vpop.f32.mrb[12].mxu1 }
 0x5b9   : > { %v5520_v18 = vadd.f32 %v5433_v59, %v11308_v3  ;;  %v7742_v41 = vpop.f32.mrb[13].mxu1 }
 0x5ba   : > { %v5436_v5 = vpop.f32.mrb[14].mxu1 }
 0x5bb   : > { %v5798_v49 = vadd.f32 %v11917_v62, %v5520_v18  ;;  %v5521_v31 = vadd.f32 %v5436_v5, %v11312_v9  ;;  %v7743_v2 = vpop.f32.mrb[15].mxu1 }
 0x5bd   : > { %v5827_v3 = vadd.f32 %v11407_v58, %v5798_v49  ;;  %v5799_v27 = vadd.f32 %v11918_v54, %v5521_v31  ;;  %v11921_v49 = vld [vmem:[#allocation49_spill] sm:$0xff] }
 0x5bf   : > { %v5828_v50 = vadd.f32 %v11407_v58, %v5799_v27  ;;  %v5849_v6 = vmax.f32 %v5827_v3, 0.0  ;;  %v11922_v27 = vld [vmem:[#allocation24_spill] sm:$0xff] }
 0x5c0   : > { %v5441_v46 = vpop.f32.mrb[16].mxu1 }
 0x5c1   : > { %v6118_v47 = vadd.f32 %v6032_v44, %v5849_v6  ;;  %v5522_v9 = vadd.f32 %v5441_v46, %v11320_v61  ;;  %v5850_v42 = vmax.f32 %v5828_v50, 0.0  ;;  %v7746_v36 = vpop.f32.mrb[17].mxu1  ;;  %v6051_v6 = vadd.f32 %v11412_v32, %v11292_v38 }
 0x5c2   : > { %v5444_v15 = vpop.f32.mrb[18].mxu1 }
 0x5c3   : > { %6140 = vst [vmem:[%s11426_s26] sm:$0xff] %v6118_v47  ;;  %v5800_v7 = vadd.f32 %v11919_v19, %v5522_v9  ;;  %v6119_v53 = vadd.f32 %v6035_v16, %v5850_v42  ;;  %v5523_v45 = vadd.f32 %v5444_v15, %v11324_v25  ;;  %v7747_v11 = vpop.f32.mrb[19].mxu1 }
 0x5c5   : > { %v5829_v21 = vadd.f32 %v11407_v58, %v5800_v7  ;;  %6141 = vst [vmem:[%s11426_s26 + $0x8] sm:$0xff] %v6119_v53  ;;  %v5801_v61 = vadd.f32 %v11920_v63, %v5523_v45 }
 0x5c7   : > { %v5830_v0 = vadd.f32 %v11407_v58, %v5801_v61  ;;  %v5851_v34 = vmax.f32 %v5829_v21, 0.0 }
 0x5c8   : > { %v5449_v59 = vpop.f32.mrb[20].mxu1 }
 0x5c9   : > { %v6120_v18 = vadd.f32 %v6040_v29, %v5851_v34  ;;  %v5524_v25 = vadd.f32 %v5449_v59, %v11332_v48  ;;  %v5852_v41 = vmax.f32 %v5830_v0, 0.0  ;;  %v7750_v5 = vpop.f32.mrb[21].mxu1  ;;  %v6048_v48 = vadd.f32 %v11412_v32, %v11287_v12 }
 0x5ca   : > { %v5452_v62 = vpop.f32.mrb[22].mxu1  ;;  %v11924_v5 = vld [vmem:[#allocation26_spill] sm:$0xff] }
 0x5cb   : > { %6142 = vst [vmem:[%s11426_s26 + $0x10] sm:$0xff] %v6120_v18  ;;  %v5802_v31 = vadd.f32 %v11921_v49, %v5524_v25  ;;  %v6121_v2 = vadd.f32 %v6043_v1, %v5852_v41  ;;  %v5525_v13 = vadd.f32 %v5452_v62, %v11336_v37  ;;  %v7751_v3 = vpop.f32.mrb[23].mxu1  ;;  %v11923_v18 = vld [vmem:[#allocation28_spill] sm:$0xff] }
 0x5cc   : > { %v11926_v3 = vld [vmem:[#allocation29_spill] sm:$0xff] }
 0x5cd   : > { %v5831_v54 = vadd.f32 %v11407_v58, %v5802_v31  ;;  %6143 = vst [vmem:[%s11426_s26 + $0x18] sm:$0xff] %v6121_v2  ;;  %v5803_v24 = vadd.f32 %v11922_v27, %v5525_v13  ;;  %v11925_v31 = vld [vmem:[#allocation27_spill] sm:$0xff] }
 0x5cf   : > { %v5832_v44 = vadd.f32 %v11407_v58, %v5803_v24  ;;  %v5853_v50 = vmax.f32 %v5831_v54, 0.0 }
 0x5d0   : > { %v5457_v16 = vpop.f32.mrb[24].mxu1 }
 0x5d1   : > { %v6122_v46 = vadd.f32 %v6048_v48, %v5853_v50  ;;  %v5526_v37 = vadd.f32 %v5457_v16, %v11341_v20  ;;  %v5854_v47 = vmax.f32 %v5832_v44, 0.0  ;;  %v7754_v9 = vpop.f32.mrb[25].mxu1  ;;  %v11927_v44 = vld [vmem:[#allocation50_spill] sm:$0xff] }
 0x5d2   : > { %v5460_v42 = vpop.f32.mrb[26].mxu1  ;;  %v11928_v16 = vld [vmem:[#allocation30_spill] sm:$0xff] }
 0x5d3   : > { %6144 = vst [vmem:[%s11426_s26 + $0x20] sm:$0xff] %v6122_v46  ;;  %v5804_v36 = vadd.f32 %v10811_v30, %v5526_v37  ;;  %v6123_v15 = vadd.f32 %v6051_v6, %v5854_v47  ;;  %v5527_v19 = vadd.f32 %v5460_v42, %v11344_v4  ;;  %v7755_v12 = vpop.f32.mrb[27].mxu1  ;;  %v11929_v42 = vld [vmem:[#allocation51_spill] sm:$0xff] }
 0x5d4   : > { %v11930_v12 = vld [vmem:[#allocation31_spill] sm:$0xff] }
 0x5d5   : > { %6145 = vst [vmem:[%s11426_s26 + $0x28] sm:$0xff] %v6123_v15  ;;  %v5805_v7 = vadd.f32 %v10814_v39, %v5527_v19 }
 0x5d8   : > { %v5465_v53 = vpop.f32.mrb[28].mxu1 }
 0x5d9   : > { %v5528_v38 = vadd.f32 %v5465_v53, %v11349_v43  ;;  %v7758_v45 = vpop.f32.mrb[29].mxu1 }
 0x5da   : > { %v5468_v11 = vpop.f32.mrb[30].mxu1 }
 0x5db   : > { %v11459_v20 = vadd.f32 %v10824_v56, %v5528_v38  ;;  %v5529_v21 = vadd.f32 %v5468_v11, %v11352_v26  ;;  %v7759_v63 = vpop.f32.mrb[31].mxu1 }
 0x5dd   : > { %v11463_v30 = vadd.f32 %v10827_v8, %v5529_v21  ;;  %v11931_v21 = vld [vmem:[#allocation52_spill] sm:$0xff] }
 0x5e0   : > { %v5473_v61 = vpop.f32.mrb[32].mxu1 }
 0x5e1   : > { %v5530_v4 = vadd.f32 %v5473_v61, %v11357_v22  ;;  %v7762_v29 = vpop.f32.mrb[33].mxu1 }
 0x5e2   : > { %v5476_v0 = vpop.f32.mrb[34].mxu1  ;;  %v11932_v29 = vld [vmem:[#allocation32_spill] sm:$0xff] }
 0x5e3   : > { %v11467_v39 = vadd.f32 %v10841_v35, %v5530_v4  ;;  %v5531_v43 = vadd.f32 %v5476_v0, %v11360_v60  ;;  %v7763_v34 = vpop.f32.mrb[35].mxu1  ;;  %v5833_v4 = vadd.f32 %v11407_v58, %v5804_v36  ;;  %v5834_v0 = vadd.f32 %v11407_v58, %v5805_v7 }
 0x5e4   : > { %v5835_v36 = vadd.f32 %v11407_v58, %v11459_v20  ;;  %v5836_v7 = vadd.f32 %v11407_v58, %v11463_v30 }
 0x5e5   : > { %v11471_v56 = vadd.f32 %v10846_v10, %v5531_v43  ;;  %v5855_v34 = vmax.f32 %v5833_v4, 0.0  ;;  %v5837_v20 = vadd.f32 %v11407_v58, %v11467_v39 }
 0x5e7   : > { %v5838_v30 = vadd.f32 %v11407_v58, %v11471_v56 }
 0x5e8   : > { %v5481_v1 = vpop.f32.mrb[36].mxu1 }
 0x5e9   : > { %v5532_v26 = vadd.f32 %v5481_v1, %v11365_v33  ;;  %v7766_v59 = vpop.f32.mrb[37].mxu1 }
 0x5ea   : > { %v5484_v8 = vpop.f32.mrb[38].mxu1 }
 0x5eb   : > { %v11475_v25 = vadd.f32 %v11923_v18, %v5532_v26  ;;  %v5533_v22 = vadd.f32 %v5484_v8, %v11368_v40  ;;  %v7767_v41 = vpop.f32.mrb[39].mxu1  ;;  %v5856_v8 = vmax.f32 %v5834_v0, 0.0 }
 0x5ed   : > { %v11479_v35 = vadd.f32 %v11924_v5, %v5533_v22  ;;  %v5857_v5 = vmax.f32 %v5835_v36, 0.0  ;;  %v5839_v39 = vadd.f32 %v11407_v58, %v11475_v25 }
 0x5ef   : > { %v5840_v56 = vadd.f32 %v11407_v58, %v11479_v35 }
 0x5f0   : > { %v5489_v62 = vpop.f32.mrb[40].mxu1 }
 0x5f1   : > { %v5534_v60 = vadd.f32 %v5489_v62, %v11373_v17  ;;  %v7770_v49 = vpop.f32.mrb[41].mxu1 }
 0x5f2   : > { %v5492_v10 = vpop.f32.mrb[42].mxu1 }
 0x5f3   : > { %v11483_v2 = vadd.f32 %v11925_v31, %v5534_v60  ;;  %v5535_v33 = vadd.f32 %v5492_v10, %v11376_v14  ;;  %v7771_v13 = vpop.f32.mrb[43].mxu1  ;;  %v5858_v31 = vmax.f32 %v5836_v7, 0.0 }
 0x5f5   : > { %v11487_v54 = vadd.f32 %v11926_v3, %v5535_v33  ;;  %v5841_v25 = vadd.f32 %v11407_v58, %v11483_v2 }
 0x5f7   : > { %v5842_v35 = vadd.f32 %v11407_v58, %v11487_v54 }
 0x5f8   : > { %v5497_v27 = vpop.f32.mrb[44].mxu1 }
 0x5f9   : > { %v5536_v40 = vadd.f32 %v5497_v27, %v11381_v23  ;;  %v7774_v24 = vpop.f32.mrb[45].mxu1 }
 0x5fa   : > { %v5500_v48 = vpop.f32.mrb[46].mxu1 }
 0x5fb   : > { %v11491_v50 = vadd.f32 %v11927_v44, %v5536_v40  ;;  %v5537_v17 = vadd.f32 %v5500_v48, %v11384_v55  ;;  %v7775_v6 = vpop.f32.mrb[47].mxu1  ;;  %v5859_v40 = vmax.f32 %v5837_v20, 0.0 }
 0x5fc   : > { %v5860_v6 = vmax.f32 %v5838_v30, 0.0 }
 0x5fd   : > { %v11495_v46 = vadd.f32 %v11928_v16, %v5537_v17  ;;  %v5843_v2 = vadd.f32 %v11407_v58, %v11491_v50 }
 0x5ff   : > { %v5844_v54 = vadd.f32 %v11407_v58, %v11495_v46 }
 0x600   : > { %v5505_v37 = vpop.f32.mrb[48].mxu1 }
 0x601   : > { %v5538_v14 = vadd.f32 %v5505_v37, %v11389_v51  ;;  %v7778_v47 = vpop.f32.mrb[49].mxu1 }
 0x602   : > { %v5508_v9 = vpop.f32.mrb[50].mxu1 }
 0x603   : > { %v11499_v15 = vadd.f32 %v11929_v42, %v5538_v14  ;;  %v5539_v23 = vadd.f32 %v5508_v9, %v11392_v52  ;;  %v7779_v19 = vpop.f32.mrb[51].mxu1  ;;  %v5861_v9 = vmax.f32 %v5839_v39, 0.0 }
 0x605   : > { %v11503_v53 = vadd.f32 %v11930_v12, %v5539_v23  ;;  %v5845_v50 = vadd.f32 %v11407_v58, %v11499_v15 }
 0x608   : > { %v5513_v38 = vpop.f32.mrb[52].mxu1 }
 0x609   : > { %v5540_v55 = vadd.f32 %v5513_v38, %v11397_v57  ;;  %v7782_v45 = vpop.f32.mrb[53].mxu1  ;;  %v5862_v38 = vmax.f32 %v5840_v56, 0.0 }
 0x60a   : > { %v5516_v11 = vpop.f32.mrb[54].mxu1 }
 0x60b   : > { %v11507_v63 = vadd.f32 %v11931_v21, %v5540_v55  ;;  %v5541_v51 = vadd.f32 %v5516_v11, %v11400_v28  ;;  %v7783_v61 = vpop.f32.mrb[55].mxu1 }
 0x60d   : > { %v11512_v52 = vadd.f32 %v11932_v29, %v5541_v51  ;;  %v5863_v51 = vmax.f32 %v5841_v25, 0.0 }
 0x60f   : > { %v5848_v30 = vadd.f32 %v11407_v58, %v11512_v52 }
 0x610   : > { %v6055_v43 = vpop.f32.mrb[56].mxu1 }
 0x611   : > { %v6056_v57 = vadd.f32 %v11412_v32, %v6055_v43  ;;  %v7860_v1 = vpop.f32.mrb[57].mxu1  ;;  %v5864_v43 = vmax.f32 %v5842_v35, 0.0 }
 0x612   : > { %v6058_v26 = vpop.f32.mrb[58].mxu1 }
 0x613   : > { %v6124_v59 = vadd.f32 %v6056_v57, %v5855_v34  ;;  %v6059_v18 = vadd.f32 %v11412_v32, %v6058_v26  ;;  %v7861_v28 = vpop.f32.mrb[59].mxu1 }
 0x615   : > { %6146 = vst [vmem:[%s11426_s26 + $0x30] sm:$0xff] %v6124_v59  ;;  %v6125_v22 = vadd.f32 %v6059_v18, %v5856_v8  ;;  %v5865_v59 = vmax.f32 %v5843_v2, 0.0 }
 0x617   : > { %6147 = vst [vmem:[%s11426_s26 + $0x38] sm:$0xff] %v6125_v22  ;;  %v5866_v22 = vmax.f32 %v5844_v54, 0.0 }
 0x618   : > { %v6063_v41 = vpop.f32.mrb[60].mxu1 }
 0x619   : > { %v6064_v62 = vadd.f32 %v11412_v32, %v6063_v41  ;;  %v7864_v60 = vpop.f32.mrb[61].mxu1 }
 0x61a   : > { %v6066_v49 = vpop.f32.mrb[62].mxu1  ;;  %v5867_v60 = vmax.f32 %v5845_v50, 0.0 }
 0x61b   : > { %v6126_v10 = vadd.f32 %v6064_v62, %v5857_v5  ;;  %v6067_v33 = vadd.f32 %v11412_v32, %v6066_v49  ;;  %v7865_v13 = vpop.f32.mrb[63].mxu1  ;;  %v5846_v5 = vadd.f32 %v11407_v58, %v11503_v53 }
 0x61d   : > { %6148 = vst [vmem:[%s11426_s26 + $0x40] sm:$0xff] %v6126_v10  ;;  %v6127_v3 = vadd.f32 %v6067_v33, %v5858_v31  ;;  %v5868_v13 = vmax.f32 %v5846_v5, 0.0 }
 0x61f   : > { %6149 = vst [vmem:[%s11426_s26 + $0x48] sm:$0xff] %v6127_v3  ;;  %v5847_v3 = vadd.f32 %v11407_v58, %v11507_v63 }
 0x620   : > { %v6071_v27 = vpop.f32.mrb[64].mxu1 }
 0x621   : > { %v6072_v24 = vadd.f32 %v11412_v32, %v6071_v27  ;;  %v7868_v48 = vpop.f32.mrb[65].mxu1 }
 0x622   : > { %v6074_v44 = vpop.f32.mrb[66].mxu1 }
 0x623   : > { %v6128_v17 = vadd.f32 %v6072_v24, %v5859_v40  ;;  %v6075_v16 = vadd.f32 %v11412_v32, %v6074_v44  ;;  %v7869_v37 = vpop.f32.mrb[67].mxu1  ;;  %v5869_v40 = vmax.f32 %v5847_v3, 0.0 }
 0x625   : > { %6150 = vst [vmem:[%s11426_s26 + $0x50] sm:$0xff] %v6128_v17  ;;  %v6129_v14 = vadd.f32 %v6075_v16, %v5860_v6  ;;  %v5870_v17 = vmax.f32 %v5848_v30, 0.0 }
 0x627   : > { %6151 = vst [vmem:[%s11426_s26 + $0x58] sm:$0xff] %v6129_v14 }
 0x628   : > { %v6079_v47 = vpop.f32.mrb[68].mxu1 }
 0x629   : > { %v6080_v42 = vadd.f32 %v11412_v32, %v6079_v47  ;;  %v7872_v23 = vpop.f32.mrb[69].mxu1 }
 0x62a   : > { %v6082_v19 = vpop.f32.mrb[70].mxu1 }
 0x62b   : > { %v6130_v12 = vadd.f32 %v6080_v42, %v5861_v9  ;;  %v6083_v55 = vadd.f32 %v11412_v32, %v6082_v19  ;;  %v7873_v45 = vpop.f32.mrb[71].mxu1 }
 0x62d   : > { %6152 = vst [vmem:[%s11426_s26 + $0x60] sm:$0xff] %v6130_v12  ;;  %v6131_v11 = vadd.f32 %v6083_v55, %v5862_v38 }
 0x62f   : > { %6153 = vst [vmem:[%s11426_s26 + $0x68] sm:$0xff] %v6131_v11 }
 0x630   : > { %v6087_v21 = vpop.f32.mrb[72].mxu1 }
 0x631   : > { %v6088_v61 = vadd.f32 %v11412_v32, %v6087_v21  ;;  %v7876_v4 = vpop.f32.mrb[73].mxu1 }
 0x632   : > { %v6090_v29 = vpop.f32.mrb[74].mxu1 }
 0x633   : > { %v6132_v0 = vadd.f32 %v6088_v61, %v5863_v51  ;;  %v6091_v34 = vadd.f32 %v11412_v32, %v6090_v29  ;;  %v7877_v57 = vpop.f32.mrb[75].mxu1 }
 0x635   : > { %6154 = vst [vmem:[%s11426_s26 + $0x70] sm:$0xff] %v6132_v0  ;;  %v6133_v1 = vadd.f32 %v6091_v34, %v5864_v43 }
 0x637   : > { %6155 = vst [vmem:[%s11426_s26 + $0x78] sm:$0xff] %v6133_v1 }
 0x638   : > { %v6095_v26 = vpop.f32.mrb[76].mxu1 }
 0x639   : > { %v6096_v8 = vadd.f32 %v11412_v32, %v6095_v26  ;;  %v7880_v18 = vpop.f32.mrb[77].mxu1 }
 0x63a   : > { %v6098_v28 = vpop.f32.mrb[78].mxu1 }
 0x63b   : > { %v6134_v36 = vadd.f32 %v6096_v8, %v5865_v59  ;;  %v6099_v7 = vadd.f32 %v11412_v32, %v6098_v28  ;;  %v7881_v41 = vpop.f32.mrb[79].mxu1 }
 0x63d   : > { %6156 = vst [vmem:[%s11426_s26 + $0x80] sm:$0xff] %v6134_v36  ;;  %v6135_v46 = vadd.f32 %v6099_v7, %v5866_v22 }
 0x63f   : > { %6157 = vst [vmem:[%s11426_s26 + $0x88] sm:$0xff] %v6135_v46 }
 0x640   : > { %v6103_v62 = vpop.f32.mrb[80].mxu1 }
 0x641   : > { %v6104_v49 = vadd.f32 %v11412_v32, %v6103_v62  ;;  %v7884_v10 = vpop.f32.mrb[81].mxu1 }
 0x642   : > { %v6106_v31 = vpop.f32.mrb[82].mxu1 }
 0x643   : > { %v6136_v33 = vadd.f32 %v6104_v49, %v5867_v60  ;;  %v6107_v15 = vadd.f32 %v11412_v32, %v6106_v31  ;;  %v7885_v20 = vpop.f32.mrb[83].mxu1 }
 0x645   : > { %6158 = vst [vmem:[%s11426_s26 + $0x90] sm:$0xff] %v6136_v33  ;;  %v6137_v53 = vadd.f32 %v6107_v15, %v5868_v13 }
 0x647   : > { %6159 = vst [vmem:[%s11426_s26 + $0x98] sm:$0xff] %v6137_v53 }
 0x648   : > { %v6111_v27 = vpop.f32.mrb[84].mxu1 }
 0x649   : > { %v6112_v24 = vadd.f32 %v11412_v32, %v6111_v27  ;;  %v7888_v48 = vpop.f32.mrb[85].mxu1 }
 0x64a   : > { %v6114_v44 = vpop.f32.mrb[86].mxu1 }
 0x64b   : > { %v6138_v63 = vadd.f32 %v6112_v24, %v5869_v40  ;;  %v6115_v6 = vadd.f32 %v11412_v32, %v6114_v44  ;;  %v7889_v16 = vpop.f32.mrb[87].mxu1 }
 0x64d   : > { %6160 = vst [vmem:[%s11426_s26 + $0xa0] sm:$0xff] %v6138_v63  ;;  %v6139_v58 = vadd.f32 %v6115_v6, %v5870_v17 }
 0x64f   : > { %6161 = vst [vmem:[%s11426_s26 + $0xa8] sm:$0xff] %v6139_v58 }
 0x650   : > { %8342 = shalt.err (!%p8339_p6)
}
 0x651   : > { %s8343_s29 = scalar_lea.hbm %s11582_s14, 2816  ;;  %s8347_s21 = scalar_lea.hbm %s11650_s11, 11264 }
 0x652   : > { %p8344_p7 = scmp.ne.s32.totalorder %s11582_s14, %s8343_s29  ;;  %p8348_p11 = scmp.lt.u32.totalorder %s11582_s14, %s11650_s11 }
 0x653   : > { %p8349_p12 = scmp.lt.u32.totalorder %s8347_s21, %s8343_s29  ;;  %p8351_p0 = scmp.lt.u32.totalorder %s8343_s29, %s11582_s14 }
 0x654   : > { %p8345_p9 = pnand %p8344_p7, %p8542_p3 }
 0x655   : > { %p8350_p13 = por %p8349_p12, %p8348_p11 }
 0x656   : > { %p8346_p10 = pneg %p8345_p9 }
 0x657   : > { %p8352_p1 = por %p8351_p0, %p8350_p13 }
 0x659   : > { %p8353_p2 = pnand %p8352_p1, %p8346_p10 }
 0x65b   : > { %8356 = shalt.err (!%p8353_p2)
}
 0x65c   : > { %s8429_s28 = smov 128   ;;  %s8430_s22 = smov 8  }
 0x65d   : > { %8128 = dma.vmem_to_hbm [thread:$0]  (%p8542_p3), %s11576_s20, 2816, %s11582_s14, %s11587_s16, %s8429_s28, %s8429_s28, %s8430_s22  }
 0x65e PF: > { %p8134_p4 = scmp.ge.s32.totalorder %s8423_s24, 2  ;;  %s6193_s13 = sand.u32 1, %s8395_s17  }
 0x65f   : > { %s6194_s27 = scalar_lea.sflag [#allocation4], %s6193_s13 }
 0x660   : > { %p8131_p5 = pnand %p8134_p4, %p8551_p8 }
 0x662   : > { %8390 = dma.done.wait (!%p8131_p5), %s6194_s27, 2816  }
 0x663   : > { %8392 = vsyncadd (!%p8131_p5), %s6194_s27, 4294964480  ;;  %s24_s24 = sadd.s32 1, %s8423_s24   ;;  %s11933_s29 = sld [smem:[#allocation10_spill]] }
 0x664   : > { %p21_p6 = scmp.ge.s32.totalorder %s24_s24, 6   ;;  %s11934_s20 = sld [smem:[#allocation6_spill]] }
 0x665   : > { %s11935_s21 = sld [smem:[#allocation7_spill]]  ;;  %s11936_s22 = sld [smem:[#allocation8_spill]] }
 0x666   : > { %s11937_s23 = sld [smem:[#allocation9_spill]]  ;;  %s11938_s17 = smov %s8399_s18 }
 0x667   : > { %s11939_s18 = smov %s8403_s19  ;;  %23 = sbr.rel (!%p21_p6) target bundleno = 5 (0x5), region = 121 }
 0x669   : > { %s11940_s19 = smov %s11933_s29 }
 0x66e   :  { %6199 = vsyncpa [#allocation4], 1 }
 0x66f   :  { %6201 = vsyncpa [#allocation4 + $0x1], 1 }

</bundles_post_ra>
